<compile_context>
chip_gen: v7x
topology: tpu7x:2x2x1
jax: 0.10.0
libtpu: 0.0.40
codegen_flags: <defaults>
</compile_context>

<pallas_src>
import functools

import jax
import jax.numpy as jnp
from jax.experimental import pallas as pl
from jax.experimental.pallas import tpu as pltpu

HEAD_NUM = 4          # static model config (query_dims // head_num = head_dims)
NEG_BIG = -1e30       # finite stand-in for -inf (avoids NaN on fully-masked rows)
LN_EPS = 1e-5         # nn.LayerNorm default
LEAKY_SLOPE = 0.01    # nn.LeakyReLU default


# ---------------------------------------------------------------------------
# Single fused kernel: 3 x (QKV proj + attention + out proj + mask + residual
# + LayerNorm) followed by (FF + mask + residual + LayerNorm).
# ---------------------------------------------------------------------------

def _dual_dec_block_kernel(
    # activations / masks (per batch element)
    q_ref, k1_ref, k2_ref, qm_ref, bias_s_ref, bias_c1_ref, bias_c2_ref,
    # self-attention weights
    wq0_ref, bq0_ref, wkv0_ref, bkv0_ref, wo0_ref, bo0_ref, g0_ref, e0_ref,
    # cross-attention-1 weights
    wq1_ref, bq1_ref, wkv1_ref, bkv1_ref, wo1_ref, bo1_ref, g1_ref, e1_ref,
    # cross-attention-2 weights
    wq2_ref, bq2_ref, wkv2_ref, bkv2_ref, wo2_ref, bo2_ref, g2_ref, e2_ref,
    # feed-forward weights
    w1_ref, b1_ref, w2_ref, b2_ref, gf_ref, ef_ref,
    # output
    o_ref,
    # scratch
    ctx_ref,
    *, head_num, head_dims):

    hid = head_num * head_dims
    qm = qm_ref[...]                                    # (Lq, 1) f32, 1=token 0=pad

    def layer_norm(z, g, b):
        mu = jnp.mean(z, axis=-1, keepdims=True)
        var = jnp.mean((z - mu) ** 2, axis=-1, keepdims=True)
        return (z - mu) * jax.lax.rsqrt(var + LN_EPS) * g + b

    def res_attention(x, kv_in, bias, wq, bq, wkv, bkv, wo, bo, g, e):
        # x: (Lq, Dq) f32 residual input; kv_in: (Lk, Dk) f32;
        # bias: (Lq, Lk) f32 additive mask (key-pad [+ causal]).
        # Projections on MXU with bf16 operands, f32 accumulation.
        qp = jnp.dot(x.astype(jnp.bfloat16), wq[...],
                     preferred_element_type=jnp.float32) + bq[...]
        kvp = jnp.dot(kv_in.astype(jnp.bfloat16), wkv[...],
                      preferred_element_type=jnp.float32) + bkv[...]
        qp16 = qp.astype(jnp.bfloat16)
        kp16 = kvp[:, :hid].astype(jnp.bfloat16)
        vp16 = kvp[:, hid:].astype(jnp.bfloat16)
        for h in range(head_num):                       # static unroll over heads
            lo = h * head_dims
            hi = lo + head_dims
            s = jax.lax.dot_general(                    # (Lq, Lk) f32 scores
                qp16[:, lo:hi], kp16[:, lo:hi],
                (((1,), (1,)), ((), ())),
                preferred_element_type=jnp.float32)
            s = s + bias                                # one add: pad + causal mask
            m = jnp.max(s, axis=-1, keepdims=True)      # softmax in f32
            ez = jnp.exp(s - m)
            p = ez * pl.reciprocal(jnp.sum(ez, axis=-1, keepdims=True),
                                   approx=True)
            ctx_ref[:, lo:hi] = jnp.dot(                # write head ctx into scratch
                p.astype(jnp.bfloat16), vp16[:, lo:hi],
                preferred_element_type=jnp.float32)
        out = jnp.dot(ctx_ref[...].astype(jnp.bfloat16), wo[...],
                      preferred_element_type=jnp.float32) + bo[...]
        out = out * qm                                  # query-pad mask
        return layer_norm(out + x, g[...], e[...])      # residual + LN (f32)

    def res_ff(x):
        hdn = jnp.dot(x.astype(jnp.bfloat16), w1_ref[...],
                      preferred_element_type=jnp.float32) + b1_ref[...]
        hdn = jnp.where(hdn >= 0.0, hdn, LEAKY_SLOPE * hdn)     # LeakyReLU
        y = jnp.dot(hdn.astype(jnp.bfloat16), w2_ref[...],
                    preferred_element_type=jnp.float32) + b2_ref[...]
        y = y * qm
        return layer_norm(x + y, gf_ref[...], ef_ref[...])

    x = q_ref[...]                                      # (Lq, Dq) f32
    x = res_attention(x, x, bias_s_ref[...],
                      wq0_ref, bq0_ref, wkv0_ref, bkv0_ref,
                      wo0_ref, bo0_ref, g0_ref, e0_ref)
    x = res_attention(x, k1_ref[...], bias_c1_ref[...],
                      wq1_ref, bq1_ref, wkv1_ref, bkv1_ref,
                      wo1_ref, bo1_ref, g1_ref, e1_ref)
    x = res_attention(x, k2_ref[...], bias_c2_ref[...],
                      wq2_ref, bq2_ref, wkv2_ref, bkv2_ref,
                      wo2_ref, bo2_ref, g2_ref, e2_ref)
    o_ref[...] = res_ff(x)


# ---------------------------------------------------------------------------
# Wrapper: additive bias precompute + single pallas_call
# ---------------------------------------------------------------------------

def dual_dec_block_forward(params, query, key1, key2,
                           query_mask, key_mask1, key_mask2):
    B, Lq, Dq = query.shape
    Lk, Dk = key1.shape[1], key1.shape[2]
    p0, p1, p2 = params["self_att"], params["cross1"], params["cross2"]
    pf = params["res_ff"]
    hid = p0["wq"].shape[1]
    ff_hid = pf["w1"].shape[1]
    head_dims = hid // HEAD_NUM

    qm3 = query_mask.reshape(B, Lq, 1).astype(jnp.float32)

    # Additive attention biases (key-pad mask; + causal for self-attention),
    # precomputed once in the wrapper -> one VPU add per head in the kernel.
    def key_bias(mask):                                  # (B, 1, L)
        return jnp.where(mask.astype(jnp.float32)[:, None, :] < 0.5,
                         jnp.float32(NEG_BIG), jnp.float32(0.0))

    causal = jnp.where(jnp.triu(jnp.ones((Lq, Lq), jnp.float32), k=1) > 0,
                       jnp.float32(NEG_BIG), jnp.float32(0.0))
    bias_self = jnp.broadcast_to(key_bias(query_mask), (B, Lq, Lq)) + causal[None]
    bias_c1 = jnp.broadcast_to(key_bias(key_mask1), (B, Lq, Lk))
    bias_c2 = jnp.broadcast_to(key_bias(key_mask2), (B, Lq, Lk))

    def act3(L, D):                                      # per-batch activation block
        return pl.BlockSpec((None, L, D), lambda b: (b, 0, 0))

    def const2(r, c):                                    # constant-index weight block
        return pl.BlockSpec((r, c), lambda b: (0, 0))

    in_specs = [act3(Lq, Dq), act3(Lk, Dk), act3(Lk, Dk),
                act3(Lq, 1), act3(Lq, Lq), act3(Lq, Lk), act3(Lq, Lk)]
    args = [query, key1, key2, qm3, bias_self, bias_c1, bias_c2]
    for p in (p0, p1, p2):
        in_specs += [const2(*p["wq"].shape), const2(1, hid),
                     const2(*p["wkv"].shape), const2(1, 2 * hid),
                     const2(hid, Dq), const2(1, Dq),
                     const2(1, Dq), const2(1, Dq)]
        args += [p["wq"], p["bq"], p["wkv"], p["bkv"],
                 p["wo"], p["bo"], p["ln_g"], p["ln_b"]]
    in_specs += [const2(Dq, ff_hid), const2(1, ff_hid),
                 const2(ff_hid, Dq), const2(1, Dq),
                 const2(1, Dq), const2(1, Dq)]
    args += [pf["w1"], pf["b1"], pf["w2"], pf["b2"], pf["ln_g"], pf["ln_b"]]

    kern = functools.partial(_dual_dec_block_kernel,
                             head_num=HEAD_NUM, head_dims=head_dims)
    out = pl.pallas_call(
        kern,
        out_shape=jax.ShapeDtypeStruct((B, Lq, Dq), jnp.float32),
        grid=(B,),
        in_specs=in_specs,
        out_specs=pl.BlockSpec((None, Lq, Dq), lambda b: (b, 0, 0)),
        scratch_shapes=[pltpu.VMEM((Lq, hid), jnp.float32)],
        compiler_params=pltpu.CompilerParams(
            dimension_semantics=("parallel",),
            vmem_limit_bytes=32 * 1024 * 1024),
    )(*args)
    return out


# ---------------------------------------------------------------------------
# Parameter init (PyTorch layout) + one-time fusion / bf16 prep
# ---------------------------------------------------------------------------

def _dense(key, shape, scale=0.1):
    return jax.random.normal(key, shape, jnp.float32) * scale


def init_mha(key, q_dims, k_dims, head_num, head_dims):
    hid = head_num * head_dims
    ks = jax.random.split(key, 8)
    return dict(
        wq=_dense(ks[0], (q_dims, hid)), bq=_dense(ks[1], (1, hid)),
        wk=_dense(ks[2], (k_dims, hid)), bk=_dense(ks[3], (1, hid)),
        wv=_dense(ks[4], (k_dims, hid)), bv=_dense(ks[5], (1, hid)),
        wo=_dense(ks[6], (hid, q_dims)), bo=_dense(ks[7], (1, q_dims)),
    )


def init_res_mha(key, q_dims, k_dims, head_num, head_dims):
    return dict(
        mha=init_mha(key, q_dims, k_dims, head_num, head_dims),
        ln_g=jnp.ones((1, q_dims), jnp.float32),
        ln_b=jnp.zeros((1, q_dims), jnp.float32),
    )


def init_res_ff(key, in_dims, hid_dims):
    ks = jax.random.split(key, 4)
    return dict(
        w1=_dense(ks[0], (in_dims, hid_dims)), b1=_dense(ks[1], (1, hid_dims)),
        w2=_dense(ks[2], (hid_dims, in_dims)), b2=_dense(ks[3], (1, in_dims)),
        ln_g=jnp.ones((1, in_dims), jnp.float32),
        ln_b=jnp.zeros((1, in_dims), jnp.float32),
    )


def init_dual_dec_block(key, q_dims, k_dims, ff_hid, head_num):
    head_dims = q_dims // head_num
    ks = jax.random.split(key, 4)
    return dict(
        self_att=init_res_mha(ks[0], q_dims, q_dims, head_num, head_dims),
        cross1=init_res_mha(ks[1], q_dims, k_dims, head_num, head_dims),
        cross2=init_res_mha(ks[2], q_dims, k_dims, head_num, head_dims),
        res_ff=init_res_ff(ks[3], q_dims, ff_hid),
    )


def prepare_params(params, head_num):
    """One-time host-side prep: fold 1/sqrt(Dh) into wq/bq, fuse wk|wv,
    cast matmul weights to bf16 (biases / LN params stay f32)."""
    def prep_att(p):
        mha = p["mha"]
        hid = mha["wq"].shape[1]
        scale = float(hid // head_num) ** (-0.5)
        return dict(
            wq=(mha["wq"] * scale).astype(jnp.bfloat16),
            bq=mha["bq"] * scale,
            wkv=jnp.concatenate([mha["wk"], mha["wv"]], axis=1).astype(jnp.bfloat16),
            bkv=jnp.concatenate([mha["bk"], mha["bv"]], axis=1),
            wo=mha["wo"].astype(jnp.bfloat16), bo=mha["bo"],
            ln_g=p["ln_g"], ln_b=p["ln_b"],
        )
    ff = params["res_ff"]
    return dict(
        self_att=prep_att(params["self_att"]),
        cross1=prep_att(params["cross1"]),
        cross2=prep_att(params["cross2"]),
        res_ff=dict(w1=ff["w1"].astype(jnp.bfloat16), b1=ff["b1"],
                    w2=ff["w2"].astype(jnp.bfloat16), b2=ff["b2"],
                    ln_g=ff["ln_g"], ln_b=ff["ln_b"]),
    )


# ---------------------------------------------------------------------------

if __name__ == "__main__":
    B, Lq, Lk = 2, 8, 8
    QDIM, KDIM, FF_HID = 32, 32, 64

    root = jax.random.PRNGKey(0)
    k_inp, k_par = jax.random.split(root)
    kq, k1, k2 = jax.random.split(k_inp, 3)

    query = jax.random.normal(kq, (B, Lq, QDIM), jnp.float32)
    key1 = jax.random.normal(k1, (B, Lk, KDIM), jnp.float32)
    key2 = jax.random.normal(k2, (B, Lk, KDIM), jnp.float32)

    # masks: 1.0 = real token, 0.0 = pad (pad_idx == 0)
    query_mask = jnp.ones((B, Lq), jnp.float32).at[1, -1].set(0.0)
    key_mask1 = (jnp.ones((B, Lk), jnp.float32)
                 .at[0, -1].set(0.0)
                 .at[1, -2:].set(0.0))
    key_mask2 = jnp.ones((B, Lk), jnp.float32)

    raw_params = init_dual_dec_block(k_par, QDIM, KDIM, FF_HID, HEAD_NUM)
    params = jax.tree_util.tree_map(
        jax.block_until_ready, prepare_params(raw_params, HEAD_NUM))

    fwd = jax.jit(dual_dec_block_forward)
    out = fwd(params, query, key1, key2, query_mask, key_mask1, key_mask2)
    out = jax.block_until_ready(out)

    assert out.shape == (B, Lq, QDIM), out.shape
    assert bool(jnp.all(jnp.isfinite(out)))
    print("KERNEL_OK")
</pallas_src>

<mosaic_0001>
module attributes {stable_mosaic.version = 11 : i64} {
  func.func @_dual_dec_block_kernel(%arg0: i32, %arg1: memref<1x8x32xf32, #tpu.memory_space<vmem>>, %arg2: memref<1x8x32xf32, #tpu.memory_space<vmem>>, %arg3: memref<1x8x32xf32, #tpu.memory_space<vmem>>, %arg4: memref<1x8x1xf32, #tpu.memory_space<vmem>>, %arg5: memref<1x8x8xf32, #tpu.memory_space<vmem>>, %arg6: memref<1x8x8xf32, #tpu.memory_space<vmem>>, %arg7: memref<1x8x8xf32, #tpu.memory_space<vmem>>, %arg8: memref<32x32xbf16, #tpu.memory_space<vmem>>, %arg9: memref<1x32xf32, #tpu.memory_space<vmem>>, %arg10: memref<32x64xbf16, #tpu.memory_space<vmem>>, %arg11: memref<1x64xf32, #tpu.memory_space<vmem>>, %arg12: memref<32x32xbf16, #tpu.memory_space<vmem>>, %arg13: memref<1x32xf32, #tpu.memory_space<vmem>>, %arg14: memref<1x32xf32, #tpu.memory_space<vmem>>, %arg15: memref<1x32xf32, #tpu.memory_space<vmem>>, %arg16: memref<32x32xbf16, #tpu.memory_space<vmem>>, %arg17: memref<1x32xf32, #tpu.memory_space<vmem>>, %arg18: memref<32x64xbf16, #tpu.memory_space<vmem>>, %arg19: memref<1x64xf32, #tpu.memory_space<vmem>>, %arg20: memref<32x32xbf16, #tpu.memory_space<vmem>>, %arg21: memref<1x32xf32, #tpu.memory_space<vmem>>, %arg22: memref<1x32xf32, #tpu.memory_space<vmem>>, %arg23: memref<1x32xf32, #tpu.memory_space<vmem>>, %arg24: memref<32x32xbf16, #tpu.memory_space<vmem>>, %arg25: memref<1x32xf32, #tpu.memory_space<vmem>>, %arg26: memref<32x64xbf16, #tpu.memory_space<vmem>>, %arg27: memref<1x64xf32, #tpu.memory_space<vmem>>, %arg28: memref<32x32xbf16, #tpu.memory_space<vmem>>, %arg29: memref<1x32xf32, #tpu.memory_space<vmem>>, %arg30: memref<1x32xf32, #tpu.memory_space<vmem>>, %arg31: memref<1x32xf32, #tpu.memory_space<vmem>>, %arg32: memref<32x64xbf16, #tpu.memory_space<vmem>>, %arg33: memref<1x64xf32, #tpu.memory_space<vmem>>, %arg34: memref<64x32xbf16, #tpu.memory_space<vmem>>, %arg35: memref<1x32xf32, #tpu.memory_space<vmem>>, %arg36: memref<1x32xf32, #tpu.memory_space<vmem>>, %arg37: memref<1x32xf32, #tpu.memory_space<vmem>>, %arg38: memref<1x8x32xf32, #tpu.memory_space<vmem>>, %arg39: memref<8x32xf32, #tpu.memory_space<vmem>>) attributes {dimension_semantics = [#tpu.dimension_semantics<parallel>], iteration_bounds = array<i64: 2>, scalar_prefetch = 0 : i64, scratch_operands = 1 : i64, tpu.core_type = #tpu.core_type<tc>, window_params = [{transform_indices = @transform_0, window_bounds = array<i64: 1, 8, 32>}, {transform_indices = @transform_1, window_bounds = array<i64: 1, 8, 32>}, {transform_indices = @transform_2, window_bounds = array<i64: 1, 8, 32>}, {transform_indices = @transform_3, window_bounds = array<i64: 1, 8, 1>}, {transform_indices = @transform_4, window_bounds = array<i64: 1, 8, 8>}, {transform_indices = @transform_5, window_bounds = array<i64: 1, 8, 8>}, {transform_indices = @transform_6, window_bounds = array<i64: 1, 8, 8>}, {pipeline_mode = #tpu.pipeline_mode<synchronous>, transform_indices = @transform_7, window_bounds = array<i64: 32, 32>}, {pipeline_mode = #tpu.pipeline_mode<synchronous>, transform_indices = @transform_8, window_bounds = array<i64: 1, 32>}, {pipeline_mode = #tpu.pipeline_mode<synchronous>, transform_indices = @transform_9, window_bounds = array<i64: 32, 64>}, {pipeline_mode = #tpu.pipeline_mode<synchronous>, transform_indices = @transform_10, window_bounds = array<i64: 1, 64>}, {pipeline_mode = #tpu.pipeline_mode<synchronous>, transform_indices = @transform_11, window_bounds = array<i64: 32, 32>}, {pipeline_mode = #tpu.pipeline_mode<synchronous>, transform_indices = @transform_12, window_bounds = array<i64: 1, 32>}, {pipeline_mode = #tpu.pipeline_mode<synchronous>, transform_indices = @transform_13, window_bounds = array<i64: 1, 32>}, {pipeline_mode = #tpu.pipeline_mode<synchronous>, transform_indices = @transform_14, window_bounds = array<i64: 1, 32>}, {pipeline_mode = #tpu.pipeline_mode<synchronous>, transform_indices = @transform_15, window_bounds = array<i64: 32, 32>}, {pipeline_mode = #tpu.pipeline_mode<synchronous>, transform_indices = @transform_16, window_bounds = array<i64: 1, 32>}, {pipeline_mode = #tpu.pipeline_mode<synchronous>, transform_indices = @transform_17, window_bounds = array<i64: 32, 64>}, {pipeline_mode = #tpu.pipeline_mode<synchronous>, transform_indices = @transform_18, window_bounds = array<i64: 1, 64>}, {pipeline_mode = #tpu.pipeline_mode<synchronous>, transform_indices = @transform_19, window_bounds = array<i64: 32, 32>}, {pipeline_mode = #tpu.pipeline_mode<synchronous>, transform_indices = @transform_20, window_bounds = array<i64: 1, 32>}, {pipeline_mode = #tpu.pipeline_mode<synchronous>, transform_indices = @transform_21, window_bounds = array<i64: 1, 32>}, {pipeline_mode = #tpu.pipeline_mode<synchronous>, transform_indices = @transform_22, window_bounds = array<i64: 1, 32>}, {pipeline_mode = #tpu.pipeline_mode<synchronous>, transform_indices = @transform_23, window_bounds = array<i64: 32, 32>}, {pipeline_mode = #tpu.pipeline_mode<synchronous>, transform_indices = @transform_24, window_bounds = array<i64: 1, 32>}, {pipeline_mode = #tpu.pipeline_mode<synchronous>, transform_indices = @transform_25, window_bounds = array<i64: 32, 64>}, {pipeline_mode = #tpu.pipeline_mode<synchronous>, transform_indices = @transform_26, window_bounds = array<i64: 1, 64>}, {pipeline_mode = #tpu.pipeline_mode<synchronous>, transform_indices = @transform_27, window_bounds = array<i64: 32, 32>}, {pipeline_mode = #tpu.pipeline_mode<synchronous>, transform_indices = @transform_28, window_bounds = array<i64: 1, 32>}, {pipeline_mode = #tpu.pipeline_mode<synchronous>, transform_indices = @transform_29, window_bounds = array<i64: 1, 32>}, {pipeline_mode = #tpu.pipeline_mode<synchronous>, transform_indices = @transform_30, window_bounds = array<i64: 1, 32>}, {pipeline_mode = #tpu.pipeline_mode<synchronous>, transform_indices = @transform_31, window_bounds = array<i64: 32, 64>}, {pipeline_mode = #tpu.pipeline_mode<synchronous>, transform_indices = @transform_32, window_bounds = array<i64: 1, 64>}, {pipeline_mode = #tpu.pipeline_mode<synchronous>, transform_indices = @transform_33, window_bounds = array<i64: 64, 32>}, {pipeline_mode = #tpu.pipeline_mode<synchronous>, transform_indices = @transform_34, window_bounds = array<i64: 1, 32>}, {pipeline_mode = #tpu.pipeline_mode<synchronous>, transform_indices = @transform_35, window_bounds = array<i64: 1, 32>}, {pipeline_mode = #tpu.pipeline_mode<synchronous>, transform_indices = @transform_36, window_bounds = array<i64: 1, 32>}, {transform_indices = @transform_37, window_bounds = array<i64: 1, 8, 32>}]} {
    %c0 = arith.constant 0 : index
    %c0_0 = arith.constant 0 : index
    %c0_1 = arith.constant 0 : index
    %0 = vector.load %arg4[%c0, %c0_0, %c0_1] : memref<1x8x1xf32, #tpu.memory_space<vmem>>, vector<1x8x1xf32>
    %1 = vector.shape_cast %0 : vector<1x8x1xf32> to vector<8x1xf32>
    %c0_2 = arith.constant 0 : index
    %c0_3 = arith.constant 0 : index
    %c0_4 = arith.constant 0 : index
    %2 = vector.load %arg1[%c0_2, %c0_3, %c0_4] : memref<1x8x32xf32, #tpu.memory_space<vmem>>, vector<1x8x32xf32>
    %3 = vector.shape_cast %2 : vector<1x8x32xf32> to vector<8x32xf32>
    %c0_5 = arith.constant 0 : index
    %c0_6 = arith.constant 0 : index
    %c0_7 = arith.constant 0 : index
    %4 = vector.load %arg5[%c0_5, %c0_6, %c0_7] : memref<1x8x8xf32, #tpu.memory_space<vmem>>, vector<1x8x8xf32>
    %5 = vector.shape_cast %4 : vector<1x8x8xf32> to vector<8x8xf32>
    %6 = arith.truncf %3 : vector<8x32xf32> to vector<8x32xbf16>
    %c0_8 = arith.constant 0 : index
    %c0_9 = arith.constant 0 : index
    %7 = vector.load %arg8[%c0_8, %c0_9] : memref<32x32xbf16, #tpu.memory_space<vmem>>, vector<32x32xbf16>
    %cst = arith.constant dense<0.000000e+00> : vector<8x32xf32>
    %8 = tpu.matmul %6, %7, %cst {dimension_numbers = #tpu.dot_dimension_numbers<[1], [0], [0], [1], [0, 0, 1, 1], [], []>} : vector<8x32xbf16>, vector<32x32xbf16>, vector<8x32xf32> -> vector<8x32xf32>
    %c0_10 = arith.constant 0 : index
    %c0_11 = arith.constant 0 : index
    %9 = vector.load %arg9[%c0_10, %c0_11] : memref<1x32xf32, #tpu.memory_space<vmem>>, vector<1x32xf32>
    %10 = vector.broadcast %9 : vector<1x32xf32> to vector<8x32xf32>
    %11 = arith.addf %8, %10 : vector<8x32xf32>
    %12 = arith.truncf %3 : vector<8x32xf32> to vector<8x32xbf16>
    %c0_12 = arith.constant 0 : index
    %c0_13 = arith.constant 0 : index
    %13 = vector.load %arg10[%c0_12, %c0_13] : memref<32x64xbf16, #tpu.memory_space<vmem>>, vector<32x64xbf16>
    %cst_14 = arith.constant dense<0.000000e+00> : vector<8x64xf32>
    %14 = tpu.matmul %12, %13, %cst_14 {dimension_numbers = #tpu.dot_dimension_numbers<[1], [0], [0], [1], [0, 0, 1, 1], [], []>} : vector<8x32xbf16>, vector<32x64xbf16>, vector<8x64xf32> -> vector<8x64xf32>
    %c0_15 = arith.constant 0 : index
    %c0_16 = arith.constant 0 : index
    %15 = vector.load %arg11[%c0_15, %c0_16] : memref<1x64xf32, #tpu.memory_space<vmem>>, vector<1x64xf32>
    %16 = vector.broadcast %15 : vector<1x64xf32> to vector<8x64xf32>
    %17 = arith.addf %14, %16 : vector<8x64xf32>
    %18 = arith.truncf %11 : vector<8x32xf32> to vector<8x32xbf16>
    %19 = vector.extract_strided_slice %17 {offsets = [0, 0], sizes = [8, 32], strides = [1, 1]} : vector<8x64xf32> to vector<8x32xf32>
    %20 = arith.truncf %19 : vector<8x32xf32> to vector<8x32xbf16>
    %21 = vector.extract_strided_slice %17 {offsets = [0, 32], sizes = [8, 32], strides = [1, 1]} : vector<8x64xf32> to vector<8x32xf32>
    %22 = arith.truncf %21 : vector<8x32xf32> to vector<8x32xbf16>
    %23 = vector.extract_strided_slice %18 {offsets = [0, 0], sizes = [8, 8], strides = [1, 1]} : vector<8x32xbf16> to vector<8x8xbf16>
    %24 = vector.extract_strided_slice %20 {offsets = [0, 0], sizes = [8, 8], strides = [1, 1]} : vector<8x32xbf16> to vector<8x8xbf16>
    %cst_17 = arith.constant dense<0.000000e+00> : vector<8x8xf32>
    %25 = tpu.matmul %23, %24, %cst_17 {dimension_numbers = #tpu.dot_dimension_numbers<[1], [1], [0], [0], [0, 0, 1, 0], [], []>} : vector<8x8xbf16>, vector<8x8xbf16>, vector<8x8xf32> -> vector<8x8xf32>
    %26 = arith.addf %25, %5 : vector<8x8xf32>
    %cst_18 = arith.constant dense<0xFF800000> : vector<8xf32>
    %27 = vector.multi_reduction <maximumf>, %26, %cst_18 [1] : vector<8x8xf32> to vector<8xf32>
    %28 = vector.shape_cast %27 : vector<8xf32> to vector<8x1xf32>
    %29 = vector.broadcast %28 : vector<8x1xf32> to vector<8x8xf32>
    %30 = arith.subf %26, %29 : vector<8x8xf32>
    %31 = math.exp %30 : vector<8x8xf32>
    %cst_19 = arith.constant dense<0.000000e+00> : vector<8xf32>
    %32 = vector.multi_reduction <add>, %31, %cst_19 [1] : vector<8x8xf32> to vector<8xf32>
    %33 = vector.shape_cast %32 : vector<8xf32> to vector<8x1xf32>
    %34 = tpu.reciprocal %33 {approx = true} : vector<8x1xf32> -> vector<8x1xf32>
    %35 = vector.broadcast %34 : vector<8x1xf32> to vector<8x8xf32>
    %36 = arith.mulf %31, %35 : vector<8x8xf32>
    %37 = arith.truncf %36 : vector<8x8xf32> to vector<8x8xbf16>
    %38 = vector.extract_strided_slice %22 {offsets = [0, 0], sizes = [8, 8], strides = [1, 1]} : vector<8x32xbf16> to vector<8x8xbf16>
    %cst_20 = arith.constant dense<0.000000e+00> : vector<8x8xf32>
    %39 = tpu.matmul %37, %38, %cst_20 {dimension_numbers = #tpu.dot_dimension_numbers<[1], [0], [0], [1], [0, 0, 1, 1], [], []>} : vector<8x8xbf16>, vector<8x8xbf16>, vector<8x8xf32> -> vector<8x8xf32>
    %c0_21 = arith.constant 0 : index
    %c0_22 = arith.constant 0 : index
    %40 = vector.load %arg39[%c0_21, %c0_22] : memref<8x32xf32, #tpu.memory_space<vmem>>, vector<8x8xf32>
    tpu.vector_store %arg39[%c0_21, %c0_22], %39 {strides = array<i32>} : memref<8x32xf32, #tpu.memory_space<vmem>>, vector<8x8xf32>,
    %41 = vector.extract_strided_slice %18 {offsets = [0, 8], sizes = [8, 8], strides = [1, 1]} : vector<8x32xbf16> to vector<8x8xbf16>
    %42 = vector.extract_strided_slice %20 {offsets = [0, 8], sizes = [8, 8], strides = [1, 1]} : vector<8x32xbf16> to vector<8x8xbf16>
    %cst_23 = arith.constant dense<0.000000e+00> : vector<8x8xf32>
    %43 = tpu.matmul %41, %42, %cst_23 {dimension_numbers = #tpu.dot_dimension_numbers<[1], [1], [0], [0], [0, 0, 1, 0], [], []>} : vector<8x8xbf16>, vector<8x8xbf16>, vector<8x8xf32> -> vector<8x8xf32>
    %44 = arith.addf %43, %5 : vector<8x8xf32>
    %cst_24 = arith.constant dense<0xFF800000> : vector<8xf32>
    %45 = vector.multi_reduction <maximumf>, %44, %cst_24 [1] : vector<8x8xf32> to vector<8xf32>
    %46 = vector.shape_cast %45 : vector<8xf32> to vector<8x1xf32>
    %47 = vector.broadcast %46 : vector<8x1xf32> to vector<8x8xf32>
    %48 = arith.subf %44, %47 : vector<8x8xf32>
    %49 = math.exp %48 : vector<8x8xf32>
    %cst_25 = arith.constant dense<0.000000e+00> : vector<8xf32>
    %50 = vector.multi_reduction <add>, %49, %cst_25 [1] : vector<8x8xf32> to vector<8xf32>
    %51 = vector.shape_cast %50 : vector<8xf32> to vector<8x1xf32>
    %52 = tpu.reciprocal %51 {approx = true} : vector<8x1xf32> -> vector<8x1xf32>
    %53 = vector.broadcast %52 : vector<8x1xf32> to vector<8x8xf32>
    %54 = arith.mulf %49, %53 : vector<8x8xf32>
    %55 = arith.truncf %54 : vector<8x8xf32> to vector<8x8xbf16>
    %56 = vector.extract_strided_slice %22 {offsets = [0, 8], sizes = [8, 8], strides = [1, 1]} : vector<8x32xbf16> to vector<8x8xbf16>
    %cst_26 = arith.constant dense<0.000000e+00> : vector<8x8xf32>
    %57 = tpu.matmul %55, %56, %cst_26 {dimension_numbers = #tpu.dot_dimension_numbers<[1], [0], [0], [1], [0, 0, 1, 1], [], []>} : vector<8x8xbf16>, vector<8x8xbf16>, vector<8x8xf32> -> vector<8x8xf32>
    %c0_27 = arith.constant 0 : index
    %c8 = arith.constant 8 : index
    %58 = vector.load %arg39[%c0_27, %c8] : memref<8x32xf32, #tpu.memory_space<vmem>>, vector<8x8xf32>
    tpu.vector_store %arg39[%c0_27, %c8], %57 {strides = array<i32>} : memref<8x32xf32, #tpu.memory_space<vmem>>, vector<8x8xf32>,
    %59 = vector.extract_strided_slice %18 {offsets = [0, 16], sizes = [8, 8], strides = [1, 1]} : vector<8x32xbf16> to vector<8x8xbf16>
    %60 = vector.extract_strided_slice %20 {offsets = [0, 16], sizes = [8, 8], strides = [1, 1]} : vector<8x32xbf16> to vector<8x8xbf16>
    %cst_28 = arith.constant dense<0.000000e+00> : vector<8x8xf32>
    %61 = tpu.matmul %59, %60, %cst_28 {dimension_numbers = #tpu.dot_dimension_numbers<[1], [1], [0], [0], [0, 0, 1, 0], [], []>} : vector<8x8xbf16>, vector<8x8xbf16>, vector<8x8xf32> -> vector<8x8xf32>
    %62 = arith.addf %61, %5 : vector<8x8xf32>
    %cst_29 = arith.constant dense<0xFF800000> : vector<8xf32>
    %63 = vector.multi_reduction <maximumf>, %62, %cst_29 [1] : vector<8x8xf32> to vector<8xf32>
    %64 = vector.shape_cast %63 : vector<8xf32> to vector<8x1xf32>
    %65 = vector.broadcast %64 : vector<8x1xf32> to vector<8x8xf32>
    %66 = arith.subf %62, %65 : vector<8x8xf32>
    %67 = math.exp %66 : vector<8x8xf32>
    %cst_30 = arith.constant dense<0.000000e+00> : vector<8xf32>
    %68 = vector.multi_reduction <add>, %67, %cst_30 [1] : vector<8x8xf32> to vector<8xf32>
    %69 = vector.shape_cast %68 : vector<8xf32> to vector<8x1xf32>
    %70 = tpu.reciprocal %69 {approx = true} : vector<8x1xf32> -> vector<8x1xf32>
    %71 = vector.broadcast %70 : vector<8x1xf32> to vector<8x8xf32>
    %72 = arith.mulf %67, %71 : vector<8x8xf32>
    %73 = arith.truncf %72 : vector<8x8xf32> to vector<8x8xbf16>
    %74 = vector.extract_strided_slice %22 {offsets = [0, 16], sizes = [8, 8], strides = [1, 1]} : vector<8x32xbf16> to vector<8x8xbf16>
    %cst_31 = arith.constant dense<0.000000e+00> : vector<8x8xf32>
    %75 = tpu.matmul %73, %74, %cst_31 {dimension_numbers = #tpu.dot_dimension_numbers<[1], [0], [0], [1], [0, 0, 1, 1], [], []>} : vector<8x8xbf16>, vector<8x8xbf16>, vector<8x8xf32> -> vector<8x8xf32>
    %c0_32 = arith.constant 0 : index
    %c16 = arith.constant 16 : index
    %76 = vector.load %arg39[%c0_32, %c16] : memref<8x32xf32, #tpu.memory_space<vmem>>, vector<8x8xf32>
    tpu.vector_store %arg39[%c0_32, %c16], %75 {strides = array<i32>} : memref<8x32xf32, #tpu.memory_space<vmem>>, vector<8x8xf32>,
    %77 = vector.extract_strided_slice %18 {offsets = [0, 24], sizes = [8, 8], strides = [1, 1]} : vector<8x32xbf16> to vector<8x8xbf16>
    %78 = vector.extract_strided_slice %20 {offsets = [0, 24], sizes = [8, 8], strides = [1, 1]} : vector<8x32xbf16> to vector<8x8xbf16>
    %cst_33 = arith.constant dense<0.000000e+00> : vector<8x8xf32>
    %79 = tpu.matmul %77, %78, %cst_33 {dimension_numbers = #tpu.dot_dimension_numbers<[1], [1], [0], [0], [0, 0, 1, 0], [], []>} : vector<8x8xbf16>, vector<8x8xbf16>, vector<8x8xf32> -> vector<8x8xf32>
    %80 = arith.addf %79, %5 : vector<8x8xf32>
    %cst_34 = arith.constant dense<0xFF800000> : vector<8xf32>
    %81 = vector.multi_reduction <maximumf>, %80, %cst_34 [1] : vector<8x8xf32> to vector<8xf32>
    %82 = vector.shape_cast %81 : vector<8xf32> to vector<8x1xf32>
    %83 = vector.broadcast %82 : vector<8x1xf32> to vector<8x8xf32>
    %84 = arith.subf %80, %83 : vector<8x8xf32>
    %85 = math.exp %84 : vector<8x8xf32>
    %cst_35 = arith.constant dense<0.000000e+00> : vector<8xf32>
    %86 = vector.multi_reduction <add>, %85, %cst_35 [1] : vector<8x8xf32> to vector<8xf32>
    %87 = vector.shape_cast %86 : vector<8xf32> to vector<8x1xf32>
    %88 = tpu.reciprocal %87 {approx = true} : vector<8x1xf32> -> vector<8x1xf32>
    %89 = vector.broadcast %88 : vector<8x1xf32> to vector<8x8xf32>
    %90 = arith.mulf %85, %89 : vector<8x8xf32>
    %91 = arith.truncf %90 : vector<8x8xf32> to vector<8x8xbf16>
    %92 = vector.extract_strided_slice %22 {offsets = [0, 24], sizes = [8, 8], strides = [1, 1]} : vector<8x32xbf16> to vector<8x8xbf16>
    %cst_36 = arith.constant dense<0.000000e+00> : vector<8x8xf32>
    %93 = tpu.matmul %91, %92, %cst_36 {dimension_numbers = #tpu.dot_dimension_numbers<[1], [0], [0], [1], [0, 0, 1, 1], [], []>} : vector<8x8xbf16>, vector<8x8xbf16>, vector<8x8xf32> -> vector<8x8xf32>
    %c0_37 = arith.constant 0 : index
    %c24 = arith.constant 24 : index
    %94 = vector.load %arg39[%c0_37, %c24] : memref<8x32xf32, #tpu.memory_space<vmem>>, vector<8x8xf32>
    tpu.vector_store %arg39[%c0_37, %c24], %93 {strides = array<i32>} : memref<8x32xf32, #tpu.memory_space<vmem>>, vector<8x8xf32>,
    %c0_38 = arith.constant 0 : index
    %c0_39 = arith.constant 0 : index
    %95 = vector.load %arg39[%c0_38, %c0_39] : memref<8x32xf32, #tpu.memory_space<vmem>>, vector<8x32xf32>
    %96 = arith.truncf %95 : vector<8x32xf32> to vector<8x32xbf16>
    %c0_40 = arith.constant 0 : index
    %c0_41 = arith.constant 0 : index
    %97 = vector.load %arg12[%c0_40, %c0_41] : memref<32x32xbf16, #tpu.memory_space<vmem>>, vector<32x32xbf16>
    %cst_42 = arith.constant dense<0.000000e+00> : vector<8x32xf32>
    %98 = tpu.matmul %96, %97, %cst_42 {dimension_numbers = #tpu.dot_dimension_numbers<[1], [0], [0], [1], [0, 0, 1, 1], [], []>} : vector<8x32xbf16>, vector<32x32xbf16>, vector<8x32xf32> -> vector<8x32xf32>
    %c0_43 = arith.constant 0 : index
    %c0_44 = arith.constant 0 : index
    %99 = vector.load %arg13[%c0_43, %c0_44] : memref<1x32xf32, #tpu.memory_space<vmem>>, vector<1x32xf32>
    %100 = vector.broadcast %99 : vector<1x32xf32> to vector<8x32xf32>
    %101 = arith.addf %98, %100 : vector<8x32xf32>
    %102 = vector.broadcast %1 : vector<8x1xf32> to vector<8x32xf32>
    %103 = arith.mulf %101, %102 : vector<8x32xf32>
    %104 = arith.addf %103, %3 : vector<8x32xf32>
    %c0_45 = arith.constant 0 : index
    %c0_46 = arith.constant 0 : index
    %105 = vector.load %arg14[%c0_45, %c0_46] : memref<1x32xf32, #tpu.memory_space<vmem>>, vector<1x32xf32>
    %c0_47 = arith.constant 0 : index
    %c0_48 = arith.constant 0 : index
    %106 = vector.load %arg15[%c0_47, %c0_48] : memref<1x32xf32, #tpu.memory_space<vmem>>, vector<1x32xf32>
    %cst_49 = arith.constant dense<0.000000e+00> : vector<8xf32>
    %107 = vector.multi_reduction <add>, %104, %cst_49 [1] : vector<8x32xf32> to vector<8xf32>
    %108 = vector.shape_cast %107 : vector<8xf32> to vector<8x1xf32>
    %cst_50 = arith.constant 3.200000e+01 : f32
    %109 = vector.broadcast %cst_50 : f32 to vector<8x1xf32>
    %110 = arith.divf %108, %109 : vector<8x1xf32>
    %111 = vector.broadcast %110 : vector<8x1xf32> to vector<8x32xf32>
    %112 = arith.subf %104, %111 : vector<8x32xf32>
    %113 = arith.mulf %112, %112 : vector<8x32xf32>
    %cst_51 = arith.constant dense<0.000000e+00> : vector<8xf32>
    %114 = vector.multi_reduction <add>, %113, %cst_51 [1] : vector<8x32xf32> to vector<8xf32>
    %115 = vector.shape_cast %114 : vector<8xf32> to vector<8x1xf32>
    %cst_52 = arith.constant 3.200000e+01 : f32
    %116 = vector.broadcast %cst_52 : f32 to vector<8x1xf32>
    %117 = arith.divf %115, %116 : vector<8x1xf32>
    %118 = vector.broadcast %110 : vector<8x1xf32> to vector<8x32xf32>
    %119 = arith.subf %104, %118 : vector<8x32xf32>
    %cst_53 = arith.constant 9.99999974E-6 : f32
    %120 = vector.broadcast %cst_53 : f32 to vector<8x1xf32>
    %121 = arith.addf %117, %120 : vector<8x1xf32>
    %122 = math.rsqrt %121 : vector<8x1xf32>
    %123 = vector.broadcast %122 : vector<8x1xf32> to vector<8x32xf32>
    %124 = arith.mulf %119, %123 : vector<8x32xf32>
    %125 = vector.broadcast %105 : vector<1x32xf32> to vector<8x32xf32>
    %126 = arith.mulf %124, %125 : vector<8x32xf32>
    %127 = vector.broadcast %106 : vector<1x32xf32> to vector<8x32xf32>
    %128 = arith.addf %126, %127 : vector<8x32xf32>
    %c0_54 = arith.constant 0 : index
    %c0_55 = arith.constant 0 : index
    %c0_56 = arith.constant 0 : index
    %129 = vector.load %arg2[%c0_54, %c0_55, %c0_56] : memref<1x8x32xf32, #tpu.memory_space<vmem>>, vector<1x8x32xf32>
    %130 = vector.shape_cast %129 : vector<1x8x32xf32> to vector<8x32xf32>
    %c0_57 = arith.constant 0 : index
    %c0_58 = arith.constant 0 : index
    %c0_59 = arith.constant 0 : index
    %131 = vector.load %arg6[%c0_57, %c0_58, %c0_59] : memref<1x8x8xf32, #tpu.memory_space<vmem>>, vector<1x8x8xf32>
    %132 = vector.shape_cast %131 : vector<1x8x8xf32> to vector<8x8xf32>
    %133 = arith.truncf %128 : vector<8x32xf32> to vector<8x32xbf16>
    %c0_60 = arith.constant 0 : index
    %c0_61 = arith.constant 0 : index
    %134 = vector.load %arg16[%c0_60, %c0_61] : memref<32x32xbf16, #tpu.memory_space<vmem>>, vector<32x32xbf16>
    %cst_62 = arith.constant dense<0.000000e+00> : vector<8x32xf32>
    %135 = tpu.matmul %133, %134, %cst_62 {dimension_numbers = #tpu.dot_dimension_numbers<[1], [0], [0], [1], [0, 0, 1, 1], [], []>} : vector<8x32xbf16>, vector<32x32xbf16>, vector<8x32xf32> -> vector<8x32xf32>
    %c0_63 = arith.constant 0 : index
    %c0_64 = arith.constant 0 : index
    %136 = vector.load %arg17[%c0_63, %c0_64] : memref<1x32xf32, #tpu.memory_space<vmem>>, vector<1x32xf32>
    %137 = vector.broadcast %136 : vector<1x32xf32> to vector<8x32xf32>
    %138 = arith.addf %135, %137 : vector<8x32xf32>
    %139 = arith.truncf %130 : vector<8x32xf32> to vector<8x32xbf16>
    %c0_65 = arith.constant 0 : index
    %c0_66 = arith.constant 0 : index
    %140 = vector.load %arg18[%c0_65, %c0_66] : memref<32x64xbf16, #tpu.memory_space<vmem>>, vector<32x64xbf16>
    %cst_67 = arith.constant dense<0.000000e+00> : vector<8x64xf32>
    %141 = tpu.matmul %139, %140, %cst_67 {dimension_numbers = #tpu.dot_dimension_numbers<[1], [0], [0], [1], [0, 0, 1, 1], [], []>} : vector<8x32xbf16>, vector<32x64xbf16>, vector<8x64xf32> -> vector<8x64xf32>
    %c0_68 = arith.constant 0 : index
    %c0_69 = arith.constant 0 : index
    %142 = vector.load %arg19[%c0_68, %c0_69] : memref<1x64xf32, #tpu.memory_space<vmem>>, vector<1x64xf32>
    %143 = vector.broadcast %142 : vector<1x64xf32> to vector<8x64xf32>
    %144 = arith.addf %141, %143 : vector<8x64xf32>
    %145 = arith.truncf %138 : vector<8x32xf32> to vector<8x32xbf16>
    %146 = vector.extract_strided_slice %144 {offsets = [0, 0], sizes = [8, 32], strides = [1, 1]} : vector<8x64xf32> to vector<8x32xf32>
    %147 = arith.truncf %146 : vector<8x32xf32> to vector<8x32xbf16>
    %148 = vector.extract_strided_slice %144 {offsets = [0, 32], sizes = [8, 32], strides = [1, 1]} : vector<8x64xf32> to vector<8x32xf32>
    %149 = arith.truncf %148 : vector<8x32xf32> to vector<8x32xbf16>
    %150 = vector.extract_strided_slice %145 {offsets = [0, 0], sizes = [8, 8], strides = [1, 1]} : vector<8x32xbf16> to vector<8x8xbf16>
    %151 = vector.extract_strided_slice %147 {offsets = [0, 0], sizes = [8, 8], strides = [1, 1]} : vector<8x32xbf16> to vector<8x8xbf16>
    %cst_70 = arith.constant dense<0.000000e+00> : vector<8x8xf32>
    %152 = tpu.matmul %150, %151, %cst_70 {dimension_numbers = #tpu.dot_dimension_numbers<[1], [1], [0], [0], [0, 0, 1, 0], [], []>} : vector<8x8xbf16>, vector<8x8xbf16>, vector<8x8xf32> -> vector<8x8xf32>
    %153 = arith.addf %152, %132 : vector<8x8xf32>
    %cst_71 = arith.constant dense<0xFF800000> : vector<8xf32>
    %154 = vector.multi_reduction <maximumf>, %153, %cst_71 [1] : vector<8x8xf32> to vector<8xf32>
    %155 = vector.shape_cast %154 : vector<8xf32> to vector<8x1xf32>
    %156 = vector.broadcast %155 : vector<8x1xf32> to vector<8x8xf32>
    %157 = arith.subf %153, %156 : vector<8x8xf32>
    %158 = math.exp %157 : vector<8x8xf32>
    %cst_72 = arith.constant dense<0.000000e+00> : vector<8xf32>
    %159 = vector.multi_reduction <add>, %158, %cst_72 [1] : vector<8x8xf32> to vector<8xf32>
    %160 = vector.shape_cast %159 : vector<8xf32> to vector<8x1xf32>
    %161 = tpu.reciprocal %160 {approx = true} : vector<8x1xf32> -> vector<8x1xf32>
    %162 = vector.broadcast %161 : vector<8x1xf32> to vector<8x8xf32>
    %163 = arith.mulf %158, %162 : vector<8x8xf32>
    %164 = arith.truncf %163 : vector<8x8xf32> to vector<8x8xbf16>
    %165 = vector.extract_strided_slice %149 {offsets = [0, 0], sizes = [8, 8], strides = [1, 1]} : vector<8x32xbf16> to vector<8x8xbf16>
    %cst_73 = arith.constant dense<0.000000e+00> : vector<8x8xf32>
    %166 = tpu.matmul %164, %165, %cst_73 {dimension_numbers = #tpu.dot_dimension_numbers<[1], [0], [0], [1], [0, 0, 1, 1], [], []>} : vector<8x8xbf16>, vector<8x8xbf16>, vector<8x8xf32> -> vector<8x8xf32>
    %c0_74 = arith.constant 0 : index
    %c0_75 = arith.constant 0 : index
    %167 = vector.load %arg39[%c0_74, %c0_75] : memref<8x32xf32, #tpu.memory_space<vmem>>, vector<8x8xf32>
    tpu.vector_store %arg39[%c0_74, %c0_75], %166 {strides = array<i32>} : memref<8x32xf32, #tpu.memory_space<vmem>>, vector<8x8xf32>,
    %168 = vector.extract_strided_slice %145 {offsets = [0, 8], sizes = [8, 8], strides = [1, 1]} : vector<8x32xbf16> to vector<8x8xbf16>
    %169 = vector.extract_strided_slice %147 {offsets = [0, 8], sizes = [8, 8], strides = [1, 1]} : vector<8x32xbf16> to vector<8x8xbf16>
    %cst_76 = arith.constant dense<0.000000e+00> : vector<8x8xf32>
    %170 = tpu.matmul %168, %169, %cst_76 {dimension_numbers = #tpu.dot_dimension_numbers<[1], [1], [0], [0], [0, 0, 1, 0], [], []>} : vector<8x8xbf16>, vector<8x8xbf16>, vector<8x8xf32> -> vector<8x8xf32>
    %171 = arith.addf %170, %132 : vector<8x8xf32>
    %cst_77 = arith.constant dense<0xFF800000> : vector<8xf32>
    %172 = vector.multi_reduction <maximumf>, %171, %cst_77 [1] : vector<8x8xf32> to vector<8xf32>
    %173 = vector.shape_cast %172 : vector<8xf32> to vector<8x1xf32>
    %174 = vector.broadcast %173 : vector<8x1xf32> to vector<8x8xf32>
    %175 = arith.subf %171, %174 : vector<8x8xf32>
    %176 = math.exp %175 : vector<8x8xf32>
    %cst_78 = arith.constant dense<0.000000e+00> : vector<8xf32>
    %177 = vector.multi_reduction <add>, %176, %cst_78 [1] : vector<8x8xf32> to vector<8xf32>
    %178 = vector.shape_cast %177 : vector<8xf32> to vector<8x1xf32>
    %179 = tpu.reciprocal %178 {approx = true} : vector<8x1xf32> -> vector<8x1xf32>
    %180 = vector.broadcast %179 : vector<8x1xf32> to vector<8x8xf32>
    %181 = arith.mulf %176, %180 : vector<8x8xf32>
    %182 = arith.truncf %181 : vector<8x8xf32> to vector<8x8xbf16>
    %183 = vector.extract_strided_slice %149 {offsets = [0, 8], sizes = [8, 8], strides = [1, 1]} : vector<8x32xbf16> to vector<8x8xbf16>
    %cst_79 = arith.constant dense<0.000000e+00> : vector<8x8xf32>
    %184 = tpu.matmul %182, %183, %cst_79 {dimension_numbers = #tpu.dot_dimension_numbers<[1], [0], [0], [1], [0, 0, 1, 1], [], []>} : vector<8x8xbf16>, vector<8x8xbf16>, vector<8x8xf32> -> vector<8x8xf32>
    %c0_80 = arith.constant 0 : index
    %c8_81 = arith.constant 8 : index
    %185 = vector.load %arg39[%c0_80, %c8_81] : memref<8x32xf32, #tpu.memory_space<vmem>>, vector<8x8xf32>
    tpu.vector_store %arg39[%c0_80, %c8_81], %184 {strides = array<i32>} : memref<8x32xf32, #tpu.memory_space<vmem>>, vector<8x8xf32>,
    %186 = vector.extract_strided_slice %145 {offsets = [0, 16], sizes = [8, 8], strides = [1, 1]} : vector<8x32xbf16> to vector<8x8xbf16>
    %187 = vector.extract_strided_slice %147 {offsets = [0, 16], sizes = [8, 8], strides = [1, 1]} : vector<8x32xbf16> to vector<8x8xbf16>
    %cst_82 = arith.constant dense<0.000000e+00> : vector<8x8xf32>
    %188 = tpu.matmul %186, %187, %cst_82 {dimension_numbers = #tpu.dot_dimension_numbers<[1], [1], [0], [0], [0, 0, 1, 0], [], []>} : vector<8x8xbf16>, vector<8x8xbf16>, vector<8x8xf32> -> vector<8x8xf32>
    %189 = arith.addf %188, %132 : vector<8x8xf32>
    %cst_83 = arith.constant dense<0xFF800000> : vector<8xf32>
    %190 = vector.multi_reduction <maximumf>, %189, %cst_83 [1] : vector<8x8xf32> to vector<8xf32>
    %191 = vector.shape_cast %190 : vector<8xf32> to vector<8x1xf32>
    %192 = vector.broadcast %191 : vector<8x1xf32> to vector<8x8xf32>
    %193 = arith.subf %189, %192 : vector<8x8xf32>
    %194 = math.exp %193 : vector<8x8xf32>
    %cst_84 = arith.constant dense<0.000000e+00> : vector<8xf32>
    %195 = vector.multi_reduction <add>, %194, %cst_84 [1] : vector<8x8xf32> to vector<8xf32>
    %196 = vector.shape_cast %195 : vector<8xf32> to vector<8x1xf32>
    %197 = tpu.reciprocal %196 {approx = true} : vector<8x1xf32> -> vector<8x1xf32>
    %198 = vector.broadcast %197 : vector<8x1xf32> to vector<8x8xf32>
    %199 = arith.mulf %194, %198 : vector<8x8xf32>
    %200 = arith.truncf %199 : vector<8x8xf32> to vector<8x8xbf16>
    %201 = vector.extract_strided_slice %149 {offsets = [0, 16], sizes = [8, 8], strides = [1, 1]} : vector<8x32xbf16> to vector<8x8xbf16>
    %cst_85 = arith.constant dense<0.000000e+00> : vector<8x8xf32>
    %202 = tpu.matmul %200, %201, %cst_85 {dimension_numbers = #tpu.dot_dimension_numbers<[1], [0], [0], [1], [0, 0, 1, 1], [], []>} : vector<8x8xbf16>, vector<8x8xbf16>, vector<8x8xf32> -> vector<8x8xf32>
    %c0_86 = arith.constant 0 : index
    %c16_87 = arith.constant 16 : index
    %203 = vector.load %arg39[%c0_86, %c16_87] : memref<8x32xf32, #tpu.memory_space<vmem>>, vector<8x8xf32>
    tpu.vector_store %arg39[%c0_86, %c16_87], %202 {strides = array<i32>} : memref<8x32xf32, #tpu.memory_space<vmem>>, vector<8x8xf32>,
    %204 = vector.extract_strided_slice %145 {offsets = [0, 24], sizes = [8, 8], strides = [1, 1]} : vector<8x32xbf16> to vector<8x8xbf16>
    %205 = vector.extract_strided_slice %147 {offsets = [0, 24], sizes = [8, 8], strides = [1, 1]} : vector<8x32xbf16> to vector<8x8xbf16>
    %cst_88 = arith.constant dense<0.000000e+00> : vector<8x8xf32>
    %206 = tpu.matmul %204, %205, %cst_88 {dimension_numbers = #tpu.dot_dimension_numbers<[1], [1], [0], [0], [0, 0, 1, 0], [], []>} : vector<8x8xbf16>, vector<8x8xbf16>, vector<8x8xf32> -> vector<8x8xf32>
    %207 = arith.addf %206, %132 : vector<8x8xf32>
    %cst_89 = arith.constant dense<0xFF800000> : vector<8xf32>
    %208 = vector.multi_reduction <maximumf>, %207, %cst_89 [1] : vector<8x8xf32> to vector<8xf32>
    %209 = vector.shape_cast %208 : vector<8xf32> to vector<8x1xf32>
    %210 = vector.broadcast %209 : vector<8x1xf32> to vector<8x8xf32>
    %211 = arith.subf %207, %210 : vector<8x8xf32>
    %212 = math.exp %211 : vector<8x8xf32>
    %cst_90 = arith.constant dense<0.000000e+00> : vector<8xf32>
    %213 = vector.multi_reduction <add>, %212, %cst_90 [1] : vector<8x8xf32> to vector<8xf32>
    %214 = vector.shape_cast %213 : vector<8xf32> to vector<8x1xf32>
    %215 = tpu.reciprocal %214 {approx = true} : vector<8x1xf32> -> vector<8x1xf32>
    %216 = vector.broadcast %215 : vector<8x1xf32> to vector<8x8xf32>
    %217 = arith.mulf %212, %216 : vector<8x8xf32>
    %218 = arith.truncf %217 : vector<8x8xf32> to vector<8x8xbf16>
    %219 = vector.extract_strided_slice %149 {offsets = [0, 24], sizes = [8, 8], strides = [1, 1]} : vector<8x32xbf16> to vector<8x8xbf16>
    %cst_91 = arith.constant dense<0.000000e+00> : vector<8x8xf32>
    %220 = tpu.matmul %218, %219, %cst_91 {dimension_numbers = #tpu.dot_dimension_numbers<[1], [0], [0], [1], [0, 0, 1, 1], [], []>} : vector<8x8xbf16>, vector<8x8xbf16>, vector<8x8xf32> -> vector<8x8xf32>
    %c0_92 = arith.constant 0 : index
    %c24_93 = arith.constant 24 : index
    %221 = vector.load %arg39[%c0_92, %c24_93] : memref<8x32xf32, #tpu.memory_space<vmem>>, vector<8x8xf32>
    tpu.vector_store %arg39[%c0_92, %c24_93], %220 {strides = array<i32>} : memref<8x32xf32, #tpu.memory_space<vmem>>, vector<8x8xf32>,
    %c0_94 = arith.constant 0 : index
    %c0_95 = arith.constant 0 : index
    %222 = vector.load %arg39[%c0_94, %c0_95] : memref<8x32xf32, #tpu.memory_space<vmem>>, vector<8x32xf32>
    %223 = arith.truncf %222 : vector<8x32xf32> to vector<8x32xbf16>
    %c0_96 = arith.constant 0 : index
    %c0_97 = arith.constant 0 : index
    %224 = vector.load %arg20[%c0_96, %c0_97] : memref<32x32xbf16, #tpu.memory_space<vmem>>, vector<32x32xbf16>
    %cst_98 = arith.constant dense<0.000000e+00> : vector<8x32xf32>
    %225 = tpu.matmul %223, %224, %cst_98 {dimension_numbers = #tpu.dot_dimension_numbers<[1], [0], [0], [1], [0, 0, 1, 1], [], []>} : vector<8x32xbf16>, vector<32x32xbf16>, vector<8x32xf32> -> vector<8x32xf32>
    %c0_99 = arith.constant 0 : index
    %c0_100 = arith.constant 0 : index
    %226 = vector.load %arg21[%c0_99, %c0_100] : memref<1x32xf32, #tpu.memory_space<vmem>>, vector<1x32xf32>
    %227 = vector.broadcast %226 : vector<1x32xf32> to vector<8x32xf32>
    %228 = arith.addf %225, %227 : vector<8x32xf32>
    %229 = vector.broadcast %1 : vector<8x1xf32> to vector<8x32xf32>
    %230 = arith.mulf %228, %229 : vector<8x32xf32>
    %231 = arith.addf %230, %128 : vector<8x32xf32>
    %c0_101 = arith.constant 0 : index
    %c0_102 = arith.constant 0 : index
    %232 = vector.load %arg22[%c0_101, %c0_102] : memref<1x32xf32, #tpu.memory_space<vmem>>, vector<1x32xf32>
    %c0_103 = arith.constant 0 : index
    %c0_104 = arith.constant 0 : index
    %233 = vector.load %arg23[%c0_103, %c0_104] : memref<1x32xf32, #tpu.memory_space<vmem>>, vector<1x32xf32>
    %cst_105 = arith.constant dense<0.000000e+00> : vector<8xf32>
    %234 = vector.multi_reduction <add>, %231, %cst_105 [1] : vector<8x32xf32> to vector<8xf32>
    %235 = vector.shape_cast %234 : vector<8xf32> to vector<8x1xf32>
    %cst_106 = arith.constant 3.200000e+01 : f32
    %236 = vector.broadcast %cst_106 : f32 to vector<8x1xf32>
    %237 = arith.divf %235, %236 : vector<8x1xf32>
    %238 = vector.broadcast %237 : vector<8x1xf32> to vector<8x32xf32>
    %239 = arith.subf %231, %238 : vector<8x32xf32>
    %240 = arith.mulf %239, %239 : vector<8x32xf32>
    %cst_107 = arith.constant dense<0.000000e+00> : vector<8xf32>
    %241 = vector.multi_reduction <add>, %240, %cst_107 [1] : vector<8x32xf32> to vector<8xf32>
    %242 = vector.shape_cast %241 : vector<8xf32> to vector<8x1xf32>
    %cst_108 = arith.constant 3.200000e+01 : f32
    %243 = vector.broadcast %cst_108 : f32 to vector<8x1xf32>
    %244 = arith.divf %242, %243 : vector<8x1xf32>
    %245 = vector.broadcast %237 : vector<8x1xf32> to vector<8x32xf32>
    %246 = arith.subf %231, %245 : vector<8x32xf32>
    %cst_109 = arith.constant 9.99999974E-6 : f32
    %247 = vector.broadcast %cst_109 : f32 to vector<8x1xf32>
    %248 = arith.addf %244, %247 : vector<8x1xf32>
    %249 = math.rsqrt %248 : vector<8x1xf32>
    %250 = vector.broadcast %249 : vector<8x1xf32> to vector<8x32xf32>
    %251 = arith.mulf %246, %250 : vector<8x32xf32>
    %252 = vector.broadcast %232 : vector<1x32xf32> to vector<8x32xf32>
    %253 = arith.mulf %251, %252 : vector<8x32xf32>
    %254 = vector.broadcast %233 : vector<1x32xf32> to vector<8x32xf32>
    %255 = arith.addf %253, %254 : vector<8x32xf32>
    %c0_110 = arith.constant 0 : index
    %c0_111 = arith.constant 0 : index
    %c0_112 = arith.constant 0 : index
    %256 = vector.load %arg3[%c0_110, %c0_111, %c0_112] : memref<1x8x32xf32, #tpu.memory_space<vmem>>, vector<1x8x32xf32>
    %257 = vector.shape_cast %256 : vector<1x8x32xf32> to vector<8x32xf32>
    %c0_113 = arith.constant 0 : index
    %c0_114 = arith.constant 0 : index
    %c0_115 = arith.constant 0 : index
    %258 = vector.load %arg7[%c0_113, %c0_114, %c0_115] : memref<1x8x8xf32, #tpu.memory_space<vmem>>, vector<1x8x8xf32>
    %259 = vector.shape_cast %258 : vector<1x8x8xf32> to vector<8x8xf32>
    %260 = arith.truncf %255 : vector<8x32xf32> to vector<8x32xbf16>
    %c0_116 = arith.constant 0 : index
    %c0_117 = arith.constant 0 : index
    %261 = vector.load %arg24[%c0_116, %c0_117] : memref<32x32xbf16, #tpu.memory_space<vmem>>, vector<32x32xbf16>
    %cst_118 = arith.constant dense<0.000000e+00> : vector<8x32xf32>
    %262 = tpu.matmul %260, %261, %cst_118 {dimension_numbers = #tpu.dot_dimension_numbers<[1], [0], [0], [1], [0, 0, 1, 1], [], []>} : vector<8x32xbf16>, vector<32x32xbf16>, vector<8x32xf32> -> vector<8x32xf32>
    %c0_119 = arith.constant 0 : index
    %c0_120 = arith.constant 0 : index
    %263 = vector.load %arg25[%c0_119, %c0_120] : memref<1x32xf32, #tpu.memory_space<vmem>>, vector<1x32xf32>
    %264 = vector.broadcast %263 : vector<1x32xf32> to vector<8x32xf32>
    %265 = arith.addf %262, %264 : vector<8x32xf32>
    %266 = arith.truncf %257 : vector<8x32xf32> to vector<8x32xbf16>
    %c0_121 = arith.constant 0 : index
    %c0_122 = arith.constant 0 : index
    %267 = vector.load %arg26[%c0_121, %c0_122] : memref<32x64xbf16, #tpu.memory_space<vmem>>, vector<32x64xbf16>
    %cst_123 = arith.constant dense<0.000000e+00> : vector<8x64xf32>
    %268 = tpu.matmul %266, %267, %cst_123 {dimension_numbers = #tpu.dot_dimension_numbers<[1], [0], [0], [1], [0, 0, 1, 1], [], []>} : vector<8x32xbf16>, vector<32x64xbf16>, vector<8x64xf32> -> vector<8x64xf32>
    %c0_124 = arith.constant 0 : index
    %c0_125 = arith.constant 0 : index
    %269 = vector.load %arg27[%c0_124, %c0_125] : memref<1x64xf32, #tpu.memory_space<vmem>>, vector<1x64xf32>
    %270 = vector.broadcast %269 : vector<1x64xf32> to vector<8x64xf32>
    %271 = arith.addf %268, %270 : vector<8x64xf32>
    %272 = arith.truncf %265 : vector<8x32xf32> to vector<8x32xbf16>
    %273 = vector.extract_strided_slice %271 {offsets = [0, 0], sizes = [8, 32], strides = [1, 1]} : vector<8x64xf32> to vector<8x32xf32>
    %274 = arith.truncf %273 : vector<8x32xf32> to vector<8x32xbf16>
    %275 = vector.extract_strided_slice %271 {offsets = [0, 32], sizes = [8, 32], strides = [1, 1]} : vector<8x64xf32> to vector<8x32xf32>
    %276 = arith.truncf %275 : vector<8x32xf32> to vector<8x32xbf16>
    %277 = vector.extract_strided_slice %272 {offsets = [0, 0], sizes = [8, 8], strides = [1, 1]} : vector<8x32xbf16> to vector<8x8xbf16>
    %278 = vector.extract_strided_slice %274 {offsets = [0, 0], sizes = [8, 8], strides = [1, 1]} : vector<8x32xbf16> to vector<8x8xbf16>
    %cst_126 = arith.constant dense<0.000000e+00> : vector<8x8xf32>
    %279 = tpu.matmul %277, %278, %cst_126 {dimension_numbers = #tpu.dot_dimension_numbers<[1], [1], [0], [0], [0, 0, 1, 0], [], []>} : vector<8x8xbf16>, vector<8x8xbf16>, vector<8x8xf32> -> vector<8x8xf32>
    %280 = arith.addf %279, %259 : vector<8x8xf32>
    %cst_127 = arith.constant dense<0xFF800000> : vector<8xf32>
    %281 = vector.multi_reduction <maximumf>, %280, %cst_127 [1] : vector<8x8xf32> to vector<8xf32>
    %282 = vector.shape_cast %281 : vector<8xf32> to vector<8x1xf32>
    %283 = vector.broadcast %282 : vector<8x1xf32> to vector<8x8xf32>
    %284 = arith.subf %280, %283 : vector<8x8xf32>
    %285 = math.exp %284 : vector<8x8xf32>
    %cst_128 = arith.constant dense<0.000000e+00> : vector<8xf32>
    %286 = vector.multi_reduction <add>, %285, %cst_128 [1] : vector<8x8xf32> to vector<8xf32>
    %287 = vector.shape_cast %286 : vector<8xf32> to vector<8x1xf32>
    %288 = tpu.reciprocal %287 {approx = true} : vector<8x1xf32> -> vector<8x1xf32>
    %289 = vector.broadcast %288 : vector<8x1xf32> to vector<8x8xf32>
    %290 = arith.mulf %285, %289 : vector<8x8xf32>
    %291 = arith.truncf %290 : vector<8x8xf32> to vector<8x8xbf16>
    %292 = vector.extract_strided_slice %276 {offsets = [0, 0], sizes = [8, 8], strides = [1, 1]} : vector<8x32xbf16> to vector<8x8xbf16>
    %cst_129 = arith.constant dense<0.000000e+00> : vector<8x8xf32>
    %293 = tpu.matmul %291, %292, %cst_129 {dimension_numbers = #tpu.dot_dimension_numbers<[1], [0], [0], [1], [0, 0, 1, 1], [], []>} : vector<8x8xbf16>, vector<8x8xbf16>, vector<8x8xf32> -> vector<8x8xf32>
    %c0_130 = arith.constant 0 : index
    %c0_131 = arith.constant 0 : index
    %294 = vector.load %arg39[%c0_130, %c0_131] : memref<8x32xf32, #tpu.memory_space<vmem>>, vector<8x8xf32>
    tpu.vector_store %arg39[%c0_130, %c0_131], %293 {strides = array<i32>} : memref<8x32xf32, #tpu.memory_space<vmem>>, vector<8x8xf32>,
    %295 = vector.extract_strided_slice %272 {offsets = [0, 8], sizes = [8, 8], strides = [1, 1]} : vector<8x32xbf16> to vector<8x8xbf16>
    %296 = vector.extract_strided_slice %274 {offsets = [0, 8], sizes = [8, 8], strides = [1, 1]} : vector<8x32xbf16> to vector<8x8xbf16>
    %cst_132 = arith.constant dense<0.000000e+00> : vector<8x8xf32>
    %297 = tpu.matmul %295, %296, %cst_132 {dimension_numbers = #tpu.dot_dimension_numbers<[1], [1], [0], [0], [0, 0, 1, 0], [], []>} : vector<8x8xbf16>, vector<8x8xbf16>, vector<8x8xf32> -> vector<8x8xf32>
    %298 = arith.addf %297, %259 : vector<8x8xf32>
    %cst_133 = arith.constant dense<0xFF800000> : vector<8xf32>
    %299 = vector.multi_reduction <maximumf>, %298, %cst_133 [1] : vector<8x8xf32> to vector<8xf32>
    %300 = vector.shape_cast %299 : vector<8xf32> to vector<8x1xf32>
    %301 = vector.broadcast %300 : vector<8x1xf32> to vector<8x8xf32>
    %302 = arith.subf %298, %301 : vector<8x8xf32>
    %303 = math.exp %302 : vector<8x8xf32>
    %cst_134 = arith.constant dense<0.000000e+00> : vector<8xf32>
    %304 = vector.multi_reduction <add>, %303, %cst_134 [1] : vector<8x8xf32> to vector<8xf32>
    %305 = vector.shape_cast %304 : vector<8xf32> to vector<8x1xf32>
    %306 = tpu.reciprocal %305 {approx = true} : vector<8x1xf32> -> vector<8x1xf32>
    %307 = vector.broadcast %306 : vector<8x1xf32> to vector<8x8xf32>
    %308 = arith.mulf %303, %307 : vector<8x8xf32>
    %309 = arith.truncf %308 : vector<8x8xf32> to vector<8x8xbf16>
    %310 = vector.extract_strided_slice %276 {offsets = [0, 8], sizes = [8, 8], strides = [1, 1]} : vector<8x32xbf16> to vector<8x8xbf16>
    %cst_135 = arith.constant dense<0.000000e+00> : vector<8x8xf32>
    %311 = tpu.matmul %309, %310, %cst_135 {dimension_numbers = #tpu.dot_dimension_numbers<[1], [0], [0], [1], [0, 0, 1, 1], [], []>} : vector<8x8xbf16>, vector<8x8xbf16>, vector<8x8xf32> -> vector<8x8xf32>
    %c0_136 = arith.constant 0 : index
    %c8_137 = arith.constant 8 : index
    %312 = vector.load %arg39[%c0_136, %c8_137] : memref<8x32xf32, #tpu.memory_space<vmem>>, vector<8x8xf32>
    tpu.vector_store %arg39[%c0_136, %c8_137], %311 {strides = array<i32>} : memref<8x32xf32, #tpu.memory_space<vmem>>, vector<8x8xf32>,
    %313 = vector.extract_strided_slice %272 {offsets = [0, 16], sizes = [8, 8], strides = [1, 1]} : vector<8x32xbf16> to vector<8x8xbf16>
    %314 = vector.extract_strided_slice %274 {offsets = [0, 16], sizes = [8, 8], strides = [1, 1]} : vector<8x32xbf16> to vector<8x8xbf16>
    %cst_138 = arith.constant dense<0.000000e+00> : vector<8x8xf32>
    %315 = tpu.matmul %313, %314, %cst_138 {dimension_numbers = #tpu.dot_dimension_numbers<[1], [1], [0], [0], [0, 0, 1, 0], [], []>} : vector<8x8xbf16>, vector<8x8xbf16>, vector<8x8xf32> -> vector<8x8xf32>
    %316 = arith.addf %315, %259 : vector<8x8xf32>
    %cst_139 = arith.constant dense<0xFF800000> : vector<8xf32>
    %317 = vector.multi_reduction <maximumf>, %316, %cst_139 [1] : vector<8x8xf32> to vector<8xf32>
    %318 = vector.shape_cast %317 : vector<8xf32> to vector<8x1xf32>
    %319 = vector.broadcast %318 : vector<8x1xf32> to vector<8x8xf32>
    %320 = arith.subf %316, %319 : vector<8x8xf32>
    %321 = math.exp %320 : vector<8x8xf32>
    %cst_140 = arith.constant dense<0.000000e+00> : vector<8xf32>
    %322 = vector.multi_reduction <add>, %321, %cst_140 [1] : vector<8x8xf32> to vector<8xf32>
    %323 = vector.shape_cast %322 : vector<8xf32> to vector<8x1xf32>
    %324 = tpu.reciprocal %323 {approx = true} : vector<8x1xf32> -> vector<8x1xf32>
    %325 = vector.broadcast %324 : vector<8x1xf32> to vector<8x8xf32>
    %326 = arith.mulf %321, %325 : vector<8x8xf32>
    %327 = arith.truncf %326 : vector<8x8xf32> to vector<8x8xbf16>
    %328 = vector.extract_strided_slice %276 {offsets = [0, 16], sizes = [8, 8], strides = [1, 1]} : vector<8x32xbf16> to vector<8x8xbf16>
    %cst_141 = arith.constant dense<0.000000e+00> : vector<8x8xf32>
    %329 = tpu.matmul %327, %328, %cst_141 {dimension_numbers = #tpu.dot_dimension_numbers<[1], [0], [0], [1], [0, 0, 1, 1], [], []>} : vector<8x8xbf16>, vector<8x8xbf16>, vector<8x8xf32> -> vector<8x8xf32>
    %c0_142 = arith.constant 0 : index
    %c16_143 = arith.constant 16 : index
    %330 = vector.load %arg39[%c0_142, %c16_143] : memref<8x32xf32, #tpu.memory_space<vmem>>, vector<8x8xf32>
    tpu.vector_store %arg39[%c0_142, %c16_143], %329 {strides = array<i32>} : memref<8x32xf32, #tpu.memory_space<vmem>>, vector<8x8xf32>,
    %331 = vector.extract_strided_slice %272 {offsets = [0, 24], sizes = [8, 8], strides = [1, 1]} : vector<8x32xbf16> to vector<8x8xbf16>
    %332 = vector.extract_strided_slice %274 {offsets = [0, 24], sizes = [8, 8], strides = [1, 1]} : vector<8x32xbf16> to vector<8x8xbf16>
    %cst_144 = arith.constant dense<0.000000e+00> : vector<8x8xf32>
    %333 = tpu.matmul %331, %332, %cst_144 {dimension_numbers = #tpu.dot_dimension_numbers<[1], [1], [0], [0], [0, 0, 1, 0], [], []>} : vector<8x8xbf16>, vector<8x8xbf16>, vector<8x8xf32> -> vector<8x8xf32>
    %334 = arith.addf %333, %259 : vector<8x8xf32>
    %cst_145 = arith.constant dense<0xFF800000> : vector<8xf32>
    %335 = vector.multi_reduction <maximumf>, %334, %cst_145 [1] : vector<8x8xf32> to vector<8xf32>
    %336 = vector.shape_cast %335 : vector<8xf32> to vector<8x1xf32>
    %337 = vector.broadcast %336 : vector<8x1xf32> to vector<8x8xf32>
    %338 = arith.subf %334, %337 : vector<8x8xf32>
    %339 = math.exp %338 : vector<8x8xf32>
    %cst_146 = arith.constant dense<0.000000e+00> : vector<8xf32>
    %340 = vector.multi_reduction <add>, %339, %cst_146 [1] : vector<8x8xf32> to vector<8xf32>
    %341 = vector.shape_cast %340 : vector<8xf32> to vector<8x1xf32>
    %342 = tpu.reciprocal %341 {approx = true} : vector<8x1xf32> -> vector<8x1xf32>
    %343 = vector.broadcast %342 : vector<8x1xf32> to vector<8x8xf32>
    %344 = arith.mulf %339, %343 : vector<8x8xf32>
    %345 = arith.truncf %344 : vector<8x8xf32> to vector<8x8xbf16>
    %346 = vector.extract_strided_slice %276 {offsets = [0, 24], sizes = [8, 8], strides = [1, 1]} : vector<8x32xbf16> to vector<8x8xbf16>
    %cst_147 = arith.constant dense<0.000000e+00> : vector<8x8xf32>
    %347 = tpu.matmul %345, %346, %cst_147 {dimension_numbers = #tpu.dot_dimension_numbers<[1], [0], [0], [1], [0, 0, 1, 1], [], []>} : vector<8x8xbf16>, vector<8x8xbf16>, vector<8x8xf32> -> vector<8x8xf32>
    %c0_148 = arith.constant 0 : index
    %c24_149 = arith.constant 24 : index
    %348 = vector.load %arg39[%c0_148, %c24_149] : memref<8x32xf32, #tpu.memory_space<vmem>>, vector<8x8xf32>
    tpu.vector_store %arg39[%c0_148, %c24_149], %347 {strides = array<i32>} : memref<8x32xf32, #tpu.memory_space<vmem>>, vector<8x8xf32>,
    %c0_150 = arith.constant 0 : index
    %c0_151 = arith.constant 0 : index
    %349 = vector.load %arg39[%c0_150, %c0_151] : memref<8x32xf32, #tpu.memory_space<vmem>>, vector<8x32xf32>
    %350 = arith.truncf %349 : vector<8x32xf32> to vector<8x32xbf16>
    %c0_152 = arith.constant 0 : index
    %c0_153 = arith.constant 0 : index
    %351 = vector.load %arg28[%c0_152, %c0_153] : memref<32x32xbf16, #tpu.memory_space<vmem>>, vector<32x32xbf16>
    %cst_154 = arith.constant dense<0.000000e+00> : vector<8x32xf32>
    %352 = tpu.matmul %350, %351, %cst_154 {dimension_numbers = #tpu.dot_dimension_numbers<[1], [0], [0], [1], [0, 0, 1, 1], [], []>} : vector<8x32xbf16>, vector<32x32xbf16>, vector<8x32xf32> -> vector<8x32xf32>
    %c0_155 = arith.constant 0 : index
    %c0_156 = arith.constant 0 : index
    %353 = vector.load %arg29[%c0_155, %c0_156] : memref<1x32xf32, #tpu.memory_space<vmem>>, vector<1x32xf32>
    %354 = vector.broadcast %353 : vector<1x32xf32> to vector<8x32xf32>
    %355 = arith.addf %352, %354 : vector<8x32xf32>
    %356 = vector.broadcast %1 : vector<8x1xf32> to vector<8x32xf32>
    %357 = arith.mulf %355, %356 : vector<8x32xf32>
    %358 = arith.addf %357, %255 : vector<8x32xf32>
    %c0_157 = arith.constant 0 : index
    %c0_158 = arith.constant 0 : index
    %359 = vector.load %arg30[%c0_157, %c0_158] : memref<1x32xf32, #tpu.memory_space<vmem>>, vector<1x32xf32>
    %c0_159 = arith.constant 0 : index
    %c0_160 = arith.constant 0 : index
    %360 = vector.load %arg31[%c0_159, %c0_160] : memref<1x32xf32, #tpu.memory_space<vmem>>, vector<1x32xf32>
    %cst_161 = arith.constant dense<0.000000e+00> : vector<8xf32>
    %361 = vector.multi_reduction <add>, %358, %cst_161 [1] : vector<8x32xf32> to vector<8xf32>
    %362 = vector.shape_cast %361 : vector<8xf32> to vector<8x1xf32>
    %cst_162 = arith.constant 3.200000e+01 : f32
    %363 = vector.broadcast %cst_162 : f32 to vector<8x1xf32>
    %364 = arith.divf %362, %363 : vector<8x1xf32>
    %365 = vector.broadcast %364 : vector<8x1xf32> to vector<8x32xf32>
    %366 = arith.subf %358, %365 : vector<8x32xf32>
    %367 = arith.mulf %366, %366 : vector<8x32xf32>
    %cst_163 = arith.constant dense<0.000000e+00> : vector<8xf32>
    %368 = vector.multi_reduction <add>, %367, %cst_163 [1] : vector<8x32xf32> to vector<8xf32>
    %369 = vector.shape_cast %368 : vector<8xf32> to vector<8x1xf32>
    %cst_164 = arith.constant 3.200000e+01 : f32
    %370 = vector.broadcast %cst_164 : f32 to vector<8x1xf32>
    %371 = arith.divf %369, %370 : vector<8x1xf32>
    %372 = vector.broadcast %364 : vector<8x1xf32> to vector<8x32xf32>
    %373 = arith.subf %358, %372 : vector<8x32xf32>
    %cst_165 = arith.constant 9.99999974E-6 : f32
    %374 = vector.broadcast %cst_165 : f32 to vector<8x1xf32>
    %375 = arith.addf %371, %374 : vector<8x1xf32>
    %376 = math.rsqrt %375 : vector<8x1xf32>
    %377 = vector.broadcast %376 : vector<8x1xf32> to vector<8x32xf32>
    %378 = arith.mulf %373, %377 : vector<8x32xf32>
    %379 = vector.broadcast %359 : vector<1x32xf32> to vector<8x32xf32>
    %380 = arith.mulf %378, %379 : vector<8x32xf32>
    %381 = vector.broadcast %360 : vector<1x32xf32> to vector<8x32xf32>
    %382 = arith.addf %380, %381 : vector<8x32xf32>
    %383 = arith.truncf %382 : vector<8x32xf32> to vector<8x32xbf16>
    %c0_166 = arith.constant 0 : index
    %c0_167 = arith.constant 0 : index
    %384 = vector.load %arg32[%c0_166, %c0_167] : memref<32x64xbf16, #tpu.memory_space<vmem>>, vector<32x64xbf16>
    %cst_168 = arith.constant dense<0.000000e+00> : vector<8x64xf32>
    %385 = tpu.matmul %383, %384, %cst_168 {dimension_numbers = #tpu.dot_dimension_numbers<[1], [0], [0], [1], [0, 0, 1, 1], [], []>} : vector<8x32xbf16>, vector<32x64xbf16>, vector<8x64xf32> -> vector<8x64xf32>
    %c0_169 = arith.constant 0 : index
    %c0_170 = arith.constant 0 : index
    %386 = vector.load %arg33[%c0_169, %c0_170] : memref<1x64xf32, #tpu.memory_space<vmem>>, vector<1x64xf32>
    %387 = vector.broadcast %386 : vector<1x64xf32> to vector<8x64xf32>
    %388 = arith.addf %385, %387 : vector<8x64xf32>
    %cst_171 = arith.constant 0.000000e+00 : f32
    %389 = vector.broadcast %cst_171 : f32 to vector<8x64xf32>
    %390 = arith.cmpf oge, %388, %389 : vector<8x64xf32>
    %cst_172 = arith.constant 0.00999999977 : f32
    %391 = vector.broadcast %cst_172 : f32 to vector<8x64xf32>
    %392 = arith.mulf %391, %388 : vector<8x64xf32>
    %393 = arith.select %390, %388, %392 : vector<8x64xi1>, vector<8x64xf32>
    %394 = arith.truncf %393 : vector<8x64xf32> to vector<8x64xbf16>
    %c0_173 = arith.constant 0 : index
    %c0_174 = arith.constant 0 : index
    %395 = vector.load %arg34[%c0_173, %c0_174] : memref<64x32xbf16, #tpu.memory_space<vmem>>, vector<64x32xbf16>
    %cst_175 = arith.constant dense<0.000000e+00> : vector<8x32xf32>
    %396 = tpu.matmul %394, %395, %cst_175 {dimension_numbers = #tpu.dot_dimension_numbers<[1], [0], [0], [1], [0, 0, 1, 1], [], []>} : vector<8x64xbf16>, vector<64x32xbf16>, vector<8x32xf32> -> vector<8x32xf32>
    %c0_176 = arith.constant 0 : index
    %c0_177 = arith.constant 0 : index
    %397 = vector.load %arg35[%c0_176, %c0_177] : memref<1x32xf32, #tpu.memory_space<vmem>>, vector<1x32xf32>
    %398 = vector.broadcast %397 : vector<1x32xf32> to vector<8x32xf32>
    %399 = arith.addf %396, %398 : vector<8x32xf32>
    %400 = vector.broadcast %1 : vector<8x1xf32> to vector<8x32xf32>
    %401 = arith.mulf %399, %400 : vector<8x32xf32>
    %402 = arith.addf %382, %401 : vector<8x32xf32>
    %c0_178 = arith.constant 0 : index
    %c0_179 = arith.constant 0 : index
    %403 = vector.load %arg36[%c0_178, %c0_179] : memref<1x32xf32, #tpu.memory_space<vmem>>, vector<1x32xf32>
    %c0_180 = arith.constant 0 : index
    %c0_181 = arith.constant 0 : index
    %404 = vector.load %arg37[%c0_180, %c0_181] : memref<1x32xf32, #tpu.memory_space<vmem>>, vector<1x32xf32>
    %cst_182 = arith.constant dense<0.000000e+00> : vector<8xf32>
    %405 = vector.multi_reduction <add>, %402, %cst_182 [1] : vector<8x32xf32> to vector<8xf32>
    %406 = vector.shape_cast %405 : vector<8xf32> to vector<8x1xf32>
    %cst_183 = arith.constant 3.200000e+01 : f32
    %407 = vector.broadcast %cst_183 : f32 to vector<8x1xf32>
    %408 = arith.divf %406, %407 : vector<8x1xf32>
    %409 = vector.broadcast %408 : vector<8x1xf32> to vector<8x32xf32>
    %410 = arith.subf %402, %409 : vector<8x32xf32>
    %411 = arith.mulf %410, %410 : vector<8x32xf32>
    %cst_184 = arith.constant dense<0.000000e+00> : vector<8xf32>
    %412 = vector.multi_reduction <add>, %411, %cst_184 [1] : vector<8x32xf32> to vector<8xf32>
    %413 = vector.shape_cast %412 : vector<8xf32> to vector<8x1xf32>
    %cst_185 = arith.constant 3.200000e+01 : f32
    %414 = vector.broadcast %cst_185 : f32 to vector<8x1xf32>
    %415 = arith.divf %413, %414 : vector<8x1xf32>
    %416 = vector.broadcast %408 : vector<8x1xf32> to vector<8x32xf32>
    %417 = arith.subf %402, %416 : vector<8x32xf32>
    %cst_186 = arith.constant 9.99999974E-6 : f32
    %418 = vector.broadcast %cst_186 : f32 to vector<8x1xf32>
    %419 = arith.addf %415, %418 : vector<8x1xf32>
    %420 = math.rsqrt %419 : vector<8x1xf32>
    %421 = vector.broadcast %420 : vector<8x1xf32> to vector<8x32xf32>
    %422 = arith.mulf %417, %421 : vector<8x32xf32>
    %423 = vector.broadcast %403 : vector<1x32xf32> to vector<8x32xf32>
    %424 = arith.mulf %422, %423 : vector<8x32xf32>
    %425 = vector.broadcast %404 : vector<1x32xf32> to vector<8x32xf32>
    %426 = arith.addf %424, %425 : vector<8x32xf32>
    %c0_187 = arith.constant 0 : index
    %c0_188 = arith.constant 0 : index
    %c0_189 = arith.constant 0 : index
    %427 = vector.load %arg38[%c0_187, %c0_188, %c0_189] : memref<1x8x32xf32, #tpu.memory_space<vmem>>, vector<1x8x32xf32>
    %428 = vector.shape_cast %427 : vector<1x8x32xf32> to vector<8x32xf32>
    %429 = vector.shape_cast %426 : vector<8x32xf32> to vector<1x8x32xf32>
    tpu.vector_store %arg38[%c0_187, %c0_188, %c0_189], %429 {strides = array<i32>} : memref<1x8x32xf32, #tpu.memory_space<vmem>>, vector<1x8x32xf32>,
    return
  }
  func.func @transform_0(%arg0: i32) -> (i32, i32, i32) {
    %c0_i32 = arith.constant 0 : i32
    %c0_i32_0 = arith.constant 0 : i32
    %c0_i32_1 = arith.constant 0 : i32
    return %arg0, %c0_i32, %c0_i32_0 : i32, i32, i32
  }
  func.func @transform_1(%arg0: i32) -> (i32, i32, i32) {
    %c0_i32 = arith.constant 0 : i32
    %c0_i32_0 = arith.constant 0 : i32
    %c0_i32_1 = arith.constant 0 : i32
    return %arg0, %c0_i32, %c0_i32_0 : i32, i32, i32
  }
  func.func @transform_2(%arg0: i32) -> (i32, i32, i32) {
    %c0_i32 = arith.constant 0 : i32
    %c0_i32_0 = arith.constant 0 : i32
    %c0_i32_1 = arith.constant 0 : i32
    return %arg0, %c0_i32, %c0_i32_0 : i32, i32, i32
  }
  func.func @transform_3(%arg0: i32) -> (i32, i32, i32) {
    %c0_i32 = arith.constant 0 : i32
    %c0_i32_0 = arith.constant 0 : i32
    %c0_i32_1 = arith.constant 0 : i32
    return %arg0, %c0_i32, %c0_i32_0 : i32, i32, i32
  }
  func.func @transform_4(%arg0: i32) -> (i32, i32, i32) {
    %c0_i32 = arith.constant 0 : i32
    %c0_i32_0 = arith.constant 0 : i32
    %c0_i32_1 = arith.constant 0 : i32
    return %arg0, %c0_i32, %c0_i32_0 : i32, i32, i32
  }
  func.func @transform_5(%arg0: i32) -> (i32, i32, i32) {
    %c0_i32 = arith.constant 0 : i32
    %c0_i32_0 = arith.constant 0 : i32
    %c0_i32_1 = arith.constant 0 : i32
    return %arg0, %c0_i32, %c0_i32_0 : i32, i32, i32
  }
  func.func @transform_6(%arg0: i32) -> (i32, i32, i32) {
    %c0_i32 = arith.constant 0 : i32
    %c0_i32_0 = arith.constant 0 : i32
    %c0_i32_1 = arith.constant 0 : i32
    return %arg0, %c0_i32, %c0_i32_0 : i32, i32, i32
  }
  func.func @transform_7(%arg0: i32) -> (i32, i32) {
    %c0_i32 = arith.constant 0 : i32
    %c0_i32_0 = arith.constant 0 : i32
    %c0_i32_1 = arith.constant 0 : i32
    return %c0_i32, %c0_i32_0 : i32, i32
  }
  func.func @transform_8(%arg0: i32) -> (i32, i32) {
    %c0_i32 = arith.constant 0 : i32
    %c0_i32_0 = arith.constant 0 : i32
    %c0_i32_1 = arith.constant 0 : i32
    return %c0_i32, %c0_i32_0 : i32, i32
  }
  func.func @transform_9(%arg0: i32) -> (i32, i32) {
    %c0_i32 = arith.constant 0 : i32
    %c0_i32_0 = arith.constant 0 : i32
    %c0_i32_1 = arith.constant 0 : i32
    return %c0_i32, %c0_i32_0 : i32, i32
  }
  func.func @transform_10(%arg0: i32) -> (i32, i32) {
    %c0_i32 = arith.constant 0 : i32
    %c0_i32_0 = arith.constant 0 : i32
    %c0_i32_1 = arith.constant 0 : i32
    return %c0_i32, %c0_i32_0 : i32, i32
  }
  func.func @transform_11(%arg0: i32) -> (i32, i32) {
    %c0_i32 = arith.constant 0 : i32
    %c0_i32_0 = arith.constant 0 : i32
    %c0_i32_1 = arith.constant 0 : i32
    return %c0_i32, %c0_i32_0 : i32, i32
  }
  func.func @transform_12(%arg0: i32) -> (i32, i32) {
    %c0_i32 = arith.constant 0 : i32
    %c0_i32_0 = arith.constant 0 : i32
    %c0_i32_1 = arith.constant 0 : i32
    return %c0_i32, %c0_i32_0 : i32, i32
  }
  func.func @transform_13(%arg0: i32) -> (i32, i32) {
    %c0_i32 = arith.constant 0 : i32
    %c0_i32_0 = arith.constant 0 : i32
    %c0_i32_1 = arith.constant 0 : i32
    return %c0_i32, %c0_i32_0 : i32, i32
  }
  func.func @transform_14(%arg0: i32) -> (i32, i32) {
    %c0_i32 = arith.constant 0 : i32
    %c0_i32_0 = arith.constant 0 : i32
    %c0_i32_1 = arith.constant 0 : i32
    return %c0_i32, %c0_i32_0 : i32, i32
  }
  func.func @transform_15(%arg0: i32) -> (i32, i32) {
    %c0_i32 = arith.constant 0 : i32
    %c0_i32_0 = arith.constant 0 : i32
    %c0_i32_1 = arith.constant 0 : i32
    return %c0_i32, %c0_i32_0 : i32, i32
  }
  func.func @transform_16(%arg0: i32) -> (i32, i32) {
    %c0_i32 = arith.constant 0 : i32
    %c0_i32_0 = arith.constant 0 : i32
    %c0_i32_1 = arith.constant 0 : i32
    return %c0_i32, %c0_i32_0 : i32, i32
  }
  func.func @transform_17(%arg0: i32) -> (i32, i32) {
    %c0_i32 = arith.constant 0 : i32
    %c0_i32_0 = arith.constant 0 : i32
    %c0_i32_1 = arith.constant 0 : i32
    return %c0_i32, %c0_i32_0 : i32, i32
  }
  func.func @transform_18(%arg0: i32) -> (i32, i32) {
    %c0_i32 = arith.constant 0 : i32
    %c0_i32_0 = arith.constant 0 : i32
    %c0_i32_1 = arith.constant 0 : i32
    return %c0_i32, %c0_i32_0 : i32, i32
  }
  func.func @transform_19(%arg0: i32) -> (i32, i32) {
    %c0_i32 = arith.constant 0 : i32
    %c0_i32_0 = arith.constant 0 : i32
    %c0_i32_1 = arith.constant 0 : i32
    return %c0_i32, %c0_i32_0 : i32, i32
  }
  func.func @transform_20(%arg0: i32) -> (i32, i32) {
    %c0_i32 = arith.constant 0 : i32
    %c0_i32_0 = arith.constant 0 : i32
    %c0_i32_1 = arith.constant 0 : i32
    return %c0_i32, %c0_i32_0 : i32, i32
  }
  func.func @transform_21(%arg0: i32) -> (i32, i32) {
    %c0_i32 = arith.constant 0 : i32
    %c0_i32_0 = arith.constant 0 : i32
    %c0_i32_1 = arith.constant 0 : i32
    return %c0_i32, %c0_i32_0 : i32, i32
  }
  func.func @transform_22(%arg0: i32) -> (i32, i32) {
    %c0_i32 = arith.constant 0 : i32
    %c0_i32_0 = arith.constant 0 : i32
    %c0_i32_1 = arith.constant 0 : i32
    return %c0_i32, %c0_i32_0 : i32, i32
  }
  func.func @transform_23(%arg0: i32) -> (i32, i32) {
    %c0_i32 = arith.constant 0 : i32
    %c0_i32_0 = arith.constant 0 : i32
    %c0_i32_1 = arith.constant 0 : i32
    return %c0_i32, %c0_i32_0 : i32, i32
  }
  func.func @transform_24(%arg0: i32) -> (i32, i32) {
    %c0_i32 = arith.constant 0 : i32
    %c0_i32_0 = arith.constant 0 : i32
    %c0_i32_1 = arith.constant 0 : i32
    return %c0_i32, %c0_i32_0 : i32, i32
  }
  func.func @transform_25(%arg0: i32) -> (i32, i32) {
    %c0_i32 = arith.constant 0 : i32
    %c0_i32_0 = arith.constant 0 : i32
    %c0_i32_1 = arith.constant 0 : i32
    return %c0_i32, %c0_i32_0 : i32, i32
  }
  func.func @transform_26(%arg0: i32) -> (i32, i32) {
    %c0_i32 = arith.constant 0 : i32
    %c0_i32_0 = arith.constant 0 : i32
    %c0_i32_1 = arith.constant 0 : i32
    return %c0_i32, %c0_i32_0 : i32, i32
  }
  func.func @transform_27(%arg0: i32) -> (i32, i32) {
    %c0_i32 = arith.constant 0 : i32
    %c0_i32_0 = arith.constant 0 : i32
    %c0_i32_1 = arith.constant 0 : i32
    return %c0_i32, %c0_i32_0 : i32, i32
  }
  func.func @transform_28(%arg0: i32) -> (i32, i32) {
    %c0_i32 = arith.constant 0 : i32
    %c0_i32_0 = arith.constant 0 : i32
    %c0_i32_1 = arith.constant 0 : i32
    return %c0_i32, %c0_i32_0 : i32, i32
  }
  func.func @transform_29(%arg0: i32) -> (i32, i32) {
    %c0_i32 = arith.constant 0 : i32
    %c0_i32_0 = arith.constant 0 : i32
    %c0_i32_1 = arith.constant 0 : i32
    return %c0_i32, %c0_i32_0 : i32, i32
  }
  func.func @transform_30(%arg0: i32) -> (i32, i32) {
    %c0_i32 = arith.constant 0 : i32
    %c0_i32_0 = arith.constant 0 : i32
    %c0_i32_1 = arith.constant 0 : i32
    return %c0_i32, %c0_i32_0 : i32, i32
  }
  func.func @transform_31(%arg0: i32) -> (i32, i32) {
    %c0_i32 = arith.constant 0 : i32
    %c0_i32_0 = arith.constant 0 : i32
    %c0_i32_1 = arith.constant 0 : i32
    return %c0_i32, %c0_i32_0 : i32, i32
  }
  func.func @transform_32(%arg0: i32) -> (i32, i32) {
    %c0_i32 = arith.constant 0 : i32
    %c0_i32_0 = arith.constant 0 : i32
    %c0_i32_1 = arith.constant 0 : i32
    return %c0_i32, %c0_i32_0 : i32, i32
  }
  func.func @transform_33(%arg0: i32) -> (i32, i32) {
    %c0_i32 = arith.constant 0 : i32
    %c0_i32_0 = arith.constant 0 : i32
    %c0_i32_1 = arith.constant 0 : i32
    return %c0_i32, %c0_i32_0 : i32, i32
  }
  func.func @transform_34(%arg0: i32) -> (i32, i32) {
    %c0_i32 = arith.constant 0 : i32
    %c0_i32_0 = arith.constant 0 : i32
    %c0_i32_1 = arith.constant 0 : i32
    return %c0_i32, %c0_i32_0 : i32, i32
  }
  func.func @transform_35(%arg0: i32) -> (i32, i32) {
    %c0_i32 = arith.constant 0 : i32
    %c0_i32_0 = arith.constant 0 : i32
    %c0_i32_1 = arith.constant 0 : i32
    return %c0_i32, %c0_i32_0 : i32, i32
  }
  func.func @transform_36(%arg0: i32) -> (i32, i32) {
    %c0_i32 = arith.constant 0 : i32
    %c0_i32_0 = arith.constant 0 : i32
    %c0_i32_1 = arith.constant 0 : i32
    return %c0_i32, %c0_i32_0 : i32, i32
  }
  func.func @transform_37(%arg0: i32) -> (i32, i32, i32) {
    %c0_i32 = arith.constant 0 : i32
    %c0_i32_0 = arith.constant 0 : i32
    %c0_i32_1 = arith.constant 0 : i32
    return %arg0, %c0_i32, %c0_i32_0 : i32, i32, i32
  }
}

</mosaic_0001>

<bundles_post_ra>
// kernel: dual_dec_block_forward.1
= control target key start
LH: loop header
LB: loop body
LE: loop exit
PB: predicated region body
PF: predicated region fallthrough
CT: control target
= control target key end

     0   :  { %s5232_s6 = smov 1   ;;  %s5233_s10 = smov 2   ;;  %s6189_s0 = inlined_call_operand.smem [shape: u32[38], index: -1, kind: input, shape index: {}] }
   0x1   :  { %s5307_s5 = sld [smem:[%s6189_s0]]   ;;  %s5234_s14 = smov 3  }
   0x2   :  { %s5312_s9 = sld [smem:[%s6189_s0 + %s5232_s6]]   ;;  %s5235_s18 = smov 4  }
   0x3   :  { %s5317_s13 = sld [smem:[%s6189_s0 + %s5233_s10]]   ;;  %s5236_s22 = smov 5  }
   0x4   :  { %s5322_s17 = sld [smem:[%s6189_s0 + %s5234_s14]]   ;;  %s5237_s26 = smov 6  }
   0x5   :  { %s5327_s21 = sld [smem:[%s6189_s0 + %s5235_s18]]   ;;  %s5238_s30 = smov 7  }
   0x6   :  { %s5332_s25 = sld [smem:[%s6189_s0 + %s5236_s22]]   ;;  %s5239_s4 = smov 8  }
   0x7   :  { %6235 = sst [smem:[#allocation36_spill]] %s5307_s5  ;;  %s5240_s10 = smov 9  }
   0x8   :  { %6236 = sst [smem:[#allocation37_spill]] %s5312_s9  ;;  %s5241_s15 = smov 10  }
   0x9   :  { %6237 = sst [smem:[#allocation38_spill]] %s5317_s13  ;;  %s5242_s20 = smov 11  }
   0xa   :  { %6238 = sst [smem:[#allocation39_spill]] %s5322_s17  ;;  %s5244_s1 = smov 13  }
   0xb   :  { %6239 = sst [smem:[#allocation40_spill]] %s5327_s21  ;;  %s5245_s7 = smov 14  }
   0xc   :  { %6240 = sst [smem:[#allocation41_spill]] %s5332_s25  ;;  %s5247_s22 = smov 16  }
   0xd   :  { %s5337_s29 = sld [smem:[%s6189_s0 + %s5237_s26]]   ;;  %s5243_s26 = smov 12  }
   0xe   :  { %s5342_s3 = sld [smem:[%s6189_s0 + %s5238_s30]]   ;;  %s5248_s28 = smov 17  }
   0xf   :  { %s5347_s8 = sld [smem:[%s6189_s0 + %s5239_s4]]  }
  0x10   :  { %s5352_s14 = sld [smem:[%s6189_s0 + %s5240_s10]]  }
  0x11   :  { %s5357_s19 = sld [smem:[%s6189_s0 + %s5241_s15]]   ;;  %s5246_s15 = smov 15  }
  0x12   :  { %s5362_s24 = sld [smem:[%s6189_s0 + %s5242_s20]]  }
  0x13   :  { %6241 = sst [smem:[#allocation42_spill]] %s5337_s29 }
  0x14   :  { %6242 = sst [smem:[#allocation43_spill]] %s5342_s3 }
  0x15   :  { %6243 = sst [smem:[#allocation44_spill]] %s5347_s8 }
  0x16   :  { %6244 = sst [smem:[#allocation45_spill]] %s5352_s14 }
  0x17   :  { %6245 = sst [smem:[#allocation46_spill]] %s5357_s19 }
  0x18   :  { %6246 = sst [smem:[#allocation47_spill]] %s5362_s24 }
  0x19   :  { %s5367_s30 = sld [smem:[%s6189_s0 + %s5243_s26]]  }
  0x1a   :  { %s5372_s6 = sld [smem:[%s6189_s0 + %s5244_s1]]  }
  0x1b   :  { %s5377_s12 = sld [smem:[%s6189_s0 + %s5245_s7]]   ;;  %s5249_s7 = smov 18  }
  0x1c   :  { %s5382_s20 = sld [smem:[%s6189_s0 + %s5246_s15]]   ;;  %s5250_s15 = smov 19  }
  0x1d   :  { %s5387_s27 = sld [smem:[%s6189_s0 + %s5247_s22]]   ;;  %s5251_s22 = smov 20  }
  0x1e   :  { %s5392_s4 = sld [smem:[%s6189_s0 + %s5248_s28]]   ;;  %s5252_s28 = smov 21  }
  0x1f   :  { %6247 = sst [smem:[#allocation48_spill]] %s5367_s30 }
  0x20   :  { %6248 = sst [smem:[#allocation49_spill]] %s5372_s6 }
  0x21   :  { %6249 = sst [smem:[#allocation50_spill]] %s5377_s12 }
  0x22   :  { %6250 = sst [smem:[#allocation51_spill]] %s5382_s20 }
  0x23   :  { %s5397_s29 = sld [smem:[%s6189_s0 + %s5249_s7]]   ;;  %s5253_s7 = smov 22  }
  0x24   :  { %6251 = sst [smem:[#allocation52_spill]] %s5392_s4 }
  0x25   :  { %s5402_s13 = sld [smem:[%s6189_s0 + %s5250_s15]]   ;;  %s5254_s15 = smov 23  }
  0x26   :  { %s5407_s25 = sld [smem:[%s6189_s0 + %s5251_s22]]   ;;  %s5255_s22 = smov 24  }
  0x27   :  { %s5412_s12 = sld [smem:[%s6189_s0 + %s5252_s28]]   ;;  %s5256_s28 = smov 25  }
  0x28   :  { %s5417_s6 = sld [smem:[%s6189_s0 + %s5253_s7]]   ;;  %s5257_s7 = smov 26  }
  0x29   :  { %6252 = sst [smem:[#allocation53_spill]] %s5397_s29 }
  0x2a   :  { %s5427_s20 = sld [smem:[%s6189_s0 + %s5255_s22]]   ;;  %s5259_s22 = smov 28  }
  0x2b   :  { %6253 = sst [smem:[#allocation54_spill]] %s5402_s13 }
  0x2c   :  { %s5422_s13 = sld [smem:[%s6189_s0 + %s5254_s15]]   ;;  %s5258_s15 = smov 27  }
  0x2d   :  { %6254 = sst [smem:[#allocation55_spill]] %s5412_s12 }
  0x2e   :  { %6255 = sst [smem:[#allocation56_spill]] %s5417_s6 }
  0x2f   :  { %s5432_s9 = sld [smem:[%s6189_s0 + %s5256_s28]]   ;;  %s5260_s28 = smov 29  }
  0x30   :  { %6257 = sst [smem:[#allocation58_spill]] %s5427_s20 }
  0x31   :  { %s5437_s4 = sld [smem:[%s6189_s0 + %s5257_s7]]   ;;  %s5261_s7 = smov 30  }
  0x32   :  { %6256 = sst [smem:[#allocation57_spill]] %s5422_s13 }
  0x33   :  { %s5442_s13 = sld [smem:[%s6189_s0 + %s5258_s15]]   ;;  %s5262_s15 = smov 31  }
  0x34   :  { %s5447_s30 = sld [smem:[%s6189_s0 + %s5259_s22]]   ;;  %s5263_s22 = smov 32  }
  0x35   :  { %6258 = sst [smem:[#allocation59_spill]] %s5432_s9 }
  0x36   :  { %s5452_s9 = sld [smem:[%s6189_s0 + %s5260_s28]]   ;;  %s5264_s28 = smov 33  }
  0x37   :  { %6259 = sst [smem:[#allocation60_spill]] %s5437_s4 }
  0x38   :  { %s5457_s17 = sld [smem:[%s6189_s0 + %s5261_s7]]   ;;  %s5265_s7 = smov 34  }
  0x39   :  { %s5462_s24 = sld [smem:[%s6189_s0 + %s5262_s15]]   ;;  %s5266_s15 = smov 35  }
  0x3a   :  { %s5467_s21 = sld [smem:[%s6189_s0 + %s5263_s22]]   ;;  %s5267_s22 = smov 36  }
  0x3b   :  { %s5472_s8 = sld [smem:[%s6189_s0 + %s5264_s28]]   ;;  %s5268_s28 = smov 37  }
  0x3c   :  { %s5477_s19 = sld [smem:[%s6189_s0 + %s5265_s7]]  }
  0x3d   :  { %s5487_s14 = sld [smem:[%s6189_s0 + %s5267_s22]]  }
  0x3f   :  { %6260 = sst [smem:[#allocation61_spill]] %s5462_s24 }
  0x40   :  { %s5482_s24 = sld [smem:[%s6189_s0 + %s5266_s15]]  }
  0x41   :  { %6261 = sst [smem:[#allocation62_spill]] %s5472_s8 }
  0x42   :  { %s5492_s8 = sld [smem:[%s6189_s0 + %s5268_s28]]  }
  0x43   :  { %80 = vsyncpa [#allocation4], 0 }
  0x44   :  { %81 = vsyncpa [#allocation7], 0 }
  0x45   :  { %82 = vsyncpa [#allocation10], 0 }
  0x46   :  { %83 = vsyncpa [#allocation13], 0 }
  0x47   :  { %84 = vsyncpa [#allocation16], 0 }
  0x48   :  { %85 = vsyncpa [#allocation19], 0 }
  0x49   :  { %86 = vsyncpa [#allocation22], 0 }
  0x4a   :  { %87 = vsyncpa [#allocation25], 0 }
  0x4b   :  { %88 = vsyncpa [#allocation5], 0 }
  0x4c   :  { %90 = vsyncpa [#allocation5 + $0x1], 0  ;;  %s5494_s7 = smov 0   ;;  %s5496_s10 = smov 0  }
  0x4d   :  { %s5498_s11 = smov 0   ;;  %s5500_s15 = smov 0  }
  0x4e LB: > { %s6262_s6 = sld [smem:[#allocation56_spill]]  ;;  %s6263_s4 = sld [smem:[#allocation60_spill]]  ;;  %s5222_s10 = sphi %s5496_s10, %s6334_s10   ;;  %s5218_s7 = sphi %s5494_s7, %s6333_s7   ;;  %s5230_s15 = sphi %s5500_s15, %s6330_s15   ;;  %s5226_s11 = sphi %s5498_s11, %s6332_s11  }
  0x4f   : > { %s6264_s3 = sld [smem:[#allocation43_spill]]  ;;  %s6265_s29 = sld [smem:[#allocation53_spill]] }
  0x50   : > { %s6266_s20 = sld [smem:[#allocation58_spill]]  ;;  %s6267_s12 = sld [smem:[#allocation55_spill]] }
  0x51   : > { %6268 = sst [smem:[#allocation63_spill]] %s5218_s7  ;;  %s5515_s0 = sadd.s32 4294967295, %s5230_s15  }
  0x52   : > { %6269 = sst [smem:[#allocation64_spill]] %s5226_s11  ;;  %s3989_s16 = sadd.s32 4294967294, %s5230_s15  }
  0x53   : > { %s5519_s18 = sadd.s32 1, %s5230_s15   ;;  %s915_s22 = sadd.s32 1, %s5226_s11 }
  0x54   : > { %6270 = sst [smem:[#allocation65_spill]] %s5519_s18  ;;  %s912_s23 = ssub.s32 %s5230_s15, %s5519_s18 }
  0x55   : > { %p925_p0 = scmp.ne.s32.totalorder %s5226_s11, %s5222_s10  ;;  %p913_p1 = scmp.eq.s32.totalorder %s912_s23, 0 }
  0x56   : > { %p926_p2 = scmp.eq.s32.totalorder %s5515_s0, 1  ;;  %p931_p3 = scmp.ne.s32.totalorder %s5222_s10, %s5218_s7 }
  0x57   : > { %p932_p4 = scmp.eq.s32.totalorder %s3989_s16, 1  ;;  %p3990_p7 = scmp.ge.s32.totalorder %s5230_s15, 1 }
  0x58   : > { %s5530_s26 = scalar_select %p913_p1, %s5226_s11, %s915_s22  }
  0x59   : > { %p5532_p5 = por %p926_p2, %p925_p0  ;;  %p5536_p6 = por %p932_p4, %p931_p3 }
  0x5a   : > { %6271 = sst [smem:[#allocation66_spill]] %s5530_s26  ;;  %p939_p8 = scmp.lt.s32.totalorder %s5230_s15, 3 }
  0x5b   : > { %s6272_s28 = scalar_select %p5532_p5, 1, 0 }
  0x5c   : > { %s6273_s1 = scalar_select %p5536_p6, 1, 0 }
  0x5d   : > { %p6204_p9 = scmp.eq.s32.totalorder %s5515_s0, 0  ;;  %p5543_p10 = pnand %p3990_p7, %p939_p8 }
  0x5e   : > { %6274 = sst [smem:[#allocation67_spill]] %s6273_s1  ;;  %s5269_s16 = smov [#allocation6]  }
  0x5f   : > { %s6275_s2 = scalar_select %p5543_p10, 1, 0 }
  0x60   : > { %s993_s22 = sshll.u32 %s5269_s16, 4  ;;  %p4488_p11 = pneg %p5543_p10  ;;  %s994_s22 = int_to_ptr.vmem [resolvable:$true] %s993_s22 }
  0x61   : > { %s5270_s23 = smov [#allocation9]   ;;  %s5271_s18 = smov [#allocation12]  }
  0x62   : > { %s1018_s26 = sshll.u32 %s5270_s23, 4  ;;  %p5551_p12 = pnand %p6204_p9, %p4488_p11  ;;  %s5555_s26 = int_to_ptr.vmem [resolvable:$true] %s1018_s26 }
  0x63   : > { %s1043_s1 = sshll.u32 %s5271_s18, 4  ;;  %s4744_s7 = scalar_lea.hbm %s6265_s29, 16  ;;  %s5557_s1 = int_to_ptr.vmem [resolvable:$true] %s1043_s1 }
  0x64   : > { %p4745_p13 = scmp.ne.s32.totalorder %s6265_s29, %s4744_s7  ;;  %p5563_p0 = pneg %p5551_p12 }
  0x65   : > { %p4751_p3 = scmp.lt.u32.totalorder %s4744_s7, %s6265_s29 }
  0x66   : > { %p4747_p1 = pnand %p5563_p0, %p4745_p13 }
  0x68   : > { %p4748_p2 = pneg %p4747_p1 }
  0x6a   : > { %p4753_p4 = pnand %p4751_p3, %p4748_p2 }
  0x6c   : > { %4756 = shalt.err (!%p4753_p4)
}
  0x6d   : > { %s4757_s23 = scalar_lea.vmem %s994_s22, 16  ;;  %s4764_s18 = scalar_lea.vmem %s994_s22, 32 }
  0x6e   : > { %p4758_p7 = scmp.ne.s32.totalorder %s994_s22, %s4757_s23  ;;  %p4765_p9 = scmp.lt.s32.totalorder %s994_s22, %s994_s22 }
  0x6f   : > { %p4766_p6 = scmp.lt.s32.totalorder %s4764_s18, %s4757_s23 }
  0x70   : > { %p4760_p8 = pnand %p4758_p7, %p5563_p0 }
  0x71   : > { %p4767_p5 = por %p4766_p6, %p4765_p9 }
  0x72   : > { %p4761_p11 = pneg %p4760_p8 }
  0x74   : > { %p4768_p10 = pnand %p4767_p5, %p4761_p11 }
  0x76   : > { %4771 = shalt.err (!%p4768_p10)
}
  0x77   : > { %4494 = dma.hbm_to_vmem [thread:$0]  (!%p5551_p12), %s6265_s29, 16, %s994_s22, [#allocation7]  }
  0x78   : > { %s4772_s7 = scalar_lea.hbm %s6267_s12, 16 }
  0x79   : > { %p4773_p13 = scmp.ne.s32.totalorder %s6267_s12, %s4772_s7  ;;  %p4779_p3 = scmp.lt.u32.totalorder %s4772_s7, %s6267_s12 }
  0x7b   : > { %p4775_p1 = pnand %p4773_p13, %p5563_p0 }
  0x7d   : > { %p4776_p2 = pneg %p4775_p1 }
  0x7f   : > { %p4781_p4 = pnand %p4779_p3, %p4776_p2 }
  0x81   : > { %4784 = shalt.err (!%p4781_p4)
}
  0x82   : > { %s4785_s23 = scalar_lea.vmem %s5555_s26, 16  ;;  %s4792_s18 = scalar_lea.vmem %s5555_s26, 32 }
  0x83   : > { %p4786_p5 = scmp.ne.s32.totalorder %s5555_s26, %s4785_s23  ;;  %p4793_p10 = scmp.lt.s32.totalorder %s5555_s26, %s5555_s26 }
  0x84   : > { %p4794_p7 = scmp.lt.s32.totalorder %s4792_s18, %s4785_s23 }
  0x85   : > { %p4788_p6 = pnand %p4786_p5, %p5563_p0 }
  0x86   : > { %p4795_p8 = por %p4794_p7, %p4793_p10 }
  0x87   : > { %p4789_p9 = pneg %p4788_p6 }
  0x89   : > { %p4796_p11 = pnand %p4795_p8, %p4789_p9 }
  0x8b   : > { %4799 = shalt.err (!%p4796_p11)
}
  0x8c   : > { %4500 = dma.hbm_to_vmem [thread:$0]  (!%p5551_p12), %s6267_s12, 16, %s5555_s26, [#allocation10]  }
  0x8d   : > { %s4800_s22 = scalar_lea.hbm %s6266_s20, 16 }
  0x8e   : > { %p4801_p13 = scmp.ne.s32.totalorder %s6266_s20, %s4800_s22  ;;  %p4807_p3 = scmp.lt.u32.totalorder %s4800_s22, %s6266_s20 }
  0x90   : > { %p4803_p1 = pnand %p4801_p13, %p5563_p0 }
  0x92   : > { %p4804_p2 = pneg %p4803_p1 }
  0x94   : > { %p4809_p4 = pnand %p4807_p3, %p4804_p2 }
  0x96   : > { %4812 = shalt.err (!%p4809_p4)
}
  0x97   : > { %s4813_s7 = scalar_lea.vmem %s5557_s1, 16  ;;  %s4820_s23 = scalar_lea.vmem %s5557_s1, 32 }
  0x98   : > { %p4814_p5 = scmp.ne.s32.totalorder %s5557_s1, %s4813_s7  ;;  %p4821_p10 = scmp.lt.s32.totalorder %s5557_s1, %s5557_s1 }
  0x99   : > { %p4822_p7 = scmp.lt.s32.totalorder %s4820_s23, %s4813_s7 }
  0x9a   : > { %p4816_p6 = pnand %p4814_p5, %p5563_p0 }
  0x9b   : > { %p4823_p8 = por %p4822_p7, %p4821_p10 }
  0x9c   : > { %p4817_p9 = pneg %p4816_p6 }
  0x9e   : > { %p4824_p11 = pnand %p4823_p8, %p4817_p9 }
  0xa0   : > { %4827 = shalt.err (!%p4824_p11)
}
  0xa1   : > { %4506 = dma.hbm_to_vmem [thread:$0]  (!%p5551_p12), %s6266_s20, 16, %s5557_s1, [#allocation13]  }
  0xa2   : > { %s5272_s26 = smov [#allocation15]   ;;  %s4828_s22 = scalar_lea.hbm %s5442_s13, 256 }
  0xa3   : > { %s1067_s18 = sshll.u32 %s5272_s26, 4  ;;  %p4829_p13 = scmp.ne.s32.totalorder %s5442_s13, %s4828_s22  ;;  %s1068_s18 = int_to_ptr.vmem [resolvable:$true] %s1067_s18 }
  0xa4   : > { %p4835_p3 = scmp.lt.u32.totalorder %s4828_s22, %s5442_s13 }
  0xa5   : > { %p4831_p1 = pnand %p4829_p13, %p5563_p0 }
  0xa7   : > { %p4832_p2 = pneg %p4831_p1 }
  0xa9   : > { %p4837_p4 = pnand %p4835_p3, %p4832_p2 }
  0xab   : > { %4840 = shalt.err (!%p4837_p4)
}
  0xac   : > { %s4841_s7 = scalar_lea.vmem %s1068_s18, 256  ;;  %p4849_p10 = scmp.lt.s32.totalorder %s1068_s18, %s1068_s18 }
  0xad   : > { %p4842_p5 = scmp.ne.s32.totalorder %s1068_s18, %s4841_s7  ;;  %p4850_p7 = scmp.lt.s32.totalorder %s4841_s7, %s4841_s7 }
  0xaf   : > { %p4844_p6 = pnand %p4842_p5, %p5563_p0  ;;  %p4851_p8 = por %p4850_p7, %p4849_p10 }
  0xb1   : > { %p4845_p9 = pneg %p4844_p6 }
  0xb3   : > { %p4852_p11 = pnand %p4851_p8, %p4845_p9 }
  0xb5   : > { %4855 = shalt.err (!%p4852_p11)
}
  0xb6   : > { %s5273_s1 = smov 64   ;;  %s5274_s23 = smov 4  }
  0xb7   : > { %4512 = dma.hbm_to_vmem [thread:$0]  (!%p5551_p12), %s5442_s13, 256, %s1068_s18, [#allocation16], %s5273_s1, %s5273_s1, %s5274_s23  }
  0xb8   : > { %s5275_s26 = smov [#allocation18]   ;;  %s5276_s12 = smov [#allocation21]  }
  0xb9   : > { %s1092_s22 = sshll.u32 %s5275_s26, 4  ;;  %s1117_s20 = sshll.u32 %s5276_s12, 4  ;;  %s1093_s22 = int_to_ptr.vmem [resolvable:$true] %s1092_s22  ;;  %s5617_s20 = int_to_ptr.vmem [resolvable:$true] %s1117_s20 }
  0xba   : > { %s4856_s7 = scalar_lea.hbm %s5452_s9, 16 }
  0xbb   : > { %p4857_p13 = scmp.ne.s32.totalorder %s5452_s9, %s4856_s7  ;;  %p4863_p3 = scmp.lt.u32.totalorder %s4856_s7, %s5452_s9 }
  0xbd   : > { %p4859_p1 = pnand %p4857_p13, %p5563_p0 }
  0xbf   : > { %p4860_p2 = pneg %p4859_p1 }
  0xc1   : > { %p4865_p4 = pnand %p4863_p3, %p4860_p2 }
  0xc3   : > { %4868 = shalt.err (!%p4865_p4)
}
  0xc4   : > { %s4869_s29 = scalar_lea.vmem %s1093_s22, 16  ;;  %s4876_s18 = scalar_lea.vmem %s1093_s22, 32 }
  0xc5   : > { %p4870_p5 = scmp.ne.s32.totalorder %s1093_s22, %s4869_s29  ;;  %p4877_p10 = scmp.lt.s32.totalorder %s1093_s22, %s1093_s22 }
  0xc6   : > { %p4878_p7 = scmp.lt.s32.totalorder %s4876_s18, %s4869_s29 }
  0xc7   : > { %p4872_p6 = pnand %p4870_p5, %p5563_p0 }
  0xc8   : > { %p4879_p8 = por %p4878_p7, %p4877_p10 }
  0xc9   : > { %p4873_p9 = pneg %p4872_p6 }
  0xcb   : > { %p4880_p11 = pnand %p4879_p8, %p4873_p9 }
  0xcd   : > { %4883 = shalt.err (!%p4880_p11)
}
  0xce   : > { %4518 = dma.hbm_to_vmem [thread:$0]  (!%p5551_p12), %s5452_s9, 16, %s1093_s22, [#allocation19]  }
  0xcf   : > { %s4884_s12 = scalar_lea.hbm %s5467_s21, 16 }
  0xd0   : > { %p4885_p13 = scmp.ne.s32.totalorder %s5467_s21, %s4884_s12  ;;  %p4891_p3 = scmp.lt.u32.totalorder %s4884_s12, %s5467_s21 }
  0xd2   : > { %p4887_p1 = pnand %p4885_p13, %p5563_p0 }
  0xd4   : > { %p4888_p2 = pneg %p4887_p1 }
  0xd6   : > { %p4893_p4 = pnand %p4891_p3, %p4888_p2 }
  0xd8   : > { %4896 = shalt.err (!%p4893_p4)
}
  0xd9   : > { %s4897_s29 = scalar_lea.vmem %s5617_s20, 16  ;;  %s4904_s1 = scalar_lea.vmem %s5617_s20, 32 }
  0xda   : > { %p4898_p5 = scmp.ne.s32.totalorder %s5617_s20, %s4897_s29  ;;  %p4905_p10 = scmp.lt.s32.totalorder %s5617_s20, %s5617_s20 }
  0xdb   : > { %p4906_p7 = scmp.lt.s32.totalorder %s4904_s1, %s4897_s29 }
  0xdc   : > { %p4900_p6 = pnand %p4898_p5, %p5563_p0 }
  0xdd   : > { %p4907_p8 = por %p4906_p7, %p4905_p10 }
  0xde   : > { %p4901_p9 = pneg %p4900_p6 }
  0xe0   : > { %p4908_p11 = pnand %p4907_p8, %p4901_p9 }
  0xe2   : > { %4911 = shalt.err (!%p4908_p11)
}
  0xe3   : > { %4524 = dma.hbm_to_vmem [thread:$0]  (!%p5551_p12), %s5467_s21, 16, %s5617_s20, [#allocation22]  }
  0xe4   : > { %s5277_s23 = smov [#allocation3]   ;;  %s5278_s22 = smov [#allocation8]  }
  0xe5   : > { %s979_s26 = sshll.u32 %s5277_s23, 4  ;;  %s1007_s7 = sshll.u32 %s5278_s22, 4  ;;  %s980_s26 = int_to_ptr.vmem [resolvable:$true] %s979_s26  ;;  %s5645_s7 = int_to_ptr.vmem [resolvable:$true] %s1007_s7 }
  0xe6   : > { %s4912_s18 = scalar_lea.hbm %s5387_s27, 16 }
  0xe7   : > { %p4913_p13 = scmp.ne.s32.totalorder %s5387_s27, %s4912_s18  ;;  %p4919_p3 = scmp.lt.u32.totalorder %s4912_s18, %s5387_s27 }
  0xe9   : > { %p4915_p1 = pnand %p4913_p13, %p5563_p0 }
  0xeb   : > { %p4916_p2 = pneg %p4915_p1 }
  0xed   : > { %p4921_p4 = pnand %p4919_p3, %p4916_p2 }
  0xef   : > { %4924 = shalt.err (!%p4921_p4)
}
  0xf0   : > { %s4925_s12 = scalar_lea.vmem %s980_s26, 16  ;;  %s4932_s20 = scalar_lea.vmem %s980_s26, 32 }
  0xf1   : > { %p4926_p5 = scmp.ne.s32.totalorder %s980_s26, %s4925_s12  ;;  %p4933_p10 = scmp.lt.s32.totalorder %s980_s26, %s980_s26 }
  0xf2   : > { %p4934_p7 = scmp.lt.s32.totalorder %s4932_s20, %s4925_s12 }
  0xf3   : > { %p4928_p6 = pnand %p4926_p5, %p5563_p0 }
  0xf4   : > { %p4935_p8 = por %p4934_p7, %p4933_p10 }
  0xf5   : > { %p4929_p9 = pneg %p4928_p6 }
  0xf7   : > { %p4936_p11 = pnand %p4935_p8, %p4929_p9 }
  0xf9   : > { %4939 = shalt.err (!%p4936_p11)
}
  0xfa   : > { %4491 = dma.hbm_to_vmem [thread:$0]  (!%p5551_p12), %s5387_s27, 16, %s980_s26, [#allocation4]  }
  0xfb   : > { %s4940_s29 = scalar_lea.hbm %s5407_s25, 16 }
  0xfc   : > { %p4941_p13 = scmp.ne.s32.totalorder %s5407_s25, %s4940_s29  ;;  %p4947_p3 = scmp.lt.u32.totalorder %s4940_s29, %s5407_s25 }
  0xfe   : > { %p4943_p1 = pnand %p4941_p13, %p5563_p0 }
 0x100   : > { %p4944_p2 = pneg %p4943_p1 }
 0x102   : > { %p4949_p4 = pnand %p4947_p3, %p4944_p2 }
 0x104   : > { %4952 = shalt.err (!%p4949_p4)
}
 0x105   : > { %s4953_s1 = scalar_lea.vmem %s5645_s7, 16  ;;  %s4960_s23 = scalar_lea.vmem %s5645_s7, 32 }
 0x106   : > { %p4954_p5 = scmp.ne.s32.totalorder %s5645_s7, %s4953_s1  ;;  %p4961_p10 = scmp.lt.s32.totalorder %s5645_s7, %s5645_s7 }
 0x107   : > { %p4962_p7 = scmp.lt.s32.totalorder %s4960_s23, %s4953_s1 }
 0x108   : > { %p4956_p6 = pnand %p4954_p5, %p5563_p0 }
 0x109   : > { %p4963_p8 = por %p4962_p7, %p4961_p10 }
 0x10a   : > { %p4957_p9 = pneg %p4956_p6 }
 0x10c   : > { %p4964_p11 = pnand %p4963_p8, %p4957_p9 }
 0x10e   : > { %4967 = shalt.err (!%p4964_p11)
}
 0x10f   : > { %4497 = dma.hbm_to_vmem [thread:$0]  (!%p5551_p12), %s5407_s25, 16, %s5645_s7, [#allocation7]  }
 0x110   : > { %s5279_s26 = smov [#allocation11]   ;;  %s5280_s18 = smov [#allocation14]  }
 0x111   : > { %s1029_s22 = sshll.u32 %s5279_s26, 4  ;;  %s1057_s12 = sshll.u32 %s5280_s18, 4  ;;  %s1030_s22 = int_to_ptr.vmem [resolvable:$true] %s1029_s22  ;;  %s5673_s12 = int_to_ptr.vmem [resolvable:$true] %s1057_s12 }
 0x112   : > { %s4968_s20 = scalar_lea.hbm %s6262_s6, 16 }
 0x113   : > { %p4969_p13 = scmp.ne.s32.totalorder %s6262_s6, %s4968_s20  ;;  %p4975_p3 = scmp.lt.u32.totalorder %s4968_s20, %s6262_s6 }
 0x115   : > { %p4971_p1 = pnand %p4969_p13, %p5563_p0 }
 0x117   : > { %p4972_p2 = pneg %p4971_p1 }
 0x119   : > { %p4977_p4 = pnand %p4975_p3, %p4972_p2 }
 0x11b   : > { %4980 = shalt.err (!%p4977_p4)
}
 0x11c   : > { %s4981_s29 = scalar_lea.vmem %s1030_s22, 16  ;;  %s4988_s7 = scalar_lea.vmem %s1030_s22, 32 }
 0x11d   : > { %p4982_p5 = scmp.ne.s32.totalorder %s1030_s22, %s4981_s29  ;;  %p4989_p10 = scmp.lt.s32.totalorder %s1030_s22, %s1030_s22 }
 0x11e   : > { %p4990_p7 = scmp.lt.s32.totalorder %s4988_s7, %s4981_s29 }
 0x11f   : > { %p4984_p6 = pnand %p4982_p5, %p5563_p0 }
 0x120   : > { %p4991_p8 = por %p4990_p7, %p4989_p10 }
 0x121   : > { %p4985_p9 = pneg %p4984_p6 }
 0x123   : > { %p4992_p11 = pnand %p4991_p8, %p4985_p9 }
 0x125   : > { %4995 = shalt.err (!%p4992_p11)
}
 0x126   : > { %4503 = dma.hbm_to_vmem [thread:$0]  (!%p5551_p12), %s6262_s6, 16, %s1030_s22, [#allocation10]  }
 0x127   : > { %s4996_s1 = scalar_lea.hbm %s6263_s4, 16 }
 0x128   : > { %p4997_p13 = scmp.ne.s32.totalorder %s6263_s4, %s4996_s1  ;;  %p5003_p3 = scmp.lt.u32.totalorder %s4996_s1, %s6263_s4 }
 0x12a   : > { %p4999_p1 = pnand %p4997_p13, %p5563_p0 }
 0x12c   : > { %p5000_p2 = pneg %p4999_p1 }
 0x12e   : > { %p5005_p4 = pnand %p5003_p3, %p5000_p2 }
 0x130   : > { %5008 = shalt.err (!%p5005_p4)
}
 0x131   : > { %s5009_s23 = scalar_lea.vmem %s5673_s12, 16  ;;  %s5016_s26 = scalar_lea.vmem %s5673_s12, 32 }
 0x132   : > { %p5010_p5 = scmp.ne.s32.totalorder %s5673_s12, %s5009_s23  ;;  %p5017_p10 = scmp.lt.s32.totalorder %s5673_s12, %s5673_s12 }
 0x133   : > { %p5018_p7 = scmp.lt.s32.totalorder %s5016_s26, %s5009_s23 }
 0x134   : > { %p5012_p6 = pnand %p5010_p5, %p5563_p0 }
 0x135   : > { %p5019_p8 = por %p5018_p7, %p5017_p10 }
 0x136   : > { %p5013_p9 = pneg %p5012_p6 }
 0x138   : > { %p5020_p11 = pnand %p5019_p8, %p5013_p9 }
 0x13a   : > { %5023 = shalt.err (!%p5020_p11)
}
 0x13b   : > { %4509 = dma.hbm_to_vmem [thread:$0]  (!%p5551_p12), %s6263_s4, 16, %s5673_s12, [#allocation13]  }
 0x13c   : > { %s5281_s22 = smov [#allocation17]   ;;  %s5282_s20 = smov [#allocation20]  }
 0x13d   : > { %s1081_s18 = sshll.u32 %s5281_s22, 4  ;;  %s1103_s29 = sshll.u32 %s5282_s20, 4  ;;  %s1082_s18 = int_to_ptr.vmem [resolvable:$true] %s1081_s18  ;;  %s5701_s29 = int_to_ptr.vmem [resolvable:$true] %s1103_s29 }
 0x13e   : > { %s5024_s7 = scalar_lea.hbm %s5447_s30, 16 }
 0x13f   : > { %p5025_p13 = scmp.ne.s32.totalorder %s5447_s30, %s5024_s7  ;;  %p5031_p3 = scmp.lt.u32.totalorder %s5024_s7, %s5447_s30 }
 0x141   : > { %p5027_p1 = pnand %p5025_p13, %p5563_p0 }
 0x143   : > { %p5028_p2 = pneg %p5027_p1 }
 0x145   : > { %p5033_p4 = pnand %p5031_p3, %p5028_p2 }
 0x147   : > { %5036 = shalt.err (!%p5033_p4)
}
 0x148   : > { %s5037_s1 = scalar_lea.vmem %s1082_s18, 16  ;;  %s5044_s12 = scalar_lea.vmem %s1082_s18, 32 }
 0x149   : > { %p5038_p5 = scmp.ne.s32.totalorder %s1082_s18, %s5037_s1  ;;  %p5045_p10 = scmp.lt.s32.totalorder %s1082_s18, %s1082_s18 }
 0x14a   : > { %p5046_p7 = scmp.lt.s32.totalorder %s5044_s12, %s5037_s1 }
 0x14b   : > { %p5040_p6 = pnand %p5038_p5, %p5563_p0 }
 0x14c   : > { %p5047_p8 = por %p5046_p7, %p5045_p10 }
 0x14d   : > { %p5041_p9 = pneg %p5040_p6 }
 0x14f   : > { %p5048_p11 = pnand %p5047_p8, %p5041_p9 }
 0x151   : > { %5051 = shalt.err (!%p5048_p11)
}
 0x152   : > { %4515 = dma.hbm_to_vmem [thread:$0]  (!%p5551_p12), %s5447_s30, 16, %s1082_s18, [#allocation16]  }
 0x153   : > { %s5052_s23 = scalar_lea.hbm %s5457_s17, 16 }
 0x154   : > { %p5053_p13 = scmp.ne.s32.totalorder %s5457_s17, %s5052_s23  ;;  %p5059_p3 = scmp.lt.u32.totalorder %s5052_s23, %s5457_s17 }
 0x156   : > { %p5055_p1 = pnand %p5053_p13, %p5563_p0 }
 0x158   : > { %p5056_p2 = pneg %p5055_p1 }
 0x15a   : > { %p5061_p4 = pnand %p5059_p3, %p5056_p2 }
 0x15c   : > { %5064 = shalt.err (!%p5061_p4)
}
 0x15d   : > { %s5065_s26 = scalar_lea.vmem %s5701_s29, 16  ;;  %s5072_s22 = scalar_lea.vmem %s5701_s29, 32 }
 0x15e   : > { %p5066_p5 = scmp.ne.s32.totalorder %s5701_s29, %s5065_s26  ;;  %p5073_p10 = scmp.lt.s32.totalorder %s5701_s29, %s5701_s29 }
 0x15f   : > { %p5074_p7 = scmp.lt.s32.totalorder %s5072_s22, %s5065_s26 }
 0x160   : > { %p5068_p6 = pnand %p5066_p5, %p5563_p0 }
 0x161   : > { %p5075_p8 = por %p5074_p7, %p5073_p10 }
 0x162   : > { %p5069_p9 = pneg %p5068_p6 }
 0x164   : > { %p5076_p11 = pnand %p5075_p8, %p5069_p9 }
 0x166   : > { %5079 = shalt.err (!%p5076_p11)
}
 0x167   : > { %4521 = dma.hbm_to_vmem [thread:$0]  (!%p5551_p12), %s5457_s17, 16, %s5701_s29, [#allocation19]  }
 0x168   : > { %s5283_s18 = smov [#allocation23]   ;;  %s5284_s7 = smov [#allocation24]  }
 0x169   : > { %s1131_s20 = sshll.u32 %s5283_s18, 4  ;;  %s1145_s1 = sshll.u32 %s5284_s7, 4  ;;  %s1132_s20 = int_to_ptr.vmem [resolvable:$true] %s1131_s20  ;;  %s5729_s1 = int_to_ptr.vmem [resolvable:$true] %s1145_s1 }
 0x16a   : > { %s5080_s12 = scalar_lea.hbm %s5477_s19, 16 }
 0x16b   : > { %p5081_p13 = scmp.ne.s32.totalorder %s5477_s19, %s5080_s12  ;;  %p5087_p3 = scmp.lt.u32.totalorder %s5080_s12, %s5477_s19 }
 0x16d   : > { %p5083_p1 = pnand %p5081_p13, %p5563_p0 }
 0x16f   : > { %p5084_p2 = pneg %p5083_p1 }
 0x171   : > { %p5089_p4 = pnand %p5087_p3, %p5084_p2 }
 0x173   : > { %5092 = shalt.err (!%p5089_p4)
}
 0x174   : > { %s5093_s23 = scalar_lea.vmem %s1132_s20, 16  ;;  %s5100_s29 = scalar_lea.vmem %s1132_s20, 32 }
 0x175   : > { %p5094_p5 = scmp.ne.s32.totalorder %s1132_s20, %s5093_s23  ;;  %p5101_p10 = scmp.lt.s32.totalorder %s1132_s20, %s1132_s20 }
 0x176   : > { %p5102_p7 = scmp.lt.s32.totalorder %s5100_s29, %s5093_s23 }
 0x177   : > { %p5096_p6 = pnand %p5094_p5, %p5563_p0 }
 0x178   : > { %p5103_p8 = por %p5102_p7, %p5101_p10 }
 0x179   : > { %p5097_p9 = pneg %p5096_p6 }
 0x17b   : > { %p5104_p11 = pnand %p5103_p8, %p5097_p9 }
 0x17d   : > { %5107 = shalt.err (!%p5104_p11)
}
 0x17e   : > { %4527 = dma.hbm_to_vmem [thread:$0]  (!%p5551_p12), %s5477_s19, 16, %s1132_s20, [#allocation22]  }
 0x17f   : > { %s5108_s26 = scalar_lea.hbm %s5487_s14, 16 }
 0x180   : > { %p5109_p13 = scmp.ne.s32.totalorder %s5487_s14, %s5108_s26  ;;  %p5115_p3 = scmp.lt.u32.totalorder %s5108_s26, %s5487_s14 }
 0x182   : > { %p5111_p1 = pnand %p5109_p13, %p5563_p0 }
 0x184   : > { %p5112_p2 = pneg %p5111_p1 }
 0x186   : > { %p5117_p4 = pnand %p5115_p3, %p5112_p2 }
 0x188   : > { %5120 = shalt.err (!%p5117_p4)
}
 0x189   : > { %s5121_s22 = scalar_lea.vmem %s5729_s1, 16  ;;  %s5128_s18 = scalar_lea.vmem %s5729_s1, 32 }
 0x18a   : > { %p5122_p5 = scmp.ne.s32.totalorder %s5729_s1, %s5121_s22  ;;  %p5129_p10 = scmp.lt.s32.totalorder %s5729_s1, %s5729_s1 }
 0x18b   : > { %p5130_p7 = scmp.lt.s32.totalorder %s5128_s18, %s5121_s22 }
 0x18c   : > { %p5124_p6 = pnand %p5122_p5, %p5563_p0 }
 0x18d   : > { %p5131_p8 = por %p5130_p7, %p5129_p10 }
 0x18e   : > { %p5125_p9 = pneg %p5124_p6 }
 0x190   : > { %p5132_p11 = pnand %p5131_p8, %p5125_p9 }
 0x192   : > { %5135 = shalt.err (!%p5132_p11)
}
 0x193   : > { %4530 = dma.hbm_to_vmem [thread:$0]  (!%p5551_p12), %s5487_s14, 16, %s5729_s1, [#allocation25]  }
 0x194   : > { %p6278_p13 = scmp.ne.s32.totalorder %s6275_s2, 0 }
 0x195   : > { %p6279_p1 = scmp.eq.s32.totalorder (!%p6278_p13), %s5515_s0, 0 }
 0x196   : > { %1207 = sbr.rel (%p6278_p13) target bundleno = 6523 (0x197b), region = 168 }
 0x19d   : > { %5181 = dma.done.wait (%p6279_p1), [#allocation4], 16   ;;  %p6280_p0 = pmov %p6279_p1 }
 0x19f   : > { %5183 = vsyncadd (%p6280_p0), [#allocation4], 4294967280  ;;  %p6281_p2 = pmov %p6280_p0 }
 0x1a0   : > { %p6282_p3 = pmov %p6280_p0 }
 0x1a1   : > { %5185 = dma.done.wait (%p6281_p2), [#allocation7], 32  }
 0x1a2   : > { %5187 = vsyncadd (%p6282_p3), [#allocation7], 4294967264  ;;  %p6283_p4 = pmov %p6280_p0 }
 0x1a3   : > { %p6284_p12 = pmov %p6280_p0 }
 0x1a4   : > { %5189 = dma.done.wait (%p6283_p4), [#allocation10], 32  }
 0x1a5   : > { %5191 = vsyncadd (%p6284_p12), [#allocation10], 4294967264  ;;  %p6285_p5 = pmov %p6280_p0 }
 0x1a6   : > { %p6286_p6 = pmov %p6280_p0 }
 0x1a7   : > { %5193 = dma.done.wait (%p6285_p5), [#allocation13], 32  }
 0x1a8   : > { %5195 = vsyncadd (%p6286_p6), [#allocation13], 4294967264  ;;  %p6287_p9 = pmov %p6280_p0 }
 0x1a9   : > { %p6288_p10 = pmov %p6280_p0 }
 0x1aa   : > { %5197 = dma.done.wait (%p6287_p9), [#allocation16], 272  }
 0x1ab   : > { %5199 = vsyncadd (%p6288_p10), [#allocation16], 4294967024  ;;  %p6289_p7 = pmov %p6280_p0 }
 0x1ac   : > { %p6290_p8 = pmov %p6280_p0 }
 0x1ad   : > { %5201 = dma.done.wait (%p6289_p7), [#allocation19], 32  }
 0x1ae   : > { %5203 = vsyncadd (%p6290_p8), [#allocation19], 4294967264  ;;  %p6291_p11 = pmov %p6280_p0 }
 0x1af   : > { %p6292_p13 = pmov %p6280_p0 }
 0x1b0   : > { %5205 = dma.done.wait (%p6291_p11), [#allocation22], 32  }
 0x1b1   : > { %5207 = vsyncadd (%p6292_p13), [#allocation22], 4294967264  ;;  %p6293_p1 = pmov %p6280_p0 }
 0x1b3   : > { %5209 = dma.done.wait (%p6293_p1), [#allocation25], 16  }
 0x1b4   : > { %5211 = vsyncadd (%p6280_p0), [#allocation25], 4294967280  ;;  %s6294_s5 = sld [smem:[#allocation36_spill]]  ;;  %p1374_p2 = scmp.lt.s32.totalorder %s5515_s0, 1  ;;  %v5285_v0 = vmov 0.0   ;;  %vm5286_vm0 = vmmov 0  }
 0x1b5   : > { %s6295_s11 = sld [smem:[#allocation45_spill]]  ;;  %4194 = vmatprep.subr.bf16.mxu1 %v5285_v0  ;;  %4198 = vmatprep.mubr.msk.bf16.mxu1 %vm5286_vm0, %v5285_v0  ;;  %v4664_v1 = vld [vmem:[%s6264_s3] sm:$0xff]   ;;  %v4665_v2 = vld [vmem:[%s6264_s3 + $0x8] sm:$0xff]   ;;  %vm1430_vm1 = vcmask 261120   ;;  %s6297_s1 = sld [smem:[#allocation46_spill]]  ;;  %vm1539_vm2 = vcmask 64512  }
 0x1b6   : > { %s1375_s16 = scalar_select %p1374_p2, %s5515_s0, 1  ;;  %4210 = vmatprep.subr.bf16.mxu0 %v5285_v0  ;;  %4212 = vmatprep.mubr.msk.bf16.mxu0 %vm5286_vm0, %v5285_v0  ;;  %vm1604_vm3 = vcmask 1043456   ;;  %vm1764_vm4 = vcmask 130112   ;;  %vm1880_vm5 = vcmask 195712   ;;  %vm1996_vm6 = vcmask 261312  }
 0x1b7   : > { %4195 = vmatpush3.bf16.msra.mxu1 %v4664_v1  ;;  %s6298_s12 = sld [smem:[#allocation44_spill]]  ;;  %s6226_s23 = smov 112   ;;  %vm3595_vm8 = vcmask 523264  }
 0x1b8   : > { %s5799_s20 = sshll.u32 %s1375_s16, 3  ;;  %4196 = vmatprep.subr.bf16.mxu1 %v5285_v0  ;;  %s6228_s29 = smov 120  }
 0x1b9   : > { %s6224_s26 = smov 104   ;;  %s6299_s22 = sld [smem:[#allocation40_spill]] }
 0x1ba   : > { %s1377_s7 = scalar_lea.vmem %s6294_s5, %s5799_s20  ;;  %s6216_s16 = smov 80  }
 0x1bb   : > { %s6296_s2 = smov %s6295_s11  ;;  %v5805_v3 = vld [vmem:[%s1377_s7] sm:$0xff]  ;;  %4197 = vmatpush3.bf16.msra.mxu1 %v4665_v2  ;;  %s6214_s7 = smov 72  }
 0x1bc   : > { %v4666_v4 = vld [vmem:[%s6295_s11] sm:$0xff]   ;;  %v1406_v5 = vpack.c.bf16 %v5805_v3, %v5805_v3  ;;  %4202 = vmatprep.subr.bf16.mxu1 %v5285_v0  ;;  %v4667_v6 = vld [vmem:[%s6296_s2 + $0x8] sm:$0xff]   ;;  %s6222_s11 = smov 96   ;;  %s6316_s2 = smov 24  }
 0x1bd   : > { %v4033_v11 = vld [vmem:[%s6297_s1] ss:$0 sm:$0xff]  ;;  %s6210_s1 = smov 88   ;;  %s6317_s3 = sld [smem:[#allocation59_spill]] }
 0x1be   : > { %4199 = vmatmul.mubr.msk.bf16.vlgmr.msra.gmra.mrb[0].mxu1 %vm1430_vm1, %v1406_v5  ;;  %v4029_v12 = vld [vmem:[%s6298_s12] ss:$0 sm:$0xff]  ;;  %s6300_s12 = sld [smem:[#allocation47_spill]]  ;;  %s6318_s4 = sld [smem:[#allocation38_spill]] }
 0x1bf   : > { %4203 = vmatpush3.bf16.msra.mxu1 %v4666_v4  ;;  %4206 = vmatprep.mubr.msk.bf16.mxu1 %vm5286_vm0, %v5285_v0  ;;  %s1393_s18 = scalar_lea.vmem %s6299_s22, %s5799_s20  ;;  %s6212_s22 = smov 8  }
 0x1c0   : > { %4204 = vmatprep.subr.bf16.mxu1 %v5285_v0  ;;  %v1405_v31 = vld [vmem:[%s1393_s18] sm:$0xff]  ;;  %s6301_s18 = sld [smem:[#allocation39_spill]]  ;;  %s6319_s5 = sld [smem:[#allocation57_spill]] }
 0x1c1   : > { %p6326_p4 = scmp.ne.s32.totalorder %s6272_s28, 0 }
 0x1c3   : > { %4205 = vmatpush3.bf16.msra.mxu1 %v4667_v6 }
 0x1c4   : > { %4216 = vmatprep.subr.bf16.mxu1 %v5285_v0  ;;  %s1385_s6 = scalar_lea.vmem %s6318_s4, %s5799_s20  ;;  %s6321_s4 = smov 112  }
 0x1c6   : > { %4207 = vmatmul.mubr.msk.bf16.vlgmr.msra.gmra.mrb[4].mxu1 %vm1430_vm1, %v1406_v5 }
 0x1c7   : > { %4218 = vmatprep.mubr.msk.bf16.mxu1 %vm5286_vm0, %v5285_v0 }
 0x291   : > { %v1468_v7 = vpop.f32.mrb[0].mxu1 }
 0x292   : > { %v4200_v8 = vpop.f32.mrb[1].mxu1  ;;  %v1469_v17 = vadd.f32 %v4029_v12, %v1468_v7 }
 0x293   : > { %v1471_v9 = vpop.f32.mrb[2].mxu1 }
 0x294   : > { %v4201_v10 = vpop.f32.mrb[3].mxu1  ;;  %v1537_v21 = vpack.c.bf16 %v1469_v17, %v1469_v17 }
 0x299   : > { %v1531_v13 = vpop.f32.mrb[4].mxu1 }
 0x29a   : > { %v1532_v14 = vadd.f32 %v4033_v11, %v1531_v13  ;;  %v4208_v15 = vpop.f32.mrb[5].mxu1 }
 0x29b   : > { %v1534_v16 = vpop.f32.mrb[6].mxu1 }
 0x29c   : > { %v5823_v18 = vpack.c.bf16 %v1532_v14, %v1532_v14  ;;  %v4209_v19 = vpop.f32.mrb[7].mxu1 }
 0x29e   : > { %1768 = vrot.lane.b32.xlu1 %v5823_v18, %s6226_s23  ;;  %1652 = vrot.lane.b32.xlu0 %v5823_v18, %s6228_s29  ;;  %v1544_v20 = vsel %vm1539_vm2, %v5823_v18, 0 }
 0x29f   : > { %4211 = vmatpush3.bf16.xpose.msra.mxu0 %v1544_v20 }
 0x2a0   : > { %4222 = vmatprep.subr.bf16.mxu0 %v5285_v0 }
 0x2a2   : > { %1766 = vrot.lane.b32.xlu1 %v1537_v21, %s6226_s23  ;;  %1650 = vrot.lane.b32.xlu0 %v1537_v21, %s6228_s29 }
 0x2a6   : > { %1882 = vrot.lane.b32.xlu1 %v1537_v21, %s6224_s26  ;;  %1884 = vrot.lane.b32.xlu0 %v5823_v18, %s6224_s26 }
 0x2a7   : > { %4213 = vmatmul.mubr.msk.bf16.vlgmr.msra.gmra.mrb[0].mxu0 %vm1539_vm2, %v1537_v21 }
 0x2a8   : > { %4224 = vmatprep.mubr.msk.bf16.mxu0 %vm5286_vm0, %v5285_v0 }
 0x310   : > { %v1653_v22 = vpop.permute.xlu0 %1652  ;;  %v1769_v24 = vpop.permute.xlu1 %1768 }
 0x311   : > { %v1658_v23 = vsel %vm1539_vm2, %v1653_v22, 0  ;;  %v1774_v26 = vsel %vm1539_vm2, %v1769_v24, 0 }
 0x312   : > { %4223 = vmatpush3.bf16.xpose.msra.mxu0 %v1658_v23 }
 0x313   : > { %4234 = vmatprep.subr.bf16.mxu0 %v5285_v0 }
 0x314   : > { %v1651_v25 = vpop.permute.xlu0 %1650  ;;  %v1767_v28 = vpop.permute.xlu1 %1766 }
 0x318   : > { %v1885_v27 = vpop.permute.xlu0 %1884  ;;  %v1883_v30 = vpop.permute.xlu1 %1882 }
 0x319   : > { %4225 = vmatmul.mubr.msk.bf16.vlgmr.msra.gmra.mrb[4].mxu0 %vm1539_vm2, %v1651_v25  ;;  %v1890_v29 = vsel %vm1539_vm2, %v1885_v27, 0 }
 0x31a   : > { %4235 = vmatpush3.bf16.xpose.msra.mxu0 %v1774_v26  ;;  %4236 = vmatprep.mubr.msk.bf16.mxu0 %vm5286_vm0, %v5285_v0 }
 0x31b   : > { %4246 = vmatprep.subr.bf16.mxu0 %v5285_v0 }
 0x321   : > { %4237 = vmatmul.mubr.msk.bf16.vlgmr.msra.gmra.mrb[8].mxu0 %vm1539_vm2, %v1767_v28 }
 0x322   : > { %4247 = vmatpush3.bf16.xpose.msra.mxu0 %v1890_v29  ;;  %4248 = vmatprep.mubr.msk.bf16.mxu0 %vm5286_vm0, %v5285_v0 }
 0x323   : > { %4258 = vmatprep.subr.bf16.mxu0 %v5285_v0 }
 0x329   : > { %4249 = vmatmul.mubr.msk.bf16.vlgmr.msra.gmra.mrb[12].mxu0 %vm1539_vm2, %v1883_v30 }
 0x32a   : > { %4262 = vmatprep.mubr.msk.bf16.mxu0 %vm5286_vm0, %v5285_v0 }
 0x37a   : > { %v1580_v32 = vpop.f32.mrb[0].mxu0 }
 0x37b   : > { %v1581_v33 = vadd.f32 %v1580_v32, %v1405_v31  ;;  %v4214_v34 = vpop.f32.mrb[1].mxu0 }
 0x37c   : > { %v1583_v35 = vpop.f32.mrb[2].mxu0 }
 0x37d   : > { %v4215_v36 = vpop.f32.mrb[3].mxu0  ;;  %v1586_v37 = vsel %vm1539_vm2, %v1581_v33, -inf }
 0x37e   : > { %1587 = vmax.xlane.f32.xlu0 %v1586_v37 }
 0x3ec   : > { %v1694_v38 = vpop.f32.mrb[4].mxu0 }
 0x3ed   : > { %v1695_v39 = vadd.f32 %v1694_v38, %v1405_v31  ;;  %v4226_v40 = vpop.f32.mrb[5].mxu0 }
 0x3ee   : > { %v1697_v41 = vpop.f32.mrb[6].mxu0 }
 0x3ef   : > { %v4227_v42 = vpop.f32.mrb[7].mxu0  ;;  %v1700_v43 = vsel %vm1539_vm2, %v1695_v39, -inf }
 0x3f0   : > { %1701 = vmax.xlane.f32.xlu1 %v1700_v43 }
 0x3f4   : > { %v1810_v44 = vpop.f32.mrb[8].mxu0 }
 0x3f5   : > { %v1811_v45 = vadd.f32 %v1810_v44, %v1405_v31  ;;  %v4238_v46 = vpop.f32.mrb[9].mxu0 }
 0x3f6   : > { %v1813_v47 = vpop.f32.mrb[10].mxu0  ;;  %v4668_v46 = vld [vmem:[%s6300_s12] sm:$0xff]  }
 0x3f7   : > { %v4239_v48 = vpop.f32.mrb[11].mxu0  ;;  %v1816_v49 = vsel %vm1539_vm2, %v1811_v45, -inf  ;;  %4259 = vmatpush3.bf16.msra.mxu0 %v4668_v46  ;;  %v4669_v47 = vld [vmem:[%s6300_s12 + $0x8] sm:$0xff]  }
 0x3f8   : > { %1817 = vmax.xlane.f32.xlu0 %v1816_v49  ;;  %4260 = vmatprep.subr.bf16.mxu0 %v5285_v0 }
 0x3fb   : > { %4261 = vmatpush3.bf16.msra.mxu0 %v4669_v47 }
 0x3fc   : > { %v1926_v50 = vpop.f32.mrb[12].mxu0  ;;  %4274 = vmatprep.subr.bf16.mxu0 %v5285_v0 }
 0x3fd   : > { %v1927_v51 = vadd.f32 %v1926_v50, %v1405_v31  ;;  %v4250_v52 = vpop.f32.mrb[13].mxu0 }
 0x3fe   : > { %v1929_v53 = vpop.f32.mrb[14].mxu0  ;;  %v5296_v52 = vmov 0  }
 0x3ff   : > { %v4251_v54 = vpop.f32.mrb[15].mxu0  ;;  %v1932_v55 = vsel %vm1539_vm2, %v1927_v51, -inf  ;;  %4662 = vset.pattern.permute.xlu1 %v5296_v52  ;;  %4663 = vset.pattern.permute.xlu0 %v5296_v52 }
 0x400   : > { %1933 = vmax.xlane.f32.xlu0 %v1932_v55 }
 0x40b   : > { %v1588_v56 = vpop.xlane.xlu0 %1587 }
 0x40c   : > { %v1589_v57 = vsub.f32 %v1581_v33, %v1588_v56 }
 0x40e   : > { %v1590_v58 = vmul.f32 1.442695, %v1589_v57 }
 0x410   : > { %4688 = vpow2.f32 %v1590_v58 }
 0x41a   : > { %v4689_v59 = vpop.eup %4688 }
 0x41b   : > { %v1592_v60 = vsel %vm1539_vm2, %v4689_v59, 0.0 }
 0x41c   : > { %1593 = vadd.xlane.f32.xlu1 %v1592_v60 }
 0x42d   : > { %1599 = vrot.lane.b32.xlu1 %v5823_v18, %s6222_s11  ;;  %s6307_s11 = sld [smem:[#allocation50_spill]] }
 0x47d   : > { %v1702_v61 = vpop.xlane.xlu1 %1701 }
 0x47e   : > { %v1703_v62 = vsub.f32 %v1695_v39, %v1702_v61 }
 0x480   : > { %v1704_v63 = vmul.f32 1.442695, %v1703_v62 }
 0x482   : > { %4690 = vpow2.f32 %v1704_v63 }
 0x485   : > { %v1818_v1 = vpop.xlane.xlu0 %1817 }
 0x486   : > { %v1819_v2 = vsub.f32 %v1811_v45, %v1818_v1 }
 0x488   : > { %v1820_v4 = vmul.f32 1.442695, %v1819_v2 }
 0x48a   : > { %4692 = vpow2.f32 %v1820_v4 }
 0x48c   : > { %v4691_v5 = vpop.eup %4690 }
 0x48d   : > { %v1934_v6 = vpop.xlane.xlu0 %1933  ;;  %v1706_v7 = vsel %vm1539_vm2, %v4691_v5, 0.0 }
 0x48e   : > { %v1935_v8 = vsub.f32 %v1927_v51, %v1934_v6  ;;  %1707 = vadd.xlane.f32.xlu0 %v1706_v7 }
 0x490   : > { %v1936_v9 = vmul.f32 1.442695, %v1935_v8 }
 0x492   : > { %4694 = vpow2.f32 %v1936_v9 }
 0x494   : > { %v4693_v10 = vpop.eup %4692 }
 0x495   : > { %v1822_v11 = vsel %vm1539_vm2, %v4693_v10, 0.0 }
 0x496   : > { %1823 = vadd.xlane.f32.xlu1 %v1822_v11 }
 0x49c   : > { %v4695_v12 = vpop.eup %4694 }
 0x49d   : > { %v1938_v13 = vsel %vm1539_vm2, %v4695_v12, 0.0 }
 0x49e   : > { %1939 = vadd.xlane.f32.xlu0 %v1938_v13 }
 0x4a7   : > { %1828 = vrot.lane.b32.xlu1 %v5823_v18, %s6216_s16  ;;  %s6302_s16 = sld [smem:[#allocation48_spill]] }
 0x4a9   : > { %v1594_v14 = vpop.xlane.xlu1 %1593 }
 0x4aa   : > { %4696 = vrcp.f32 %v1594_v14 }
 0x4ab   : > { %1944 = vrot.lane.b32.xlu1 %v5823_v18, %s6214_s7  ;;  %s6218_s7 = smov 24  }
 0x4ad   : > { %v1600_v15 = vpop.permute.xlu1 %1599  ;;  %v4045_v63 = vld [vmem:[%s6302_s16] ss:$0 sm:$0xff]  ;;  %s6305_s16 = sld [smem:[#allocation51_spill]] }
 0x4ae   : > { %v1606_v16 = vsel %vm1604_vm3, %v1600_v15, 0 }
 0x4af   : > { %4217 = vmatpush3.bf16.msra.mxu1 %v1606_v16 }
 0x4b0   : > { %4228 = vmatprep.subr.bf16.mxu1 %v5285_v0 }
 0x4b4   : > { %v4697_v17 = vpop.eup %4696  ;;  %1712 = vrot.lane.b32.xlu0 %v5823_v18, %s6210_s1  ;;  %s6220_s1 = smov 16  }
 0x4b5   : > { %v1596_v19 = vmul.f32 %v4697_v17, %v4689_v59 }
 0x4b7   : > { %v1597_v20 = vpack.c.bf16 %v1596_v19, %v1596_v19 }
 0x4b9   : > { %4219 = vmatmul.mubr.msk.bf16.vlgmr.msra.gmra.mrb[8].mxu1 %vm1539_vm2, %v1597_v20  ;;  %v4672_v20 = vld [vmem:[%s6305_s16] sm:$0xff]  }
 0x4ba   : > { %4230 = vmatprep.mubr.msk.bf16.mxu1 %vm5286_vm0, %v5285_v0 }
 0x51b   : > { %v1708_v21 = vpop.xlane.xlu0 %1707 }
 0x51c   : > { %4698 = vrcp.f32 %v1708_v21  ;;  %v4673_v21 = vld [vmem:[%s6305_s16 + $0x8] sm:$0xff]  }
 0x523   : > { %v1824_v22 = vpop.xlane.xlu1 %1823 }
 0x524   : > { %4700 = vrcp.f32 %v1824_v22 }
 0x526   : > { %v4699_v23 = vpop.eup %4698 }
 0x527   : > { %v1710_v25 = vmul.f32 %v4699_v23, %v4691_v5  ;;  %v1829_v28 = vpop.permute.xlu1 %1828 }
 0x528   : > { %v1834_v30 = vsel %vm1604_vm3, %v1829_v28, 0  ;;  %v4050_v28 = vld [vmem:[%s6307_s11] ss:$0 sm:$0xff]  ;;  %s6308_s11 = sld [smem:[#allocation41_spill]] }
 0x529   : > { %v1711_v18 = vpack.c.bf16 %v1710_v25, %v1710_v25 }
 0x52b   : > { %v1940_v24 = vpop.xlane.xlu0 %1939  ;;  %v1945_v32 = vpop.permute.xlu1 %1944 }
 0x52c   : > { %4702 = vrcp.f32 %v1940_v24  ;;  %v1950_v35 = vsel %vm1604_vm3, %v1945_v32, 0 }
 0x52e   : > { %v4701_v29 = vpop.eup %4700 }
 0x52f   : > { %v1713_v26 = vpop.permute.xlu0 %1712  ;;  %v1826_v31 = vmul.f32 %v4701_v29, %v4693_v10 }
 0x530   : > { %v1718_v27 = vsel %vm1604_vm3, %v1713_v26, 0 }
 0x531   : > { %4229 = vmatpush3.bf16.msra.mxu1 %v1718_v27  ;;  %v1827_v33 = vpack.c.bf16 %v1826_v31, %v1826_v31  ;;  %v4055_v31 = vld [vmem:[#allocation6] ss:$0 sm:$0xff] }
 0x532   : > { %4240 = vmatprep.subr.bf16.mxu1 %v5285_v0 }
 0x534   : > { %4231 = vmatmul.mubr.msk.bf16.vlgmr.msra.gmra.mrb[12].mxu1 %vm1539_vm2, %v1711_v18 }
 0x535   : > { %4241 = vmatpush3.bf16.msra.mxu1 %v1834_v30  ;;  %4242 = vmatprep.mubr.msk.bf16.mxu1 %vm5286_vm0, %v5285_v0 }
 0x536   : > { %4252 = vmatprep.subr.bf16.mxu1 %v5285_v0  ;;  %v4703_v34 = vpop.eup %4702 }
 0x537   : > { %v1942_v36 = vmul.f32 %v4703_v34, %v4695_v12 }
 0x539   : > { %v1943_v37 = vpack.c.bf16 %v1942_v36, %v1942_v36 }
 0x53c   : > { %4243 = vmatmul.mubr.msk.bf16.vlgmr.msra.gmra.mrb[16].mxu1 %vm1539_vm2, %v1827_v33 }
 0x53d   : > { %4253 = vmatpush3.bf16.msra.mxu1 %v1950_v35  ;;  %4254 = vmatprep.mubr.msk.bf16.mxu1 %vm5286_vm0, %v5285_v0 }
 0x53e   : > { %4266 = vmatprep.subr.bf16.mxu1 %v5285_v0 }
 0x544   : > { %4255 = vmatmul.mubr.msk.bf16.vlgmr.msra.gmra.mrb[20].mxu1 %vm1539_vm2, %v1943_v37 }
 0x545   : > { %4270 = vmatprep.mubr.msk.bf16.mxu1 %vm5286_vm0, %v5285_v0  ;;  %4267 = vmatpush3.bf16.msra.mxu1 %v4672_v20 }
 0x546   : > { %4268 = vmatprep.subr.bf16.mxu1 %v5285_v0 }
 0x549   : > { %4269 = vmatpush3.bf16.msra.mxu1 %v4673_v21 }
 0x54a   : > { %4282 = vmatprep.subr.bf16.mxu1 %v5285_v0 }
 0x58c   : > { %v1642_v38 = vpop.f32.mrb[8].mxu1 }
 0x58d   : > { %1648 = vst.msk [vmem:[#allocation2] sm:$0xff] %vm1539_vm2, %v1642_v38  ;;  %v4220_v39 = vpop.f32.mrb[9].mxu1 }
 0x58e   : > { %v1645_v40 = vpop.f32.mrb[10].mxu1  ;;  %v4051_v39 = vld [vmem:[#allocation3] ss:$0 sm:$0xff] }
 0x58f   : > { %v4221_v41 = vpop.f32.mrb[11].mxu1 }
 0x607   : > { %v1754_v42 = vpop.f32.mrb[12].mxu1 }
 0x608   : > { %1761 = vrot.lane.b32.xlu0 %v1754_v42, %s6212_s22  ;;  %v4232_v43 = vpop.f32.mrb[13].mxu1  ;;  %s1389_s22 = scalar_lea.vmem %s6301_s18, %s5799_s20  ;;  %s6304_s18 = sld [smem:[#allocation37_spill]] }
 0x609   : > { %v1757_v44 = vpop.f32.mrb[14].mxu1  ;;  %v1403_v53 = vld [vmem:[%s1389_s22] sm:$0xff]  ;;  %s6303_s22 = sld [smem:[#allocation52_spill]] }
 0x60a   : > { %v4233_v45 = vpop.f32.mrb[15].mxu1 }
 0x60f   : > { %v1870_v48 = vpop.f32.mrb[16].mxu1  ;;  %v4670_v16 = vld [vmem:[%s6303_s22] sm:$0xff]   ;;  %v4671_v17 = vld [vmem:[%s6303_s22 + $0x8] sm:$0xff]  }
 0x610   : > { %1877 = vrot.lane.b32.xlu1 %v1870_v48, %s6220_s1  ;;  %v4244_v49 = vpop.f32.mrb[17].mxu1  ;;  %s6306_s1 = sld [smem:[#allocation49_spill]] }
 0x611   : > { %v1873_v50 = vpop.f32.mrb[18].mxu1 }
 0x612   : > { %v4245_v51 = vpop.f32.mrb[19].mxu1 }
 0x614   : > { %2068 = vperm.xlu1 %4662, %v1403_v53  }
 0x616   : > { %v4049_v26 = vld [vmem:[%s6306_s1] ss:$0 sm:$0xff]  ;;  %s6309_s1 = smov 96  }
 0x617   : > { %v1986_v54 = vpop.f32.mrb[20].mxu1 }
 0x618   : > { %1993 = vrot.lane.b32.xlu0 %v1986_v54, %s6218_s7  ;;  %v4256_v55 = vpop.f32.mrb[21].mxu1  ;;  %s1381_s7 = scalar_lea.vmem %s6304_s18, %s5799_s20  ;;  %s6310_s18 = smov 80  }
 0x619   : > { %v1989_v56 = vpop.f32.mrb[22].mxu1 }
 0x61a   : > { %v4257_v57 = vpop.f32.mrb[23].mxu1 }
 0x67a   : > { %v1762_v58 = vpop.permute.xlu0 %1761 }
 0x67b   : > { %1765 = vst.msk [vmem:[#allocation2] sm:$0xff] %vm1764_vm4, %v1762_v58 }
 0x682   : > { %v1878_v59 = vpop.permute.xlu1 %1877 }
 0x683   : > { %1881 = vst.msk [vmem:[#allocation2] sm:$0xff] %vm1880_vm5, %v1878_v59 }
 0x68a   : > { %v1994_v60 = vpop.permute.xlu0 %1993 }
 0x68b   : > { %1997 = vst.msk [vmem:[#allocation2] sm:$0xff] %vm1996_vm6, %v1994_v60 }
 0x692   : > { %v1998_v61 = vld [vmem:[#allocation2] sm:$0xff] }
 0x693   : > { %v1999_v62 = vpack.c.bf16 %v1998_v61, %v1998_v61  ;;  %v5910_v2 = vpop.permute.xlu1 %2068 }
 0x695   : > { %4263 = vmatmul.mubr.msk.bf16.vlgmr.msra.gmra.mrb[16].mxu0 %vm1430_vm1, %v1999_v62 }
 0x696   : > { %4278 = vmatprep.mubr.msk.bf16.mxu0 %vm5286_vm0, %v5285_v0  ;;  %4275 = vmatpush3.bf16.msra.mxu0 %v4670_v16 }
 0x697   : > { %4276 = vmatprep.subr.bf16.mxu0 %v5285_v0 }
 0x69a   : > { %4277 = vmatpush3.bf16.msra.mxu0 %v4671_v17 }
 0x69b   : > { %4288 = vmatprep.subr.bf16.mxu0 %v5285_v0 }
 0x768   : > { %v2060_v1 = vpop.f32.mrb[16].mxu0 }
 0x769   : > { %v2061_v4 = vadd.f32 %v4045_v63, %v2060_v1  ;;  %v4264_v5 = vpop.f32.mrb[17].mxu0 }
 0x76a   : > { %v2063_v6 = vpop.f32.mrb[18].mxu0 }
 0x76b   : > { %v4265_v7 = vpop.f32.mrb[19].mxu0  ;;  %v2071_v8 = vmul.f32 %v5910_v2, %v2061_v4 }
 0x76d   : > { %v2072_v9 = vadd.f32 %v2071_v8, %v5805_v3  ;;  %v2103_v3 = vld [vmem:[%s1381_s7] sm:$0xff]  ;;  %s1397_s7 = scalar_lea.vmem %s6308_s11, %s5799_s20  ;;  %s6311_s11 = smov 72  }
 0x76e   : > { %v2172_v19 = vpack.c.bf16 %v2103_v3, %v2103_v3  ;;  %v2104_v55 = vld [vmem:[%s1397_s7] sm:$0xff]  ;;  %s6312_s7 = smov 88  }
 0x76f   : > { %v2075_v10 = vsel %vm1430_vm1, %v2072_v9, 0.0 }
 0x770   : > { %2076 = vadd.xlane.f32.xlu0 %v2075_v10  ;;  %4279 = vmatmul.mubr.msk.bf16.vlgmr.msra.gmra.mrb[20].mxu0 %vm1430_vm1, %v2172_v19 }
 0x771   : > { %4290 = vmatprep.mubr.msk.bf16.mxu0 %vm5286_vm0, %v5285_v0 }
 0x7fd   : > { %v2077_v11 = vpop.xlane.xlu0 %2076 }
 0x7fe   : > { %v2079_v12 = vmul.f32 0.03125, %v2077_v11 }
 0x800   : > { %v2080_v13 = vsub.f32 %v2072_v9, %v2079_v12 }
 0x802   : > { %v2081_v14 = vmul.f32 %v2080_v13, %v2080_v13 }
 0x804   : > { %v2082_v15 = vsel %vm1430_vm1, %v2081_v14, 0.0 }
 0x805   : > { %2083 = vadd.xlane.f32.xlu1 %v2082_v15 }
 0x843   : > { %v2233_v32 = vpop.f32.mrb[20].mxu0 }
 0x844   : > { %v2234_v33 = vadd.f32 %v4055_v31, %v2233_v32  ;;  %v4280_v34 = vpop.f32.mrb[21].mxu0 }
 0x845   : > { %v2236_v35 = vpop.f32.mrb[22].mxu0 }
 0x846   : > { %v5938_v36 = vpack.c.bf16 %v2234_v33, %v2234_v33  ;;  %v4281_v37 = vpop.f32.mrb[23].mxu0 }
 0x848   : > { %2352 = vrot.lane.b32.xlu0 %v5938_v36, %s6228_s29  ;;  %v2245_v38 = vsel %vm1539_vm2, %v5938_v36, 0 }
 0x84c   : > { %2467 = vrot.lane.b32.xlu0 %v5938_v36, %s6226_s23 }
 0x850   : > { %2582 = vrot.lane.b32.xlu0 %v5938_v36, %s6224_s26 }
 0x892   : > { %v2084_v22 = vpop.xlane.xlu1 %2083 }
 0x893   : > { %v2085_v23 = vmul.f32 0.03125, %v2084_v22 }
 0x895   : > { %v2086_v24 = vadd.f32 1e-05, %v2085_v23 }
 0x897   : > { %4704 = vrsqrt.f32 %v2086_v24 }
 0x8a1   : > { %v4705_v25 = vpop.eup %4704 }
 0x8a2   : > { %v2088_v27 = vmul.f32 %v4705_v25, %v2080_v13 }
 0x8a4   : > { %v2095_v18 = vmul.f32 %v4049_v26, %v2088_v27 }
 0x8a6   : > { %v5931_v29 = vadd.f32 %v4050_v28, %v2095_v18 }
 0x8a8   : > { %v2105_v30 = vpack.c.bf16 %v5931_v29, %v5931_v29 }
 0x8aa   : > { %4271 = vmatmul.mubr.msk.bf16.vlgmr.msra.gmra.mrb[24].mxu1 %vm1430_vm1, %v2105_v30 }
 0x8ab   : > { %4284 = vmatprep.mubr.msk.bf16.mxu1 %vm5286_vm0, %v5285_v0  ;;  %4283 = vmatpush3.bf16.xpose.msra.mxu1 %v2245_v38 }
 0x8ac   : > { %4294 = vmatprep.subr.bf16.mxu1 %v5285_v0 }
 0x8ba   : > { %v2353_v44 = vpop.permute.xlu0 %2352 }
 0x8bb   : > { %v2358_v47 = vsel %vm1539_vm2, %v2353_v44, 0 }
 0x8be   : > { %v2468_v48 = vpop.permute.xlu0 %2467 }
 0x8bf   : > { %v2473_v50 = vsel %vm1539_vm2, %v2468_v48, 0 }
 0x8c2   : > { %v2583_v51 = vpop.permute.xlu0 %2582 }
 0x8c3   : > { %v2588_v53 = vsel %vm1539_vm2, %v2583_v51, 0 }
 0x97d   : > { %v2166_v40 = vpop.f32.mrb[24].mxu1 }
 0x97e   : > { %v2167_v41 = vadd.f32 %v4051_v39, %v2166_v40  ;;  %v4272_v42 = vpop.f32.mrb[25].mxu1 }
 0x97f   : > { %v2169_v43 = vpop.f32.mrb[26].mxu1 }
 0x980   : > { %v2239_v45 = vpack.c.bf16 %v2167_v41, %v2167_v41  ;;  %v4273_v46 = vpop.f32.mrb[27].mxu1 }
 0x982   : > { %2350 = vrot.lane.b32.xlu1 %v2239_v45, %s6228_s29  ;;  %4285 = vmatmul.mubr.msk.bf16.vlgmr.msra.gmra.mrb[28].mxu1 %vm1539_vm2, %v2239_v45  ;;  %s6315_s29 = smov 16  }
 0x983   : > { %4295 = vmatpush3.bf16.xpose.msra.mxu1 %v2358_v47  ;;  %4296 = vmatprep.mubr.msk.bf16.mxu1 %vm5286_vm0, %v5285_v0 }
 0x984   : > { %4306 = vmatprep.subr.bf16.mxu1 %v5285_v0 }
 0x986   : > { %2465 = vrot.lane.b32.xlu1 %v2239_v45, %s6226_s23  ;;  %s6314_s23 = smov 8  }
 0x98a   : > { %2580 = vrot.lane.b32.xlu1 %v2239_v45, %s6224_s26  ;;  %s6313_s26 = sld [smem:[#allocation54_spill]] }
 0x9f4   : > { %v2351_v49 = vpop.permute.xlu1 %2350 }
 0x9f5   : > { %4297 = vmatmul.mubr.msk.bf16.vlgmr.msra.gmra.mrb[32].mxu1 %vm1539_vm2, %v2351_v49 }
 0x9f6   : > { %4307 = vmatpush3.bf16.xpose.msra.mxu1 %v2473_v50  ;;  %4308 = vmatprep.mubr.msk.bf16.mxu1 %vm5286_vm0, %v5285_v0 }
 0x9f7   : > { %4318 = vmatprep.subr.bf16.mxu1 %v5285_v0 }
 0x9f8   : > { %v2466_v52 = vpop.permute.xlu1 %2465 }
 0x9fc   : > { %v2581_v54 = vpop.permute.xlu1 %2580 }
 0x9fd   : > { %4309 = vmatmul.mubr.msk.bf16.vlgmr.msra.gmra.mrb[36].mxu1 %vm1539_vm2, %v2466_v52 }
 0x9fe   : > { %4319 = vmatpush3.bf16.xpose.msra.mxu1 %v2588_v53  ;;  %4320 = vmatprep.mubr.msk.bf16.mxu1 %vm5286_vm0, %v5285_v0 }
 0x9ff   : > { %4330 = vmatprep.subr.bf16.mxu1 %v5285_v0 }
 0xa05   : > { %4321 = vmatmul.mubr.msk.bf16.vlgmr.msra.gmra.mrb[40].mxu1 %vm1539_vm2, %v2581_v54 }
 0xa06   : > { %4334 = vmatprep.mubr.msk.bf16.mxu1 %vm5286_vm0, %v5285_v0 }
 0xa55   : > { %v2281_v56 = vpop.f32.mrb[28].mxu1 }
 0xa56   : > { %v2282_v57 = vadd.f32 %v2281_v56, %v2104_v55  ;;  %v4286_v58 = vpop.f32.mrb[29].mxu1 }
 0xa57   : > { %v2284_v59 = vpop.f32.mrb[30].mxu1 }
 0xa58   : > { %v4287_v60 = vpop.f32.mrb[31].mxu1  ;;  %v2287_v61 = vsel %vm1539_vm2, %v2282_v57, -inf }
 0xa59   : > { %2288 = vmax.xlane.f32.xlu0 %v2287_v61 }
 0xac8   : > { %v2394_v62 = vpop.f32.mrb[32].mxu1 }
 0xac9   : > { %v2395_v63 = vadd.f32 %v2394_v62, %v2104_v55  ;;  %v4298_v1 = vpop.f32.mrb[33].mxu1 }
 0xaca   : > { %v2397_v4 = vpop.f32.mrb[34].mxu1 }
 0xacb   : > { %v4299_v5 = vpop.f32.mrb[35].mxu1  ;;  %v2400_v6 = vsel %vm1539_vm2, %v2395_v63, -inf }
 0xacc   : > { %2401 = vmax.xlane.f32.xlu1 %v2400_v6 }
 0xad0   : > { %v2509_v7 = vpop.f32.mrb[36].mxu1 }
 0xad1   : > { %v2510_v8 = vadd.f32 %v2509_v7, %v2104_v55  ;;  %v4310_v9 = vpop.f32.mrb[37].mxu1 }
 0xad2   : > { %v2512_v10 = vpop.f32.mrb[38].mxu1 }
 0xad3   : > { %v4311_v11 = vpop.f32.mrb[39].mxu1  ;;  %v2515_v12 = vsel %vm1539_vm2, %v2510_v8, -inf  ;;  %v4674_v10 = vld [vmem:[%s6313_s26] sm:$0xff]  }
 0xad4   : > { %2516 = vmax.xlane.f32.xlu0 %v2515_v12  ;;  %4331 = vmatpush3.bf16.msra.mxu1 %v4674_v10  ;;  %v4675_v11 = vld [vmem:[%s6313_s26 + $0x8] sm:$0xff]  }
 0xad5   : > { %4332 = vmatprep.subr.bf16.mxu1 %v5285_v0 }
 0xad8   : > { %v2624_v13 = vpop.f32.mrb[40].mxu1  ;;  %4333 = vmatpush3.bf16.msra.mxu1 %v4675_v11 }
 0xad9   : > { %v2625_v14 = vadd.f32 %v2624_v13, %v2104_v55  ;;  %v4322_v15 = vpop.f32.mrb[41].mxu1  ;;  %4346 = vmatprep.subr.bf16.mxu1 %v5285_v0 }
 0xada   : > { %v2627_v16 = vpop.f32.mrb[42].mxu1 }
 0xadb   : > { %v4323_v17 = vpop.f32.mrb[43].mxu1  ;;  %v2630_v3 = vsel %vm1539_vm2, %v2625_v14, -inf }
 0xadc   : > { %2631 = vmax.xlane.f32.xlu0 %v2630_v3 }
 0xae6   : > { %v2289_v19 = vpop.xlane.xlu0 %2288 }
 0xae7   : > { %v2290_v20 = vsub.f32 %v2282_v57, %v2289_v19 }
 0xae9   : > { %v2291_v21 = vmul.f32 1.442695, %v2290_v20 }
 0xaeb   : > { %4706 = vpow2.f32 %v2291_v21 }
 0xaf5   : > { %v4707_v22 = vpop.eup %4706 }
 0xaf6   : > { %v2293_v23 = vsel %vm1539_vm2, %v4707_v22, 0.0 }
 0xaf7   : > { %2294 = vadd.xlane.f32.xlu1 %v2293_v23 }
 0xb08   : > { %2300 = vrot.lane.b32.xlu1 %v5938_v36, %s6309_s1 }
 0xb59   : > { %v2402_v24 = vpop.xlane.xlu1 %2401 }
 0xb5a   : > { %v2403_v25 = vsub.f32 %v2395_v63, %v2402_v24 }
 0xb5c   : > { %v2404_v26 = vmul.f32 1.442695, %v2403_v25  ;;  %v4067_v25 = vld [vmem:[#allocation8] ss:$0 sm:$0xff] }
 0xb5e   : > { %4708 = vpow2.f32 %v2404_v26 }
 0xb61   : > { %v2517_v27 = vpop.xlane.xlu0 %2516 }
 0xb62   : > { %v2518_v28 = vsub.f32 %v2510_v8, %v2517_v27 }
 0xb64   : > { %v2519_v18 = vmul.f32 1.442695, %v2518_v28 }
 0xb66   : > { %4710 = vpow2.f32 %v2519_v18 }
 0xb68   : > { %v4709_v30 = vpop.eup %4708 }
 0xb69   : > { %v2632_v31 = vpop.xlane.xlu0 %2631  ;;  %v2406_v32 = vsel %vm1539_vm2, %v4709_v30, 0.0 }
 0xb6a   : > { %v2633_v33 = vsub.f32 %v2625_v14, %v2632_v31  ;;  %2407 = vadd.xlane.f32.xlu0 %v2406_v32 }
 0xb6c   : > { %v2634_v34 = vmul.f32 1.442695, %v2633_v33 }
 0xb6e   : > { %4712 = vpow2.f32 %v2634_v34 }
 0xb70   : > { %v4711_v35 = vpop.eup %4710 }
 0xb71   : > { %v2521_v37 = vsel %vm1539_vm2, %v4711_v35, 0.0 }
 0xb72   : > { %2522 = vadd.xlane.f32.xlu1 %v2521_v37 }
 0xb78   : > { %v4713_v38 = vpop.eup %4712 }
 0xb79   : > { %v2636_v39 = vsel %vm1539_vm2, %v4713_v38, 0.0 }
 0xb7a   : > { %2637 = vadd.xlane.f32.xlu0 %v2636_v39 }
 0xb83   : > { %2527 = vrot.lane.b32.xlu1 %v5938_v36, %s6310_s18 }
 0xb84   : > { %v2295_v40 = vpop.xlane.xlu1 %2294 }
 0xb85   : > { %4714 = vrcp.f32 %v2295_v40  ;;  %v4676_v40 = vld [vmem:[%s6317_s3] sm:$0xff]  }
 0xb87   : > { %2642 = vrot.lane.b32.xlu1 %v5938_v36, %s6311_s11 }
 0xb88   : > { %v2301_v41 = vpop.permute.xlu1 %2300 }
 0xb89   : > { %v2306_v42 = vsel %vm1604_vm3, %v2301_v41, 0  ;;  %v4677_v41 = vld [vmem:[%s6317_s3 + $0x8] sm:$0xff]   ;;  %s6322_s3 = smov 104  }
 0xb8a   : > { %4289 = vmatpush3.bf16.msra.mxu0 %v2306_v42 }
 0xb8b   : > { %4300 = vmatprep.subr.bf16.mxu0 %v5285_v0 }
 0xb8f   : > { %v4715_v43 = vpop.eup %4714 }
 0xb90   : > { %v2297_v44 = vmul.f32 %v4715_v43, %v4707_v22  ;;  %2412 = vrot.lane.b32.xlu0 %v5938_v36, %s6312_s7  ;;  %v4678_v43 = vld [vmem:[%s6319_s5] sm:$0xff]  }
 0xb92   : > { %v2298_v45 = vpack.c.bf16 %v2297_v44, %v2297_v44  ;;  %v4679_v44 = vld [vmem:[%s6319_s5 + $0x8] sm:$0xff]  }
 0xb94   : > { %4291 = vmatmul.mubr.msk.bf16.vlgmr.msra.gmra.mrb[24].mxu0 %vm1539_vm2, %v2298_v45 }
 0xb95   : > { %4302 = vmatprep.mubr.msk.bf16.mxu0 %vm5286_vm0, %v5285_v0 }
 0xbf7   : > { %v2408_v46 = vpop.xlane.xlu0 %2407 }
 0xbf8   : > { %4716 = vrcp.f32 %v2408_v46 }
 0xbff   : > { %v2523_v47 = vpop.xlane.xlu1 %2522 }
 0xc00   : > { %4718 = vrcp.f32 %v2523_v47 }
 0xc02   : > { %v4717_v48 = vpop.eup %4716 }
 0xc03   : > { %v2410_v50 = vmul.f32 %v4717_v48, %v4709_v30  ;;  %v2528_v53 = vpop.permute.xlu1 %2527 }
 0xc04   : > { %v2533_v55 = vsel %vm1604_vm3, %v2528_v53, 0 }
 0xc05   : > { %v2411_v36 = vpack.c.bf16 %v2410_v50, %v2410_v50 }
 0xc07   : > { %v2638_v49 = vpop.xlane.xlu0 %2637  ;;  %v2643_v57 = vpop.permute.xlu1 %2642 }
 0xc08   : > { %4720 = vrcp.f32 %v2638_v49  ;;  %v2648_v60 = vsel %vm1604_vm3, %v2643_v57, 0  ;;  %v4071_v49 = vld [vmem:[#allocation9] ss:$0 sm:$0xff] }
 0xc0a   : > { %v4719_v54 = vpop.eup %4718 }
 0xc0b   : > { %v2413_v51 = vpop.permute.xlu0 %2412  ;;  %v2525_v56 = vmul.f32 %v4719_v54, %v4711_v35  ;;  %v4077_v54 = vld [vmem:[#allocation14] ss:$0 sm:$0xff] }
 0xc0c   : > { %v2418_v52 = vsel %vm1604_vm3, %v2413_v51, 0  ;;  %v4072_v51 = vld [vmem:[#allocation11] ss:$0 sm:$0xff] }
 0xc0d   : > { %4301 = vmatpush3.bf16.msra.mxu0 %v2418_v52  ;;  %v2526_v58 = vpack.c.bf16 %v2525_v56, %v2525_v56 }
 0xc0e   : > { %4312 = vmatprep.subr.bf16.mxu0 %v5285_v0 }
 0xc10   : > { %4303 = vmatmul.mubr.msk.bf16.vlgmr.msra.gmra.mrb[28].mxu0 %vm1539_vm2, %v2411_v36 }
 0xc11   : > { %4313 = vmatpush3.bf16.msra.mxu0 %v2533_v55  ;;  %4314 = vmatprep.mubr.msk.bf16.mxu0 %vm5286_vm0, %v5285_v0 }
 0xc12   : > { %4324 = vmatprep.subr.bf16.mxu0 %v5285_v0  ;;  %v4721_v59 = vpop.eup %4720 }
 0xc13   : > { %v2640_v61 = vmul.f32 %v4721_v59, %v4713_v38 }
 0xc15   : > { %v2641_v62 = vpack.c.bf16 %v2640_v61, %v2640_v61 }
 0xc18   : > { %4315 = vmatmul.mubr.msk.bf16.vlgmr.msra.gmra.mrb[32].mxu0 %vm1539_vm2, %v2526_v58 }
 0xc19   : > { %4325 = vmatpush3.bf16.msra.mxu0 %v2648_v60  ;;  %4326 = vmatprep.mubr.msk.bf16.mxu0 %vm5286_vm0, %v5285_v0 }
 0xc1a   : > { %4338 = vmatprep.subr.bf16.mxu0 %v5285_v0 }
 0xc20   : > { %4327 = vmatmul.mubr.msk.bf16.vlgmr.msra.gmra.mrb[36].mxu0 %vm1539_vm2, %v2641_v62  ;;  %v4073_v62 = vld [vmem:[#allocation12] ss:$0 sm:$0xff] }
 0xc21   : > { %4342 = vmatprep.mubr.msk.bf16.mxu0 %vm5286_vm0, %v5285_v0  ;;  %4339 = vmatpush3.bf16.msra.mxu0 %v4678_v43 }
 0xc22   : > { %4340 = vmatprep.subr.bf16.mxu0 %v5285_v0 }
 0xc25   : > { %4341 = vmatpush3.bf16.msra.mxu0 %v4679_v44 }
 0xc26   : > { %4354 = vmatprep.subr.bf16.mxu0 %v5285_v0 }
 0xc67   : > { %v2342_v63 = vpop.f32.mrb[24].mxu0 }
 0xc68   : > { %2348 = vst.msk [vmem:[#allocation2] sm:$0xff] %vm1539_vm2, %v2342_v63  ;;  %v4292_v1 = vpop.f32.mrb[25].mxu0 }
 0xc69   : > { %v2345_v4 = vpop.f32.mrb[26].mxu0 }
 0xc6a   : > { %v4293_v5 = vpop.f32.mrb[27].mxu0 }
 0xce3   : > { %v2454_v6 = vpop.f32.mrb[28].mxu0 }
 0xce4   : > { %2461 = vrot.lane.b32.xlu0 %v2454_v6, %s6314_s23  ;;  %v4304_v7 = vpop.f32.mrb[29].mxu0 }
 0xce5   : > { %v2457_v8 = vpop.f32.mrb[30].mxu0 }
 0xce6   : > { %v4305_v9 = vpop.f32.mrb[31].mxu0 }
 0xceb   : > { %v2569_v12 = vpop.f32.mrb[32].mxu0 }
 0xcec   : > { %2576 = vrot.lane.b32.xlu1 %v2569_v12, %s6315_s29  ;;  %v4316_v13 = vpop.f32.mrb[33].mxu0 }
 0xced   : > { %v2572_v14 = vpop.f32.mrb[34].mxu0 }
 0xcee   : > { %v4317_v15 = vpop.f32.mrb[35].mxu0 }
 0xcf3   : > { %v2684_v16 = vpop.f32.mrb[36].mxu0 }
 0xcf4   : > { %2691 = vrot.lane.b32.xlu0 %v2684_v16, %s6316_s2  ;;  %v4328_v17 = vpop.f32.mrb[37].mxu0 }
 0xcf5   : > { %v2687_v3 = vpop.f32.mrb[38].mxu0 }
 0xcf6   : > { %v4329_v19 = vpop.f32.mrb[39].mxu0 }
 0xd56   : > { %v2462_v20 = vpop.permute.xlu0 %2461 }
 0xd57   : > { %2464 = vst.msk [vmem:[#allocation2] sm:$0xff] %vm1764_vm4, %v2462_v20 }
 0xd5e   : > { %v2577_v21 = vpop.permute.xlu1 %2576 }
 0xd5f   : > { %2579 = vst.msk [vmem:[#allocation2] sm:$0xff] %vm1880_vm5, %v2577_v21 }
 0xd66   : > { %v2692_v22 = vpop.permute.xlu0 %2691 }
 0xd67   : > { %2694 = vst.msk [vmem:[#allocation2] sm:$0xff] %vm1996_vm6, %v2692_v22 }
 0xd6e   : > { %v2695_v23 = vld [vmem:[#allocation2] sm:$0xff] }
 0xd6f   : > { %v2696_v24 = vpack.c.bf16 %v2695_v23, %v2695_v23 }
 0xd71   : > { %4335 = vmatmul.mubr.msk.bf16.vlgmr.msra.gmra.mrb[44].mxu1 %vm1430_vm1, %v2696_v24 }
 0xd72   : > { %4350 = vmatprep.mubr.msk.bf16.mxu1 %vm5286_vm0, %v5285_v0  ;;  %4347 = vmatpush3.bf16.msra.mxu1 %v4676_v40 }
 0xd73   : > { %4348 = vmatprep.subr.bf16.mxu1 %v5285_v0 }
 0xd76   : > { %4349 = vmatpush3.bf16.msra.mxu1 %v4677_v41 }
 0xd77   : > { %4360 = vmatprep.subr.bf16.mxu1 %v5285_v0 }
 0xe44   : > { %v2757_v26 = vpop.f32.mrb[44].mxu1 }
 0xe45   : > { %v2758_v27 = vadd.f32 %v4067_v25, %v2757_v26  ;;  %v4336_v28 = vpop.f32.mrb[45].mxu1 }
 0xe46   : > { %v2760_v18 = vpop.f32.mrb[46].mxu1 }
 0xe47   : > { %v2763_v30 = vmul.f32 %v2758_v27, %v5910_v2  ;;  %v4337_v31 = vpop.f32.mrb[47].mxu1 }
 0xe49   : > { %v2764_v32 = vadd.f32 %v2763_v30, %v5931_v29  ;;  %v2794_v29 = vld [vmem:[%s1385_s6] sm:$0xff]  ;;  %s6320_s6 = smov 120  }
 0xe4a   : > { %v2863_v42 = vpack.c.bf16 %v2794_v29, %v2794_v29 }
 0xe4b   : > { %v2767_v33 = vsel %vm1430_vm1, %v2764_v32, 0.0 }
 0xe4c   : > { %2768 = vadd.xlane.f32.xlu1 %v2767_v33  ;;  %4351 = vmatmul.mubr.msk.bf16.vlgmr.msra.gmra.mrb[48].mxu1 %vm1430_vm1, %v2863_v42 }
 0xe4d   : > { %4362 = vmatprep.mubr.msk.bf16.mxu1 %vm5286_vm0, %v5285_v0 }
 0xed9   : > { %v2769_v34 = vpop.xlane.xlu1 %2768 }
 0xeda   : > { %v2770_v35 = vmul.f32 0.03125, %v2769_v34 }
 0xedc   : > { %v2771_v37 = vsub.f32 %v2764_v32, %v2770_v35 }
 0xede   : > { %v2772_v38 = vmul.f32 %v2771_v37, %v2771_v37 }
 0xee0   : > { %v2773_v39 = vsel %vm1430_vm1, %v2772_v38, 0.0 }
 0xee1   : > { %2774 = vadd.xlane.f32.xlu0 %v2773_v39 }
 0xf1f   : > { %v2924_v55 = vpop.f32.mrb[48].mxu1 }
 0xf20   : > { %v2925_v56 = vadd.f32 %v4077_v54, %v2924_v55  ;;  %v4352_v57 = vpop.f32.mrb[49].mxu1 }
 0xf21   : > { %v2927_v58 = vpop.f32.mrb[50].mxu1 }
 0xf22   : > { %v6046_v59 = vpack.c.bf16 %v2925_v56, %v2925_v56  ;;  %v4353_v60 = vpop.f32.mrb[51].mxu1 }
 0xf24   : > { %3043 = vrot.lane.b32.xlu0 %v6046_v59, %s6320_s6  ;;  %v2936_v61 = vsel %vm1539_vm2, %v6046_v59, 0 }
 0xf6e   : > { %v2775_v45 = vpop.xlane.xlu0 %2774 }
 0xf6f   : > { %v2776_v46 = vmul.f32 0.03125, %v2775_v45 }
 0xf71   : > { %v2777_v47 = vadd.f32 1e-05, %v2776_v46 }
 0xf73   : > { %4722 = vrsqrt.f32 %v2777_v47 }
 0xf7d   : > { %v4723_v48 = vpop.eup %4722 }
 0xf7e   : > { %v2779_v50 = vmul.f32 %v4723_v48, %v2771_v37 }
 0xf80   : > { %v2786_v52 = vmul.f32 %v4071_v49, %v2779_v50 }
 0xf82   : > { %v6039_v53 = vadd.f32 %v4072_v51, %v2786_v52 }
 0xf84   : > { %v2796_v36 = vpack.c.bf16 %v6039_v53, %v6039_v53 }
 0xf86   : > { %4343 = vmatmul.mubr.msk.bf16.vlgmr.msra.gmra.mrb[40].mxu0 %vm1430_vm1, %v2796_v36 }
 0xf87   : > { %4356 = vmatprep.mubr.msk.bf16.mxu0 %vm5286_vm0, %v5285_v0  ;;  %4355 = vmatpush3.bf16.xpose.msra.mxu0 %v2936_v61 }
 0xf88   : > { %4366 = vmatprep.subr.bf16.mxu0 %v5285_v0 }
 0xf96   : > { %v3044_v5 = vpop.permute.xlu0 %3043 }
 0xf97   : > { %v3049_v9 = vsel %vm1539_vm2, %v3044_v5, 0 }
0x1059   : > { %v2857_v63 = vpop.f32.mrb[40].mxu0 }
0x105a   : > { %v2858_v1 = vadd.f32 %v4073_v62, %v2857_v63  ;;  %v4344_v4 = vpop.f32.mrb[41].mxu0 }
0x105b   : > { %v2860_v6 = vpop.f32.mrb[42].mxu0 }
0x105c   : > { %v2930_v7 = vpack.c.bf16 %v2858_v1, %v2858_v1  ;;  %v4345_v8 = vpop.f32.mrb[43].mxu0 }
0x105e   : > { %3156 = vrot.lane.b32.xlu0 %v2930_v7, %s6321_s4  ;;  %3041 = vrot.lane.b32.xlu1 %v2930_v7, %s6320_s6  ;;  %s6323_s6 = sld [smem:[#allocation42_spill]] }
0x105f   : > { %4357 = vmatmul.mubr.msk.bf16.vlgmr.msra.gmra.mrb[44].mxu0 %vm1539_vm2, %v2930_v7 }
0x1060   : > { %4367 = vmatpush3.bf16.xpose.msra.mxu0 %v3049_v9  ;;  %4368 = vmatprep.mubr.msk.bf16.mxu0 %vm5286_vm0, %v5285_v0 }
0x1061   : > { %4378 = vmatprep.subr.bf16.mxu0 %v5285_v0 }
0x1062   : > { %3271 = vrot.lane.b32.xlu0 %v2930_v7, %s6322_s3  ;;  %3158 = vrot.lane.b32.xlu1 %v6046_v59, %s6321_s4 }
0x1066   : > { %3273 = vrot.lane.b32.xlu1 %v6046_v59, %s6322_s3  ;;  %s1401_s3 = scalar_lea.vmem %s6323_s6, %s5799_s20  ;;  %s6325_s20 = sld [smem:[#allocation62_spill]] }
0x1067   : > { %v2795_v17 = vld [vmem:[%s1401_s3] sm:$0xff] }
0x10d0   : > { %v3042_v10 = vpop.permute.xlu1 %3041  ;;  %v3157_v14 = vpop.permute.xlu0 %3156 }
0x10d1   : > { %4369 = vmatmul.mubr.msk.bf16.vlgmr.msra.gmra.mrb[48].mxu0 %vm1539_vm2, %v3042_v10 }
0x10d2   : > { %4380 = vmatprep.mubr.msk.bf16.mxu0 %vm5286_vm0, %v5285_v0 }
0x10d4   : > { %v3159_v11 = vpop.permute.xlu1 %3158  ;;  %v3272_v16 = vpop.permute.xlu0 %3271 }
0x10d5   : > { %v3164_v12 = vsel %vm1539_vm2, %v3159_v11, 0 }
0x10d6   : > { %4379 = vmatpush3.bf16.xpose.msra.mxu0 %v3164_v12 }
0x10d7   : > { %4390 = vmatprep.subr.bf16.mxu0 %v5285_v0 }
0x10d8   : > { %v3274_v13 = vpop.permute.xlu1 %3273 }
0x10d9   : > { %v3279_v15 = vsel %vm1539_vm2, %v3274_v13, 0 }
0x10dd   : > { %4381 = vmatmul.mubr.msk.bf16.vlgmr.msra.gmra.mrb[52].mxu0 %vm1539_vm2, %v3157_v14 }
0x10de   : > { %4391 = vmatpush3.bf16.xpose.msra.mxu0 %v3279_v15  ;;  %4392 = vmatprep.mubr.msk.bf16.mxu0 %vm5286_vm0, %v5285_v0 }
0x10df   : > { %4402 = vmatprep.subr.bf16.mxu0 %v5285_v0 }
0x10e5   : > { %4393 = vmatmul.mubr.msk.bf16.vlgmr.msra.gmra.mrb[56].mxu0 %vm1539_vm2, %v3272_v16 }
0x10e6   : > { %4406 = vmatprep.mubr.msk.bf16.mxu0 %vm5286_vm0, %v5285_v0 }
0x1132   : > { %v2972_v3 = vpop.f32.mrb[44].mxu0 }
0x1133   : > { %v2973_v19 = vadd.f32 %v2972_v3, %v2795_v17  ;;  %v4358_v20 = vpop.f32.mrb[45].mxu0 }
0x1134   : > { %v2975_v21 = vpop.f32.mrb[46].mxu0 }
0x1135   : > { %v4359_v22 = vpop.f32.mrb[47].mxu0  ;;  %v2978_v23 = vsel %vm1539_vm2, %v2973_v19, -inf }
0x1136   : > { %2979 = vmax.xlane.f32.xlu1 %v2978_v23 }
0x11a4   : > { %v3085_v24 = vpop.f32.mrb[48].mxu0 }
0x11a5   : > { %v3086_v25 = vadd.f32 %v3085_v24, %v2795_v17  ;;  %v4370_v26 = vpop.f32.mrb[49].mxu0 }
0x11a6   : > { %v3088_v27 = vpop.f32.mrb[50].mxu0 }
0x11a7   : > { %v4371_v28 = vpop.f32.mrb[51].mxu0  ;;  %v3091_v18 = vsel %vm1539_vm2, %v3086_v25, -inf }
0x11a8   : > { %3092 = vmax.xlane.f32.xlu0 %v3091_v18 }
0x11b0   : > { %v3200_v30 = vpop.f32.mrb[52].mxu0 }
0x11b1   : > { %v3201_v31 = vadd.f32 %v3200_v30, %v2795_v17  ;;  %v4382_v32 = vpop.f32.mrb[53].mxu0 }
0x11b2   : > { %v3203_v33 = vpop.f32.mrb[54].mxu0 }
0x11b3   : > { %v4383_v34 = vpop.f32.mrb[55].mxu0  ;;  %v3206_v35 = vsel %vm1539_vm2, %v3201_v31, -inf  ;;  %v4680_v33 = vld [vmem:[#allocation15] sm:$0xff]  }
0x11b4   : > { %3207 = vmax.xlane.f32.xlu0 %v3206_v35  ;;  %4403 = vmatpush3.bf16.msra.mxu0 %v4680_v33  ;;  %v4681_v34 = vld [vmem:[#allocation15 + $0x8] sm:$0xff]  }
0x11b5   : > { %4404 = vmatprep.subr.bf16.mxu0 %v5285_v0 }
0x11b8   : > { %v3315_v37 = vpop.f32.mrb[56].mxu0  ;;  %4405 = vmatpush3.bf16.msra.mxu0 %v4681_v34 }
0x11b9   : > { %v3316_v38 = vadd.f32 %v3315_v37, %v2795_v17  ;;  %v4394_v39 = vpop.f32.mrb[57].mxu0  ;;  %4418 = vmatprep.subr.bf16.mxu0 %v5285_v0 }
0x11ba   : > { %v3318_v40 = vpop.f32.mrb[58].mxu0 }
0x11bb   : > { %v4395_v41 = vpop.f32.mrb[59].mxu0  ;;  %v3321_v29 = vsel %vm1539_vm2, %v3316_v38, -inf }
0x11bc   : > { %3322 = vmax.xlane.f32.xlu1 %v3321_v29 }
0x11c3   : > { %v2980_v42 = vpop.xlane.xlu1 %2979 }
0x11c4   : > { %v2981_v43 = vsub.f32 %v2973_v19, %v2980_v42 }
0x11c6   : > { %v2982_v44 = vmul.f32 1.442695, %v2981_v43 }
0x11c8   : > { %4724 = vpow2.f32 %v2982_v44 }
0x11d2   : > { %v4725_v45 = vpop.eup %4724 }
0x11d3   : > { %v2984_v46 = vsel %vm1539_vm2, %v4725_v45, 0.0 }
0x11d4   : > { %2985 = vadd.xlane.f32.xlu0 %v2984_v46 }
0x1235   : > { %v3093_v47 = vpop.xlane.xlu0 %3092 }
0x1236   : > { %v3094_v48 = vsub.f32 %v3086_v25, %v3093_v47 }
0x1238   : > { %v3095_v49 = vmul.f32 1.442695, %v3094_v48  ;;  %v4089_v48 = vld [vmem:[#allocation17] ss:$0 sm:$0xff] }
0x123a   : > { %4726 = vpow2.f32 %v3095_v49 }
0x1241   : > { %v3208_v50 = vpop.xlane.xlu0 %3207 }
0x1242   : > { %v3209_v51 = vsub.f32 %v3201_v31, %v3208_v50 }
0x1244   : > { %v4727_v52 = vpop.eup %4726  ;;  %v3210_v36 = vmul.f32 1.442695, %v3209_v51 }
0x1245   : > { %v3097_v54 = vsel %vm1539_vm2, %v4727_v52, 0.0 }
0x1246   : > { %4728 = vpow2.f32 %v3210_v36  ;;  %3098 = vadd.xlane.f32.xlu1 %v3097_v54 }
0x1249   : > { %v3323_v57 = vpop.xlane.xlu1 %3322 }
0x124a   : > { %v3324_v58 = vsub.f32 %v3316_v38, %v3323_v57 }
0x124c   : > { %v3325_v60 = vmul.f32 1.442695, %v3324_v58 }
0x124e   : > { %4730 = vpow2.f32 %v3325_v60 }
0x1250   : > { %v4729_v55 = vpop.eup %4728 }
0x1251   : > { %v3212_v56 = vsel %vm1539_vm2, %v4729_v55, 0.0 }
0x1252   : > { %3213 = vadd.xlane.f32.xlu0 %v3212_v56 }
0x1257   : > { %3103 = vrot.lane.b32.xlu1 %v6046_v59, %s6312_s7 }
0x1258   : > { %v4731_v61 = vpop.eup %4730 }
0x1259   : > { %v3327_v62 = vsel %vm1539_vm2, %v4731_v61, 0.0 }
0x1261   : > { %v2986_v63 = vpop.xlane.xlu0 %2985 }
0x1262   : > { %4732 = vrcp.f32 %v2986_v63 }
0x1268   : > { %2991 = vrot.lane.b32.xlu0 %v6046_v59, %s6309_s1  ;;  %s4108_s1 = sshll.u32 %s5515_s0, 7  ;;  %s5298_s0 = smov [#allocation26]  }
0x1269   : > { %s6150_s7 = scalar_lea.hbm %s5492_s8, %s4108_s1  ;;  %s5140_s3 = sshll.u32 %s5298_s0, 4  ;;  %s5141_s3 = int_to_ptr.vmem [resolvable:$false] %s5140_s3 }
0x126c   : > { %3333 = vrot.lane.b32.xlu0 %v6046_v59, %s6311_s11  ;;  %v4733_v4 = vpop.eup %4732 }
0x126d   : > { %v2988_v6 = vmul.f32 %v4733_v4, %v4725_v45  ;;  %v4684_v4 = vld [vmem:[%s6325_s20] sm:$0xff]  }
0x126f   : > { %v2989_v10 = vpack.c.bf16 %v2988_v6, %v2988_v6 }
0x127b   : > { %3328 = vadd.xlane.f32.xlu1 %v3327_v62 }
0x128c   : > { %3218 = vrot.lane.b32.xlu1 %v6046_v59, %s6310_s18 }
0x12d3   : > { %v3099_v1 = vpop.xlane.xlu1 %3098 }
0x12d4   : > { %4734 = vrcp.f32 %v3099_v1 }
0x12d7   : > { %v3104_v9 = vpop.permute.xlu1 %3103 }
0x12d8   : > { %v3109_v12 = vsel %vm1604_vm3, %v3104_v9, 0  ;;  %v4093_v9 = vld [vmem:[#allocation18] ss:$0 sm:$0xff] }
0x12de   : > { %v4735_v11 = vpop.eup %4734 }
0x12df   : > { %v3214_v5 = vpop.xlane.xlu0 %3213  ;;  %v3101_v59 = vmul.f32 %v4735_v11, %v4727_v52  ;;  %v4094_v11 = vld [vmem:[#allocation20] ss:$0 sm:$0xff] }
0x12e0   : > { %4736 = vrcp.f32 %v3214_v5 }
0x12e1   : > { %v3102_v13 = vpack.c.bf16 %v3101_v59, %v3101_v59 }
0x12e3   : > { %v2992_v7 = vpop.permute.xlu0 %2991 }
0x12e4   : > { %v2997_v8 = vsel %vm1604_vm3, %v2992_v7, 0 }
0x12e5   : > { %4361 = vmatpush3.bf16.msra.mxu1 %v2997_v8 }
0x12e6   : > { %4372 = vmatprep.subr.bf16.mxu1 %v5285_v0 }
0x12e7   : > { %v3334_v19 = vpop.permute.xlu0 %3333 }
0x12e8   : > { %4363 = vmatmul.mubr.msk.bf16.vlgmr.msra.gmra.mrb[52].mxu1 %vm1539_vm2, %v2989_v10  ;;  %v3339_v21 = vsel %vm1604_vm3, %v3334_v19, 0 }
0x12e9   : > { %4373 = vmatpush3.bf16.msra.mxu1 %v3109_v12  ;;  %4374 = vmatprep.mubr.msk.bf16.mxu1 %vm5286_vm0, %v5285_v0 }
0x12ea   : > { %4384 = vmatprep.subr.bf16.mxu1 %v5285_v0  ;;  %v4737_v14 = vpop.eup %4736 }
0x12eb   : > { %v3216_v16 = vmul.f32 %v4737_v14, %v4729_v55  ;;  %v4686_v14 = vld [vmem:[%s6325_s20 + $0x10] sm:$0xff]  }
0x12ed   : > { %v3217_v20 = vpack.c.bf16 %v3216_v16, %v3216_v16  ;;  %v4095_v16 = vld [vmem:[#allocation21] ss:$0 sm:$0xff] }
0x12f0   : > { %4375 = vmatmul.mubr.msk.bf16.vlgmr.msra.gmra.mrb[56].mxu1 %vm1539_vm2, %v3102_v13 }
0x12f1   : > { %4386 = vmatprep.mubr.msk.bf16.mxu1 %vm5286_vm0, %v5285_v0 }
0x1308   : > { %v3329_v15 = vpop.xlane.xlu1 %3328 }
0x1309   : > { %4738 = vrcp.f32 %v3329_v15  ;;  %v4687_v15 = vld [vmem:[%s6325_s20 + $0x18] sm:$0xff]  }
0x130c   : > { %v3219_v17 = vpop.permute.xlu1 %3218 }
0x130d   : > { %v3224_v3 = vsel %vm1604_vm3, %v3219_v17, 0 }
0x130e   : > { %4385 = vmatpush3.bf16.msra.mxu1 %v3224_v3 }
0x130f   : > { %4396 = vmatprep.subr.bf16.mxu1 %v5285_v0 }
0x1311   : > { %4387 = vmatmul.mubr.msk.bf16.vlgmr.msra.gmra.mrb[60].mxu1 %vm1539_vm2, %v3217_v20 }
0x1312   : > { %4397 = vmatpush3.bf16.msra.mxu1 %v3339_v21  ;;  %4398 = vmatprep.mubr.msk.bf16.mxu1 %vm5286_vm0, %v5285_v0 }
0x1313   : > { %v4739_v22 = vpop.eup %4738  ;;  %4410 = vmatprep.subr.bf16.mxu1 %v5285_v0 }
0x1314   : > { %v3331_v23 = vmul.f32 %v4739_v22, %v4731_v61 }
0x1316   : > { %v3332_v24 = vpack.c.bf16 %v3331_v23, %v3331_v23 }
0x1319   : > { %4399 = vmatmul.mubr.msk.bf16.vlgmr.msra.gmra.mrb[64].mxu1 %vm1539_vm2, %v3332_v24 }
0x131a   : > { %4414 = vmatprep.mubr.msk.bf16.mxu1 %vm5286_vm0, %v5285_v0 }
0x13bb   : > { %v3033_v25 = vpop.f32.mrb[52].mxu1 }
0x13bc   : > { %3039 = vst.msk [vmem:[#allocation2] sm:$0xff] %vm1539_vm2, %v3033_v25  ;;  %v4364_v26 = vpop.f32.mrb[53].mxu1  ;;  %v4099_v25 = vld [vmem:[#allocation23] ss:$0 sm:$0xff] }
0x13bd   : > { %v3036_v27 = vpop.f32.mrb[54].mxu1 }
0x13be   : > { %v4365_v28 = vpop.f32.mrb[55].mxu1 }
0x13c3   : > { %v3145_v18 = vpop.f32.mrb[56].mxu1 }
0x13c4   : > { %3152 = vrot.lane.b32.xlu1 %v3145_v18, %s6314_s23  ;;  %v4376_v30 = vpop.f32.mrb[57].mxu1  ;;  %s1371_s23 = sand.u32 1, %s5222_s10  }
0x13c5   : > { %v3148_v31 = vpop.f32.mrb[58].mxu1  ;;  %s3672_s4 = scalar_lea.sflag [#allocation5], %s1371_s23 }
0x13c6   : > { %v4377_v32 = vpop.f32.mrb[59].mxu1 }
0x13e4   : > { %v3260_v35 = vpop.f32.mrb[60].mxu1 }
0x13e5   : > { %3267 = vrot.lane.b32.xlu0 %v3260_v35, %s6315_s29  ;;  %v4388_v37 = vpop.f32.mrb[61].mxu1  ;;  %s4021_s29 = sshll.u32 %s1371_s23, 3 }
0x13e6   : > { %v3263_v38 = vpop.f32.mrb[62].mxu1  ;;  %s1373_s18 = scalar_lea.vmem [#allocation26], %s4021_s29  ;;  %s5142_s29 = scalar_lea.vmem %s5141_s3, 256 }
0x13e7   : > { %v4389_v39 = vpop.f32.mrb[63].mxu1  ;;  %s3685_s11 = sshll.u32 %s1373_s18, 4  ;;  %s6152_s11 = int_to_ptr.vmem [resolvable:$true] %s3685_s11 }
0x13e8   : > { %s5136_s6 = scalar_lea.vmem %s6152_s11, 128  ;;  %p5143_p6 = scmp.lt.s32.totalorder %s6152_s11, %s5141_s3 }
0x13e9   : > { %p5137_p3 = scmp.ne.s32.totalorder %s6152_s11, %s5136_s6  ;;  %p5144_p9 = scmp.lt.s32.totalorder %s5142_s29, %s5136_s6 }
0x13eb   : > { %p5138_p12 = pnand %p5137_p3, %p6326_p4  ;;  %p5145_p10 = por %p5144_p9, %p5143_p6 }
0x13ec   : > { %v3375_v40 = vpop.f32.mrb[64].mxu1 }
0x13ed   : > { %3382 = vrot.lane.b32.xlu1 %v3375_v40, %s6316_s2  ;;  %v4400_v41 = vpop.f32.mrb[65].mxu1  ;;  %s6324_s2 = sld [smem:[#allocation61_spill]]  ;;  %p5139_p5 = pneg %p5138_p12 }
0x13ee   : > { %v3378_v29 = vpop.f32.mrb[66].mxu1 }
0x13ef   : > { %v4401_v42 = vpop.f32.mrb[67].mxu1  ;;  %v4105_v29 = vld [vmem:[%s5482_s24] ss:$0 sm:$0xff]  ;;  %p5146_p7 = pnand %p5145_p10, %p5139_p5 }
0x13f3   : > { %v4682_v63 = vld [vmem:[%s6324_s2] sm:$0xff]   ;;  %v4683_v1 = vld [vmem:[%s6324_s2 + $0x8] sm:$0xff]  }
0x13f4   : > { %4411 = vmatpush3.bf16.msra.mxu1 %v4682_v63 }
0x13f5   : > { %4412 = vmatprep.subr.bf16.mxu1 %v5285_v0 }
0x13f8   : > { %4413 = vmatpush3.bf16.msra.mxu1 %v4683_v1 }
0x1436   : > { %v3153_v43 = vpop.permute.xlu1 %3152 }
0x1437   : > { %3155 = vst.msk [vmem:[#allocation2] sm:$0xff] %vm1764_vm4, %v3153_v43  ;;  %v4106_v43 = vld [vmem:[#allocation24] ss:$0 sm:$0xff] }
0x1457   : > { %v3268_v44 = vpop.permute.xlu0 %3267 }
0x1458   : > { %3270 = vst.msk [vmem:[#allocation2] sm:$0xff] %vm1880_vm5, %v3268_v44 }
0x145f   : > { %v3383_v45 = vpop.permute.xlu1 %3382 }
0x1460   : > { %3385 = vst.msk [vmem:[#allocation2] sm:$0xff] %vm1996_vm6, %v3383_v45 }
0x1467   : > { %v3386_v46 = vld [vmem:[#allocation2] sm:$0xff] }
0x1468   : > { %v3387_v47 = vpack.c.bf16 %v3386_v46, %v3386_v46 }
0x146a   : > { %4407 = vmatmul.mubr.msk.bf16.vlgmr.msra.gmra.mrb[60].mxu0 %vm1430_vm1, %v3387_v47 }
0x146b   : > { %4426 = vmatprep.mubr.msk.bf16.mxu0 %vm5286_vm0, %v5285_v0  ;;  %4419 = vmatpush3.bf16.msra.mxu0 %v4684_v4 }
0x146c   : > { %4420 = vmatprep.subr.bf16.mxu0 %v5285_v0 }
0x153d   : > { %v3448_v49 = vpop.f32.mrb[60].mxu0 }
0x153e   : > { %v3449_v50 = vadd.f32 %v4089_v48, %v3448_v49  ;;  %v4408_v51 = vpop.f32.mrb[61].mxu0 }
0x153f   : > { %v3451_v52 = vpop.f32.mrb[62].mxu0 }
0x1540   : > { %v3454_v36 = vmul.f32 %v3449_v50, %v5910_v2  ;;  %v4409_v54 = vpop.f32.mrb[63].mxu0 }
0x1542   : > { %v3455_v55 = vadd.f32 %v3454_v36, %v6039_v53  ;;  %v4685_v53 = vld [vmem:[%s6325_s20 + $0x8] sm:$0xff]  }
0x1543   : > { %4421 = vmatpush3.bf16.msra.mxu0 %v4685_v53 }
0x1544   : > { %v3458_v56 = vsel %vm1430_vm1, %v3455_v55, 0.0  ;;  %4422 = vmatprep.subr.bf16.mxu0 %v5285_v0 }
0x1545   : > { %3459 = vadd.xlane.f32.xlu0 %v3458_v56 }
0x1547   : > { %4423 = vmatpush3.bf16.msra.mxu0 %v4686_v14 }
0x1548   : > { %4424 = vmatprep.subr.bf16.mxu0 %v5285_v0 }
0x154b   : > { %4425 = vmatpush3.bf16.msra.mxu0 %v4687_v15 }
0x15d2   : > { %v3460_v57 = vpop.xlane.xlu0 %3459 }
0x15d3   : > { %v3461_v58 = vmul.f32 0.03125, %v3460_v57 }
0x15d5   : > { %v3462_v60 = vsub.f32 %v3455_v55, %v3461_v58 }
0x15d7   : > { %v3463_v61 = vmul.f32 %v3462_v60, %v3462_v60 }
0x15d9   : > { %v3464_v62 = vsel %vm1430_vm1, %v3463_v61, 0.0 }
0x15da   : > { %3465 = vadd.xlane.f32.xlu1 %v3464_v62 }
0x1667   : > { %v3466_v5 = vpop.xlane.xlu1 %3465 }
0x1668   : > { %v3467_v6 = vmul.f32 0.03125, %v3466_v5 }
0x166a   : > { %v3468_v7 = vadd.f32 1e-05, %v3467_v6 }
0x166c   : > { %4740 = vrsqrt.f32 %v3468_v7 }
0x1676   : > { %v4741_v8 = vpop.eup %4740 }
0x1677   : > { %v3470_v10 = vmul.f32 %v4741_v8, %v3462_v60 }
0x1679   : > { %v3477_v12 = vmul.f32 %v4093_v9, %v3470_v10 }
0x167b   : > { %v3484_v59 = vadd.f32 %v4094_v11, %v3477_v12 }
0x167d   : > { %v3485_v13 = vpack.c.bf16 %v3484_v59, %v3484_v59 }
0x167f   : > { %4415 = vmatmul.mubr.msk.bf16.vlgmr.msra.gmra.mrb[68].mxu1 %vm1430_vm1, %v3485_v13 }
0x1752   : > { %v3546_v17 = vpop.f32.mrb[68].mxu1 }
0x1753   : > { %v3547_v3 = vadd.f32 %v4095_v16, %v3546_v17  ;;  %v4416_v19 = vpop.f32.mrb[69].mxu1 }
0x1754   : > { %v3549_v20 = vpop.f32.mrb[70].mxu1 }
0x1755   : > { %vm3552_vm7 = vcmp.ge.f32.partialorder %v3547_v3, 0.0  ;;  %v3553_v21 = vmul.f32 0.01, %v3547_v3  ;;  %v4417_v22 = vpop.f32.mrb[71].mxu1 }
0x1757   : > { %v3554_v23 = vsel %vm3552_vm7, %v3547_v3, %v3553_v21 }
0x1758   : > { %v3555_v24 = vpack.c.bf16 %v3554_v23, %v3554_v23 }
0x175a   : > { %4427 = vmatmul.mubr.msk.bf16.vlgmr.msra.gmra.mrb[64].mxu0 %vm3595_vm8, %v3555_v24 }
0x182d   : > { %v3633_v26 = vpop.f32.mrb[64].mxu0 }
0x182e   : > { %v3634_v27 = vadd.f32 %v4099_v25, %v3633_v26  ;;  %v4428_v28 = vpop.f32.mrb[65].mxu0 }
0x182f   : > { %v3636_v18 = vpop.f32.mrb[66].mxu0 }
0x1830   : > { %v3639_v0 = vmul.f32 %v3634_v27, %v5910_v2  ;;  %v4429_v30 = vpop.f32.mrb[67].mxu0 }
0x1832   : > { %v3640_v31 = vadd.f32 %v3639_v0, %v3484_v59 }
0x1834   : > { %v3643_v32 = vsel %vm1430_vm1, %v3640_v31, 0.0 }
0x1835   : > { %3644 = vadd.xlane.f32.xlu0 %v3643_v32 }
0x18c2   : > { %v3645_v33 = vpop.xlane.xlu0 %3644 }
0x18c3   : > { %v3646_v34 = vmul.f32 0.03125, %v3645_v33 }
0x18c5   : > { %v3647_v35 = vsub.f32 %v3640_v31, %v3646_v34 }
0x18c7   : > { %v3648_v37 = vmul.f32 %v3647_v35, %v3647_v35 }
0x18c9   : > { %v3649_v38 = vsel %vm1430_vm1, %v3648_v37, 0.0 }
0x18ca   : > { %3650 = vadd.xlane.f32.xlu0 %v3649_v38 }
0x1957   : > { %v3651_v39 = vpop.xlane.xlu0 %3650 }
0x1958   : > { %v3652_v40 = vmul.f32 0.03125, %v3651_v39 }
0x195a   : > { %v3653_v41 = vadd.f32 1e-05, %v3652_v40 }
0x195c   : > { %4742 = vrsqrt.f32 %v3653_v41 }
0x1966   : > { %v4743_v2 = vpop.eup %4742 }
0x1967   : > { %v3655_v42 = vmul.f32 %v4743_v2, %v3647_v35 }
0x1969   : > { %v3662_v44 = vmul.f32 %v4105_v29, %v3655_v42 }
0x196b   : > { %v3669_v45 = vadd.f32 %v4106_v43, %v3662_v44 }
0x196d   : > { %3670 = vst.msk [vmem:[%s1373_s18] sm:$0xff] %vm1430_vm1, %v3669_v45 }
0x196e   : > { %5149 = shalt.err (!%p5146_p7)
}
0x196f   : > { %s5150_s23 = scalar_lea.hbm %s6150_s7, 128  ;;  %s5154_s1 = scalar_lea.hbm %s5492_s8, 256 }
0x1970   : > { %p5151_p8 = scmp.ne.s32.totalorder %s6150_s7, %s5150_s23  ;;  %p5155_p1 = scmp.lt.u32.totalorder %s6150_s7, %s5492_s8 }
0x1971   : > { %p5156_p0 = scmp.lt.u32.totalorder %s5154_s1, %s5150_s23  ;;  %p5158_p3 = scmp.lt.u32.totalorder %s5150_s23, %s6150_s7 }
0x1972   : > { %p5152_p11 = pnand %p5151_p8, %p6326_p4 }
0x1973   : > { %p5157_p2 = por %p5156_p0, %p5155_p1 }
0x1974   : > { %p5153_p13 = pneg %p5152_p11 }
0x1975   : > { %p5159_p12 = por %p5158_p3, %p5157_p2 }
0x1977   : > { %p5160_p5 = pnand %p5159_p12, %p5153_p13 }
0x1979   : > { %5163 = shalt.err (!%p5160_p5)
}
0x197a   : > { %4486 = dma.vmem_to_hbm [thread:$0]  (%p6326_p4), %s6152_s11, 128, %s6150_s7, %s3672_s4  }
0x197b PF: > { %s6327_s18 = sld [smem:[#allocation63_spill]]  ;;  %s6328_s6 = sld [smem:[#allocation67_spill]] }
0x197c   : > { %p4563_p6 = scmp.ge.s32.totalorder %s5230_s15, 2 }
0x1981   : > { %s3697_s0 = sand.u32 1, %s6327_s18   ;;  %p6329_p9 = scmp.ne.s32.totalorder %s6328_s6, 0 }
0x1982   : > { %s3698_s3 = scalar_lea.sflag [#allocation5], %s3697_s0 }
0x1983   : > { %p4532_p10 = pnand %p4563_p6, %p6329_p9 }
0x1985   : > { %5213 = dma.done.wait (!%p4532_p10), %s3698_s3, 128  }
0x1986   : > { %5215 = vsyncadd (!%p4532_p10), %s3698_s3, 4294967168  ;;  %s6330_s15 = sld [smem:[#allocation65_spill]]  ;;  %s6331_s29 = sld [smem:[#allocation64_spill]] }
0x1987   : > { %s6332_s11 = sld [smem:[#allocation66_spill]]  ;;  %s6333_s7 = smov %s5222_s10 }
0x198c   : > { %p93_p7 = scmp.ge.s32.totalorder %s6330_s15, 4   ;;  %s6334_s10 = smov %s6331_s29 }
0x198e   :  { %95 = sbr.rel (!%p93_p7) target bundleno = 78 (0x4e), region = 315 }
0x1995   :  { %3703 = vsyncpa [#allocation4], 1 }
0x1996   :  { %3705 = vsyncpa [#allocation4 + $0x1], 1 }
0x1997   :  { %3706 = vsyncpa [#allocation7], 1 }
0x1998   :  { %3707 = vsyncpa [#allocation10], 1 }
0x1999   :  { %3708 = vsyncpa [#allocation13], 1 }
0x199a   :  { %3709 = vsyncpa [#allocation16], 1 }
0x199b   :  { %3710 = vsyncpa [#allocation19], 1 }
0x199c   :  { %3711 = vsyncpa [#allocation22], 1 }
0x199d   :  { %3712 = vsyncpa [#allocation25], 1 }
0x199e   :  { %3713 = vsyncpa [#allocation5], 1 }
0x199f   :  { %3715 = vsyncpa [#allocation5 + $0x1], 1 }

</bundles_post_ra>
